<compile_context>
chip_gen: v7x
topology: tpu7x:2x2x1
jax: 0.10.0
libtpu: 0.0.40
codegen_flags: <defaults>
</compile_context>

<pallas_src>
import numpy as np
import jax
import jax.numpy as jnp
from jax import lax
from jax.experimental import pallas as pl
from jax.experimental.pallas import tpu as pltpu

_EPS = 1e-5                       # PyTorch BatchNorm2d default eps
_VMEM_LIMIT = 48 * 1024 * 1024    # > v6e 32 MiB default scoped limit, < v7x 64 MiB


def _dot(a, b):
    # Default MXU precision (fast bf16 pass), f32 accumulation.
    return jnp.dot(a, b, preferred_element_type=jnp.float32)


def _dot_t(a, b):
    # a @ b.T via dot_general (no transpose op): channel Gram matrices, f32 accumulation.
    return lax.dot_general(a, b, (((1,), (1,)), ((), ())),
                           preferred_element_type=jnp.float32)


def _cparams(*sem):
    return pltpu.CompilerParams(dimension_semantics=sem,
                                vmem_limit_bytes=_VMEM_LIMIT)


def _round_up(x, m):
    return (x + m - 1) // m * m


def _pick_pixel_tile(p, max_tile=2048):
    """Largest 128-multiple divisor of p that is <= max_tile (else p itself)."""
    best = None
    t = 128
    while t <= min(p, max_tile):
        if p % t == 0:
            best = t
        t += 128
    return best if best is not None else p


def _pick_channel_tile(c, per_channel_bytes, budget=4 << 20):
    """Largest divisor of c whose per-step FFT working set fits the budget."""
    for tc in range(c, 0, -1):
        if c % tc == 0 and tc * per_channel_bytes <= budget:
            return tc
    return 1


# ----------------------------- Pallas kernels -----------------------------

def _gram_kernel(x_ref, gram_ref, sum_ref):
    """Per-channel sum and channel Gram matrix (X X^T), accumulated over (n, pixel-tile)."""
    @pl.when(jnp.logical_and(pl.program_id(0) == 0, pl.program_id(1) == 0))
    def _():
        gram_ref[...] = jnp.zeros_like(gram_ref)
        sum_ref[...] = jnp.zeros_like(sum_ref)

    xn = x_ref[0]                                     # (Cin, TP) f32
    gram_ref[...] += _dot_t(xn, xn)
    sum_ref[...] += jnp.sum(xn, axis=1, keepdims=True)


def _gram2_kernel(sr_ref, si_ref, grr_ref, gri_ref, gii_ref, rsum_ref, isum_ref):
    """Spectrum BN stats: Gram blocks / sums of the [real; imag] channels."""
    @pl.when(jnp.logical_and(pl.program_id(0) == 0, pl.program_id(1) == 0))
    def _():
        for r in (grr_ref, gri_ref, gii_ref, rsum_ref, isum_ref):
            r[...] = jnp.zeros_like(r)

    re, im = sr_ref[0], si_ref[0]                     # (C, TPf) bf16, MXU-native
    grr_ref[...] += _dot_t(re, re)
    gri_ref[...] += _dot_t(re, im)
    gii_ref[...] += _dot_t(im, im)
    rsum_ref[...] += jnp.sum(re.astype(jnp.float32), axis=1, keepdims=True)
    isum_ref[...] += jnp.sum(im.astype(jnp.float32), axis=1, keepdims=True)


def _conv_bn_relu_kernel(x_ref, w_ref, b_ref, o_ref):
    """1x1 conv with BN(train stats) pre-folded into (W_eff, b_eff), + ReLU (f32 epilogue)."""
    acc = _dot(w_ref[...], x_ref[0]) + b_ref[...]
    o_ref[0] = jnp.maximum(acc, 0.0).astype(o_ref.dtype)


def _rfft2_kernel(a_ref, fwc_ref, fws_ref, fhc_ref, fhs_ref, fhcs_ref, sr_ref, si_ref):
    """rfft along W as ONE (Tc*H, W) matmul, then per-channel FFT along H (Karatsuba)."""
    tc, h = sr_ref.shape[1], sr_ref.shape[2]
    av = a_ref[0]                                     # (Tc*H, W) bf16
    xr = _dot(av, fwc_ref[...])                       # (Tc*H, Wf_p) f32
    xi = _dot(av, fws_ref[...])
    for c in range(tc):                               # short unrolled channel loop
        xrc = xr[c * h:(c + 1) * h]
        xic = xi[c * h:(c + 1) * h]
        t1 = _dot(fhc_ref[...], xrc)
        t2 = _dot(fhs_ref[...], xic)
        t3 = _dot(fhcs_ref[...], xrc + xic)
        sr_ref[0, c] = (t1 - t2).astype(sr_ref.dtype)
        si_ref[0, c] = (t3 - t1 - t2).astype(si_ref.dtype)


def _spectrum_conv_kernel(sr_ref, si_ref, arr_ref, ari_ref, air_ref, aii_ref,
                          tr_ref, ti_ref, hr_ref, hi_ref):
    """Spectrum 1x1 conv + folded BN + ReLU; real/imag kept separate (no concat)."""
    re, im = sr_ref[0], si_ref[0]                     # (C, TPf) bf16, lane-dense
    hr = _dot(arr_ref[...], re) + _dot(ari_ref[...], im) + tr_ref[...]
    hi = _dot(air_ref[...], re) + _dot(aii_ref[...], im) + ti_ref[...]
    hr_ref[0] = jnp.maximum(hr, 0.0).astype(hr_ref.dtype)
    hi_ref[0] = jnp.maximum(hi, 0.0).astype(hi_ref.dtype)


def _irfft2_kernel(hr_ref, hi_ref, ihc_ref, ihs_ref, ihcs_ref, iwc_ref, iws_ref,
                   y_ref, ur_s, ui_s):
    """Per-channel inverse FFT along H (Karatsuba) into VMEM scratch, then ONE big
    (Tc*H, Wf_p) @ (Wf_p, W) irfft-W matmul pair."""
    tc, h = hr_ref.shape[1], hr_ref.shape[2]
    for c in range(tc):
        zr = hr_ref[0, c].astype(jnp.float32)
        zi = hi_ref[0, c].astype(jnp.float32)
        t1 = _dot(ihc_ref[...], zr)
        t2 = _dot(ihs_ref[...], zi)
        t3 = _dot(ihcs_ref[...], zr + zi)
        ur_s[pl.ds(c * h, h), :] = t1 - t2
        ui_s[pl.ds(c * h, h), :] = t3 - t1 - t2
    yb = _dot(ur_s[...], iwc_ref[...]) + _dot(ui_s[...], iws_ref[...])
    y_ref[0] = yb.astype(y_ref.dtype)


def _residual_conv_kernel(a_ref, y_ref, w_ref, o_ref):
    """Fused residual add + final 1x1 conv (bias=False); f32 elementwise add."""
    s = a_ref[0].astype(jnp.float32) + y_ref[0].astype(jnp.float32)
    o_ref[0] = _dot(w_ref[...], s).astype(o_ref.dtype)


# ----------------------------- DFT matrices (ortho norm, lane-padded) -----------------------------

def _dft_matrices(H, W, wf_pad, dtype):
    Wf = W // 2 + 1
    w = np.arange(W)[:, None]
    k = np.arange(Wf)[None, :]
    ang_w = 2.0 * np.pi * w * k / W
    fw_c = np.zeros((W, wf_pad))
    fw_s = np.zeros((W, wf_pad))
    fw_c[:, :Wf] = np.cos(ang_w) / np.sqrt(W)         # forward rfft along W
    fw_s[:, :Wf] = -np.sin(ang_w) / np.sqrt(W)

    h = np.arange(H)[:, None]
    g = np.arange(H)[None, :]
    ang_h = 2.0 * np.pi * h * g / H
    fh_c = np.cos(ang_h) / np.sqrt(H)                 # forward FFT along H
    fh_s = -np.sin(ang_h) / np.sqrt(H)
    ih_c = np.cos(ang_h) / np.sqrt(H)                 # inverse FFT along H
    ih_s = np.sin(ang_h) / np.sqrt(H)

    mult = np.full((Wf,), 2.0)                        # Hermitian weights for C2R
    mult[0] = 1.0
    if W % 2 == 0:
        mult[-1] = 1.0
    k2 = np.arange(Wf)[:, None]
    w2 = np.arange(W)[None, :]
    ang_i = 2.0 * np.pi * k2 * w2 / W
    iw_c = np.zeros((wf_pad, W))                      # zero rows kill padded columns
    iw_s = np.zeros((wf_pad, W))
    iw_c[:Wf] = mult[:, None] * np.cos(ang_i) / np.sqrt(W)
    iw_s[:Wf] = -mult[:, None] * np.sin(ang_i) / np.sqrt(W)

    to = lambda m: jnp.asarray(m, dtype)
    return dict(fw_c=to(fw_c), fw_s=to(fw_s),
                fh_c=to(fh_c), fh_s=to(fh_s), fh_cs=to(fh_c + fh_s),
                ih_c=to(ih_c), ih_s=to(ih_s), ih_cs=to(ih_c + ih_s),
                iw_c=to(iw_c), iw_s=to(iw_s))


# ----------------------------- SpectralTransform forward -----------------------------

@jax.jit
def spectral_transform_forward(x, params):
    N, Cin, H, W = x.shape
    assert H % 8 == 0, "H must be a multiple of 8 (sublane alignment of the channel-merged FFT)"
    w1, g1, b1 = params["w1"], params["g1"], params["b1"]
    w2, g2, b2 = params["w2"], params["g2"], params["b2"]
    w3 = params["w3"]
    C = w1.shape[1]                 # Cmid = out_channels // 2
    Cout = w3.shape[1]
    Wf = W // 2 + 1
    Wf_p = _round_up(Wf, 128)       # lane-dense spectra (unmasked vst)
    HW, HWf = H * W, H * Wf_p
    f32, bf16 = jnp.float32, jnp.bfloat16
    S = jax.ShapeDtypeStruct
    hp = lax.Precision.HIGHEST
    m = _dft_matrices(H, W, Wf_p, bf16)

    x3 = x.reshape(N, Cin, HW)      # free row-major reshape (no data movement)

    TP = _pick_pixel_tile(HW)
    nP = HW // TP

    # ---- pass 1: conv1 BN batch statistics via channel Gram matrix ----
    gram_x, sum_x = pl.pallas_call(
        _gram_kernel,
        grid=(N, nP),
        in_specs=[pl.BlockSpec((1, Cin, TP), lambda n, p: (n, 0, p))],
        out_specs=(pl.BlockSpec((Cin, Cin), lambda n, p: (0, 0)),
                   pl.BlockSpec((Cin, 1), lambda n, p: (0, 0))),
        out_shape=(S((Cin, Cin), f32), S((Cin, 1), f32)),
        compiler_params=_cparams("arbitrary", "arbitrary"),
    )(x3)

    # fold conv1 + BN(training stats) into one affine map; HIGHEST for the tiny folds,
    # var clamped >= 0 to protect rsqrt against cancellation.
    P1 = N * HW
    mean_x = sum_x[:, 0] / P1
    mean_h = jnp.dot(mean_x, w1, precision=hp)
    e_h2 = jnp.sum(w1 * jnp.dot(gram_x / P1, w1, precision=hp), axis=0)
    var_h = jnp.maximum(e_h2 - mean_h ** 2, 0.0)
    s1 = g1.reshape(-1) * lax.rsqrt(var_h + _EPS)
    w1_eff = (w1 * s1[None, :]).T                    # (C, Cin), left-multiply form
    t1 = (b1.reshape(-1) - mean_h * s1).reshape(C, 1)

    # ---- conv1 (1x1, bias=False) + BN + ReLU : lane-dense (C, TP) bf16 blocks ----
    a = pl.pallas_call(
        _conv_bn_relu_kernel,
        grid=(N, nP),
        in_specs=[pl.BlockSpec((1, Cin, TP), lambda n, p: (n, 0, p)),
                  pl.BlockSpec((C, Cin), lambda n, p: (0, 0)),
                  pl.BlockSpec((C, 1), lambda n, p: (0, 0))],
        out_specs=pl.BlockSpec((1, C, TP), lambda n, p: (n, 0, p)),
        out_shape=S((N, C, HW), bf16),
        compiler_params=_cparams("parallel", "parallel"),
    )(x3, w1_eff, t1)

    # ---- FourierUnit rfft2 (ortho), channel-merged blocks ----
    per_c_bytes = H * (2 * W + 12 * Wf_p)            # bf16 in/out + f32 intermediates
    Tc = _pick_channel_tile(C, per_c_bytes)
    nC = C // Tc
    a_hw = a.reshape(N, C * H, W)                    # free view: rows = (c, h)
    spec_r, spec_i = pl.pallas_call(
        _rfft2_kernel,
        grid=(N, nC),
        in_specs=[pl.BlockSpec((1, Tc * H, W), lambda n, ct: (n, ct, 0)),
                  pl.BlockSpec((W, Wf_p), lambda n, ct: (0, 0)),
                  pl.BlockSpec((W, Wf_p), lambda n, ct: (0, 0)),
                  pl.BlockSpec((H, H), lambda n, ct: (0, 0)),
                  pl.BlockSpec((H, H), lambda n, ct: (0, 0)),
                  pl.BlockSpec((H, H), lambda n, ct: (0, 0))],
        out_specs=(pl.BlockSpec((1, Tc, H, Wf_p), lambda n, ct: (n, ct, 0, 0)),
                   pl.BlockSpec((1, Tc, H, Wf_p), lambda n, ct: (n, ct, 0, 0))),
        out_shape=(S((N, C, H, Wf_p), bf16), S((N, C, H, Wf_p), bf16)),
        compiler_params=_cparams("parallel", "parallel"),
    )(a_hw, m["fw_c"], m["fw_s"], m["fh_c"], m["fh_s"], m["fh_cs"])

    # ---- spectrum-conv BN statistics (Gram over [real; imag] channels) ----
    sr2 = spec_r.reshape(N, C, HWf)                  # free, lane-dense slabs
    si2 = spec_i.reshape(N, C, HWf)
    TPf = _pick_pixel_tile(HWf)
    nPf = HWf // TPf
    grr, gri, gii, rsum, isum = pl.pallas_call(
        _gram2_kernel,
        grid=(N, nPf),
        in_specs=[pl.BlockSpec((1, C, TPf), lambda n, p: (n, 0, p)),
                  pl.BlockSpec((1, C, TPf), lambda n, p: (n, 0, p))],
        out_specs=(pl.BlockSpec((C, C), lambda n, p: (0, 0)),
                   pl.BlockSpec((C, C), lambda n, p: (0, 0)),
                   pl.BlockSpec((C, C), lambda n, p: (0, 0)),
                   pl.BlockSpec((C, 1), lambda n, p: (0, 0)),
                   pl.BlockSpec((C, 1), lambda n, p: (0, 0))),
        out_shape=(S((C, C), f32), S((C, C), f32), S((C, C), f32),
                   S((C, 1), f32), S((C, 1), f32)),
        compiler_params=_cparams("arbitrary", "arbitrary"),
    )(sr2, si2)

    P2 = N * H * Wf                                  # real (un-padded) pixel count
    gram_sp = jnp.concatenate(
        [jnp.concatenate([grr, gri], axis=1),
         jnp.concatenate([gri.T, gii], axis=1)], axis=0) / P2
    mean_sp = jnp.concatenate([rsum[:, 0], isum[:, 0]]) / P2
    mean_h2 = jnp.dot(mean_sp, w2, precision=hp)
    e_h22 = jnp.sum(w2 * jnp.dot(gram_sp, w2, precision=hp), axis=0)
    var_h2 = jnp.maximum(e_h22 - mean_h2 ** 2, 0.0)
    s2 = g2.reshape(-1) * lax.rsqrt(var_h2 + _EPS)
    w2l = (w2 * s2[None, :]).T                       # (2C, 2C): rows=out, cols=in
    t2 = b2.reshape(-1) - mean_h2 * s2
    w2_rr, w2_ri = w2l[:C, :C].astype(bf16), w2l[:C, C:].astype(bf16)
    w2_ir, w2_ii = w2l[C:, :C].astype(bf16), w2l[C:, C:].astype(bf16)
    t2r, t2i = t2[:C].reshape(C, 1), t2[C:].reshape(C, 1)

    # ---- spectrum 1x1 conv + BN + ReLU (real/imag kept separate, no HBM concat) ----
    h2r, h2i = pl.pallas_call(
        _spectrum_conv_kernel,
        grid=(N, nPf),
        in_specs=[pl.BlockSpec((1, C, TPf), lambda n, p: (n, 0, p)),
                  pl.BlockSpec((1, C, TPf), lambda n, p: (n, 0, p)),
                  pl.BlockSpec((C, C), lambda n, p: (0, 0)),
                  pl.BlockSpec((C, C), lambda n, p: (0, 0)),
                  pl.BlockSpec((C, C), lambda n, p: (0, 0)),
                  pl.BlockSpec((C, C), lambda n, p: (0, 0)),
                  pl.BlockSpec((C, 1), lambda n, p: (0, 0)),
                  pl.BlockSpec((C, 1), lambda n, p: (0, 0))],
        out_specs=(pl.BlockSpec((1, C, TPf), lambda n, p: (n, 0, p)),
                   pl.BlockSpec((1, C, TPf), lambda n, p: (n, 0, p))),
        out_shape=(S((N, C, HWf), bf16), S((N, C, HWf), bf16)),
        compiler_params=_cparams("parallel", "parallel"),
    )(sr2, si2, w2_rr, w2_ri, w2_ir, w2_ii, t2r, t2i)

    # ---- irfft2 (ortho), channel-merged blocks ----
    h2r4 = h2r.reshape(N, C, H, Wf_p)
    h2i4 = h2i.reshape(N, C, H, Wf_p)
    y = pl.pallas_call(
        _irfft2_kernel,
        grid=(N, nC),
        in_specs=[pl.BlockSpec((1, Tc, H, Wf_p), lambda n, ct: (n, ct, 0, 0)),
                  pl.BlockSpec((1, Tc, H, Wf_p), lambda n, ct: (n, ct, 0, 0)),
                  pl.BlockSpec((H, H), lambda n, ct: (0, 0)),
                  pl.BlockSpec((H, H), lambda n, ct: (0, 0)),
                  pl.BlockSpec((H, H), lambda n, ct: (0, 0)),
                  pl.BlockSpec((Wf_p, W), lambda n, ct: (0, 0)),
                  pl.BlockSpec((Wf_p, W), lambda n, ct: (0, 0))],
        out_specs=pl.BlockSpec((1, Tc * H, W), lambda n, ct: (n, ct, 0)),
        out_shape=S((N, C * H, W), bf16),
        scratch_shapes=[pltpu.VMEM((Tc * H, Wf_p), f32),
                        pltpu.VMEM((Tc * H, Wf_p), f32)],
        compiler_params=_cparams("parallel", "parallel"),
    )(h2r4, h2i4, m["ih_c"], m["ih_s"], m["ih_cs"], m["iw_c"], m["iw_s"])

    # ---- fused residual add + conv2 (1x1, bias=False), lane-dense output ----
    y3 = y.reshape(N, C, HW)                         # free view
    w3l = w3.T                                       # (Cout, C)
    out = pl.pallas_call(
        _residual_conv_kernel,
        grid=(N, nP),
        in_specs=[pl.BlockSpec((1, C, TP), lambda n, p: (n, 0, p)),
                  pl.BlockSpec((1, C, TP), lambda n, p: (n, 0, p)),
                  pl.BlockSpec((Cout, C), lambda n, p: (0, 0))],
        out_specs=pl.BlockSpec((1, Cout, TP), lambda n, p: (n, 0, p)),
        out_shape=S((N, Cout, HW), f32),
        compiler_params=_cparams("parallel", "parallel"),
    )(a, y3, w3l)

    return out.reshape(N, Cout, H, W)


# ----------------------------- plain-JAX reference -----------------------------

def _reference_forward(x, params):
    w1, g1, b1 = params["w1"], params["g1"], params["b1"]
    w2, g2, b2 = params["w2"], params["g2"], params["b2"]
    w3 = params["w3"]

    def conv1x1(t, w):
        return jnp.einsum("nchw,cd->ndhw", t, w, precision=jax.lax.Precision.HIGHEST)

    def bn_relu(t, g, b):
        mean = jnp.mean(t, axis=(0, 2, 3), keepdims=True)
        var = jnp.mean((t - mean) ** 2, axis=(0, 2, 3), keepdims=True)
        tn = (t - mean) * jax.lax.rsqrt(var + _EPS)
        return jax.nn.relu(tn * g.reshape(1, -1, 1, 1) + b.reshape(1, -1, 1, 1))

    a = bn_relu(conv1x1(x, w1), g1, b1)
    H, W = a.shape[-2:]
    X = jnp.fft.rfft2(a, norm="ortho")
    sp = jnp.concatenate([X.real, X.imag], axis=1)
    h2 = bn_relu(conv1x1(sp, w2), g2, b2)
    C = a.shape[1]
    Z = h2[:, :C] + 1j * h2[:, C:]
    y = jnp.fft.irfft2(Z, s=(H, W), norm="ortho")
    return conv1x1(a + y, w3)


# ----------------------------- main -----------------------------

if __name__ == "__main__":
    N, Cin, Cout, H, W = 2, 4, 8, 16, 16             # SpectralTransform(4, 8)
    Cmid = Cout // 2

    key = jax.random.PRNGKey(0)
    ks = jax.random.split(key, 8)
    params = dict(
        w1=jax.random.normal(ks[0], (Cin, Cmid), jnp.float32) / np.sqrt(Cin),
        g1=1.0 + 0.1 * jax.random.normal(ks[1], (1, Cmid), jnp.float32),
        b1=0.1 * jax.random.normal(ks[2], (1, Cmid), jnp.float32),
        w2=jax.random.normal(ks[3], (2 * Cmid, 2 * Cmid), jnp.float32) / np.sqrt(2 * Cmid),
        g2=1.0 + 0.1 * jax.random.normal(ks[4], (1, 2 * Cmid), jnp.float32),
        b2=0.1 * jax.random.normal(ks[5], (1, 2 * Cmid), jnp.float32),
        w3=jax.random.normal(ks[6], (Cmid, Cout), jnp.float32) / np.sqrt(Cmid),
    )
    x = jax.random.normal(ks[7], (N, Cin, H, W), jnp.float32)

    out = jax.block_until_ready(spectral_transform_forward(x, params))
    ref = jax.block_until_ready(_reference_forward(x, params))

    assert out.shape == (N, Cout, H, W), out.shape
    err = float(jnp.max(jnp.abs(out - ref)))
    # bf16 inter-stage storage + default (bf16-pass) MXU precision vs the f32-HIGHEST
    # reference -> loose tolerance; genuine bugs produce O(1)+ errors, not O(0.05).
    if not np.allclose(np.asarray(out), np.asarray(ref), atol=1e-1, rtol=5e-2):
        raise AssertionError(f"Pallas output mismatch vs reference (max abs err = {err})")
    print("KERNEL_OK")
</pallas_src>

<mosaic_0001>
module attributes {stable_mosaic.version = 11 : i64} {
  func.func @_gram_kernel(%arg0: i32, %arg1: i32, %arg2: memref<1x4x256xf32, #tpu.memory_space<vmem>>, %arg3: memref<4x4xf32, #tpu.memory_space<vmem>>, %arg4: memref<4x1xf32, #tpu.memory_space<vmem>>) attributes {dimension_semantics = [#tpu.dimension_semantics<arbitrary>, #tpu.dimension_semantics<arbitrary>], iteration_bounds = array<i64: 2, 1>, scalar_prefetch = 0 : i64, scratch_operands = 0 : i64, tpu.core_type = #tpu.core_type<tc>, window_params = [{transform_indices = @transform_0, window_bounds = array<i64: 1, 4, 256>}, {pipeline_mode = #tpu.pipeline_mode<synchronous>, transform_indices = @transform_1, window_bounds = array<i64: 4, 4>}, {pipeline_mode = #tpu.pipeline_mode<synchronous>, transform_indices = @transform_2, window_bounds = array<i64: 4, 1>}]} {
    %c0_i32 = arith.constant 0 : i32
    %0 = arith.cmpi eq, %arg0, %c0_i32 : i32
    %c0_i32_0 = arith.constant 0 : i32
    %1 = arith.cmpi eq, %arg1, %c0_i32_0 : i32
    %2 = arith.andi %0, %1 : i1
    %3 = arith.extui %2 : i1 to i32
    %c0_i32_1 = arith.constant 0 : i32
    %4 = arith.cmpi ne, %3, %c0_i32_1 : i32
    scf.if %4 {
      %cst_13 = arith.constant 0.000000e+00 : f32
      %16 = vector.broadcast %cst_13 : f32 to vector<4x4xf32>
      %c0_14 = arith.constant 0 : index
      %c0_15 = arith.constant 0 : index
      %17 = vector.load %arg3[%c0_14, %c0_15] : memref<4x4xf32, #tpu.memory_space<vmem>>, vector<4x4xf32>
      tpu.vector_store %arg3[%c0_14, %c0_15], %16 {strides = array<i32>} : memref<4x4xf32, #tpu.memory_space<vmem>>, vector<4x4xf32>,
      %cst_16 = arith.constant 0.000000e+00 : f32
      %18 = vector.broadcast %cst_16 : f32 to vector<4x1xf32>
      %c0_17 = arith.constant 0 : index
      %c0_18 = arith.constant 0 : index
      %19 = vector.load %arg4[%c0_17, %c0_18] : memref<4x1xf32, #tpu.memory_space<vmem>>, vector<4x1xf32>
      tpu.vector_store %arg4[%c0_17, %c0_18], %18 {strides = array<i32>} : memref<4x1xf32, #tpu.memory_space<vmem>>, vector<4x1xf32>,
    } else {
    }
    %c0 = arith.constant 0 : index
    %c0_2 = arith.constant 0 : index
    %c0_3 = arith.constant 0 : index
    %5 = vector.load %arg2[%c0, %c0_2, %c0_3] : memref<1x4x256xf32, #tpu.memory_space<vmem>>, vector<1x4x256xf32>
    %6 = vector.shape_cast %5 : vector<1x4x256xf32> to vector<4x256xf32>
    %c0_4 = arith.constant 0 : index
    %c0_5 = arith.constant 0 : index
    %7 = vector.load %arg3[%c0_4, %c0_5] : memref<4x4xf32, #tpu.memory_space<vmem>>, vector<4x4xf32>
    %cst = arith.constant dense<0.000000e+00> : vector<4x4xf32>
    %8 = tpu.matmul %6, %6, %cst {dimension_numbers = #tpu.dot_dimension_numbers<[1], [1], [0], [0], [0, 0, 1, 0], [], []>} : vector<4x256xf32>, vector<4x256xf32>, vector<4x4xf32> -> vector<4x4xf32>
    %9 = arith.addf %7, %8 : vector<4x4xf32>
    %c0_6 = arith.constant 0 : index
    %c0_7 = arith.constant 0 : index
    %10 = vector.load %arg3[%c0_6, %c0_7] : memref<4x4xf32, #tpu.memory_space<vmem>>, vector<4x4xf32>
    tpu.vector_store %arg3[%c0_6, %c0_7], %9 {strides = array<i32>} : memref<4x4xf32, #tpu.memory_space<vmem>>, vector<4x4xf32>,
    %c0_8 = arith.constant 0 : index
    %c0_9 = arith.constant 0 : index
    %11 = vector.load %arg4[%c0_8, %c0_9] : memref<4x1xf32, #tpu.memory_space<vmem>>, vector<4x1xf32>
    %cst_10 = arith.constant dense<0.000000e+00> : vector<4xf32>
    %12 = vector.multi_reduction <add>, %6, %cst_10 [1] : vector<4x256xf32> to vector<4xf32>
    %13 = vector.shape_cast %12 : vector<4xf32> to vector<4x1xf32>
    %14 = arith.addf %11, %13 : vector<4x1xf32>
    %c0_11 = arith.constant 0 : index
    %c0_12 = arith.constant 0 : index
    %15 = vector.load %arg4[%c0_11, %c0_12] : memref<4x1xf32, #tpu.memory_space<vmem>>, vector<4x1xf32>
    tpu.vector_store %arg4[%c0_11, %c0_12], %14 {strides = array<i32>} : memref<4x1xf32, #tpu.memory_space<vmem>>, vector<4x1xf32>,
    return
  }
  func.func @transform_0(%arg0: i32, %arg1: i32) -> (i32, i32, i32) {
    %c0_i32 = arith.constant 0 : i32
    %c0_i32_0 = arith.constant 0 : i32
    return %arg0, %c0_i32, %arg1 : i32, i32, i32
  }
  func.func @transform_1(%arg0: i32, %arg1: i32) -> (i32, i32) {
    %c0_i32 = arith.constant 0 : i32
    %c0_i32_0 = arith.constant 0 : i32
    %c0_i32_1 = arith.constant 0 : i32
    return %c0_i32, %c0_i32_0 : i32, i32
  }
  func.func @transform_2(%arg0: i32, %arg1: i32) -> (i32, i32) {
    %c0_i32 = arith.constant 0 : i32
    %c0_i32_0 = arith.constant 0 : i32
    %c0_i32_1 = arith.constant 0 : i32
    return %c0_i32, %c0_i32_0 : i32, i32
  }
}

module attributes {stable_mosaic.version = 11 : i64} {
  func.func @_conv_bn_relu_kernel(%arg0: i32, %arg1: i32, %arg2: memref<1x4x256xf32, #tpu.memory_space<vmem>>, %arg3: memref<4x4xf32, #tpu.memory_space<vmem>>, %arg4: memref<4x1xf32, #tpu.memory_space<vmem>>, %arg5: memref<1x4x256xbf16, #tpu.memory_space<vmem>>) attributes {dimension_semantics = [#tpu.dimension_semantics<parallel>, #tpu.dimension_semantics<parallel>], iteration_bounds = array<i64: 2, 1>, scalar_prefetch = 0 : i64, scratch_operands = 0 : i64, tpu.core_type = #tpu.core_type<tc>, window_params = [{transform_indices = @transform_0, window_bounds = array<i64: 1, 4, 256>}, {pipeline_mode = #tpu.pipeline_mode<synchronous>, transform_indices = @transform_1, window_bounds = array<i64: 4, 4>}, {pipeline_mode = #tpu.pipeline_mode<synchronous>, transform_indices = @transform_2, window_bounds = array<i64: 4, 1>}, {transform_indices = @transform_3, window_bounds = array<i64: 1, 4, 256>}]} {
    %c0 = arith.constant 0 : index
    %c0_0 = arith.constant 0 : index
    %0 = vector.load %arg3[%c0, %c0_0] : memref<4x4xf32, #tpu.memory_space<vmem>>, vector<4x4xf32>
    %c0_1 = arith.constant 0 : index
    %c0_2 = arith.constant 0 : index
    %c0_3 = arith.constant 0 : index
    %1 = vector.load %arg2[%c0_1, %c0_2, %c0_3] : memref<1x4x256xf32, #tpu.memory_space<vmem>>, vector<1x4x256xf32>
    %2 = vector.shape_cast %1 : vector<1x4x256xf32> to vector<4x256xf32>
    %cst = arith.constant dense<0.000000e+00> : vector<4x256xf32>
    %3 = tpu.matmul %0, %2, %cst {dimension_numbers = #tpu.dot_dimension_numbers<[1], [0], [0], [1], [0, 0, 1, 1], [], []>} : vector<4x4xf32>, vector<4x256xf32>, vector<4x256xf32> -> vector<4x256xf32>
    %c0_4 = arith.constant 0 : index
    %c0_5 = arith.constant 0 : index
    %4 = vector.load %arg4[%c0_4, %c0_5] : memref<4x1xf32, #tpu.memory_space<vmem>>, vector<4x1xf32>
    %5 = vector.broadcast %4 : vector<4x1xf32> to vector<4x256xf32>
    %6 = arith.addf %3, %5 : vector<4x256xf32>
    %cst_6 = arith.constant 0.000000e+00 : f32
    %7 = vector.broadcast %cst_6 : f32 to vector<4x256xf32>
    %8 = arith.maximumf %6, %7 : vector<4x256xf32>
    %9 = arith.truncf %8 : vector<4x256xf32> to vector<4x256xbf16>
    %c0_7 = arith.constant 0 : index
    %c0_8 = arith.constant 0 : index
    %c0_9 = arith.constant 0 : index
    %10 = vector.load %arg5[%c0_7, %c0_8, %c0_9] : memref<1x4x256xbf16, #tpu.memory_space<vmem>>, vector<1x4x256xbf16>
    %11 = vector.shape_cast %10 : vector<1x4x256xbf16> to vector<4x256xbf16>
    %12 = vector.shape_cast %9 : vector<4x256xbf16> to vector<1x4x256xbf16>
    tpu.vector_store %arg5[%c0_7, %c0_8, %c0_9], %12 {strides = array<i32>} : memref<1x4x256xbf16, #tpu.memory_space<vmem>>, vector<1x4x256xbf16>,
    return
  }
  func.func @transform_0(%arg0: i32, %arg1: i32) -> (i32, i32, i32) {
    %c0_i32 = arith.constant 0 : i32
    %c0_i32_0 = arith.constant 0 : i32
    return %arg0, %c0_i32, %arg1 : i32, i32, i32
  }
  func.func @transform_1(%arg0: i32, %arg1: i32) -> (i32, i32) {
    %c0_i32 = arith.constant 0 : i32
    %c0_i32_0 = arith.constant 0 : i32
    %c0_i32_1 = arith.constant 0 : i32
    return %c0_i32, %c0_i32_0 : i32, i32
  }
  func.func @transform_2(%arg0: i32, %arg1: i32) -> (i32, i32) {
    %c0_i32 = arith.constant 0 : i32
    %c0_i32_0 = arith.constant 0 : i32
    %c0_i32_1 = arith.constant 0 : i32
    return %c0_i32, %c0_i32_0 : i32, i32
  }
  func.func @transform_3(%arg0: i32, %arg1: i32) -> (i32, i32, i32) {
    %c0_i32 = arith.constant 0 : i32
    %c0_i32_0 = arith.constant 0 : i32
    return %arg0, %c0_i32, %arg1 : i32, i32, i32
  }
}

module attributes {stable_mosaic.version = 11 : i64} {
  func.func @_rfft2_kernel(%arg0: i32, %arg1: i32, %arg2: memref<1x64x16xbf16, #tpu.memory_space<vmem>>, %arg3: memref<16x128xbf16, #tpu.memory_space<vmem>>, %arg4: memref<16x128xbf16, #tpu.memory_space<vmem>>, %arg5: memref<16x16xbf16, #tpu.memory_space<vmem>>, %arg6: memref<16x16xbf16, #tpu.memory_space<vmem>>, %arg7: memref<16x16xbf16, #tpu.memory_space<vmem>>, %arg8: memref<1x4x16x128xbf16, #tpu.memory_space<vmem>>, %arg9: memref<1x4x16x128xbf16, #tpu.memory_space<vmem>>) attributes {dimension_semantics = [#tpu.dimension_semantics<parallel>, #tpu.dimension_semantics<parallel>], iteration_bounds = array<i64: 2, 1>, scalar_prefetch = 0 : i64, scratch_operands = 0 : i64, tpu.core_type = #tpu.core_type<tc>, window_params = [{transform_indices = @transform_0, window_bounds = array<i64: 1, 64, 16>}, {pipeline_mode = #tpu.pipeline_mode<synchronous>, transform_indices = @transform_1, window_bounds = array<i64: 16, 128>}, {pipeline_mode = #tpu.pipeline_mode<synchronous>, transform_indices = @transform_2, window_bounds = array<i64: 16, 128>}, {pipeline_mode = #tpu.pipeline_mode<synchronous>, transform_indices = @transform_3, window_bounds = array<i64: 16, 16>}, {pipeline_mode = #tpu.pipeline_mode<synchronous>, transform_indices = @transform_4, window_bounds = array<i64: 16, 16>}, {pipeline_mode = #tpu.pipeline_mode<synchronous>, transform_indices = @transform_5, window_bounds = array<i64: 16, 16>}, {transform_indices = @transform_6, window_bounds = array<i64: 1, 4, 16, 128>}, {transform_indices = @transform_7, window_bounds = array<i64: 1, 4, 16, 128>}]} {
    %c0 = arith.constant 0 : index
    %c0_0 = arith.constant 0 : index
    %c0_1 = arith.constant 0 : index
    %0 = vector.load %arg2[%c0, %c0_0, %c0_1] : memref<1x64x16xbf16, #tpu.memory_space<vmem>>, vector<1x64x16xbf16>
    %1 = vector.shape_cast %0 : vector<1x64x16xbf16> to vector<64x16xbf16>
    %c0_2 = arith.constant 0 : index
    %c0_3 = arith.constant 0 : index
    %2 = vector.load %arg3[%c0_2, %c0_3] : memref<16x128xbf16, #tpu.memory_space<vmem>>, vector<16x128xbf16>
    %cst = arith.constant dense<0.000000e+00> : vector<64x128xf32>
    %3 = tpu.matmul %1, %2, %cst {dimension_numbers = #tpu.dot_dimension_numbers<[1], [0], [0], [1], [0, 0, 1, 1], [], []>} : vector<64x16xbf16>, vector<16x128xbf16>, vector<64x128xf32> -> vector<64x128xf32>
    %c0_4 = arith.constant 0 : index
    %c0_5 = arith.constant 0 : index
    %4 = vector.load %arg4[%c0_4, %c0_5] : memref<16x128xbf16, #tpu.memory_space<vmem>>, vector<16x128xbf16>
    %cst_6 = arith.constant dense<0.000000e+00> : vector<64x128xf32>
    %5 = tpu.matmul %1, %4, %cst_6 {dimension_numbers = #tpu.dot_dimension_numbers<[1], [0], [0], [1], [0, 0, 1, 1], [], []>} : vector<64x16xbf16>, vector<16x128xbf16>, vector<64x128xf32> -> vector<64x128xf32>
    %6 = vector.extract_strided_slice %3 {offsets = [0, 0], sizes = [16, 128], strides = [1, 1]} : vector<64x128xf32> to vector<16x128xf32>
    %7 = vector.extract_strided_slice %5 {offsets = [0, 0], sizes = [16, 128], strides = [1, 1]} : vector<64x128xf32> to vector<16x128xf32>
    %c0_7 = arith.constant 0 : index
    %c0_8 = arith.constant 0 : index
    %8 = vector.load %arg5[%c0_7, %c0_8] : memref<16x16xbf16, #tpu.memory_space<vmem>>, vector<16x16xbf16>
    %cst_9 = arith.constant dense<0.000000e+00> : vector<16x128xf32>
    %9 = tpu.matmul %8, %6, %cst_9 {dimension_numbers = #tpu.dot_dimension_numbers<[1], [0], [0], [1], [0, 0, 1, 1], [], []>} : vector<16x16xbf16>, vector<16x128xf32>, vector<16x128xf32> -> vector<16x128xf32>
    %c0_10 = arith.constant 0 : index
    %c0_11 = arith.constant 0 : index
    %10 = vector.load %arg6[%c0_10, %c0_11] : memref<16x16xbf16, #tpu.memory_space<vmem>>, vector<16x16xbf16>
    %cst_12 = arith.constant dense<0.000000e+00> : vector<16x128xf32>
    %11 = tpu.matmul %10, %7, %cst_12 {dimension_numbers = #tpu.dot_dimension_numbers<[1], [0], [0], [1], [0, 0, 1, 1], [], []>} : vector<16x16xbf16>, vector<16x128xf32>, vector<16x128xf32> -> vector<16x128xf32>
    %c0_13 = arith.constant 0 : index
    %c0_14 = arith.constant 0 : index
    %12 = vector.load %arg7[%c0_13, %c0_14] : memref<16x16xbf16, #tpu.memory_space<vmem>>, vector<16x16xbf16>
    %13 = arith.addf %6, %7 : vector<16x128xf32>
    %cst_15 = arith.constant dense<0.000000e+00> : vector<16x128xf32>
    %14 = tpu.matmul %12, %13, %cst_15 {dimension_numbers = #tpu.dot_dimension_numbers<[1], [0], [0], [1], [0, 0, 1, 1], [], []>} : vector<16x16xbf16>, vector<16x128xf32>, vector<16x128xf32> -> vector<16x128xf32>
    %15 = arith.subf %9, %11 : vector<16x128xf32>
    %16 = arith.truncf %15 : vector<16x128xf32> to vector<16x128xbf16>
    %c0_16 = arith.constant 0 : index
    %c0_17 = arith.constant 0 : index
    %c0_18 = arith.constant 0 : index
    %c0_19 = arith.constant 0 : index
    %17 = vector.load %arg8[%c0_16, %c0_17, %c0_18, %c0_19] : memref<1x4x16x128xbf16, #tpu.memory_space<vmem>>, vector<1x1x16x128xbf16>
    %18 = vector.shape_cast %17 : vector<1x1x16x128xbf16> to vector<16x128xbf16>
    %19 = vector.shape_cast %16 : vector<16x128xbf16> to vector<1x1x16x128xbf16>
    tpu.vector_store %arg8[%c0_16, %c0_17, %c0_18, %c0_19], %19 {strides = array<i32>} : memref<1x4x16x128xbf16, #tpu.memory_space<vmem>>, vector<1x1x16x128xbf16>,
    %20 = arith.subf %14, %9 : vector<16x128xf32>
    %21 = arith.subf %20, %11 : vector<16x128xf32>
    %22 = arith.truncf %21 : vector<16x128xf32> to vector<16x128xbf16>
    %c0_20 = arith.constant 0 : index
    %c0_21 = arith.constant 0 : index
    %c0_22 = arith.constant 0 : index
    %c0_23 = arith.constant 0 : index
    %23 = vector.load %arg9[%c0_20, %c0_21, %c0_22, %c0_23] : memref<1x4x16x128xbf16, #tpu.memory_space<vmem>>, vector<1x1x16x128xbf16>
    %24 = vector.shape_cast %23 : vector<1x1x16x128xbf16> to vector<16x128xbf16>
    %25 = vector.shape_cast %22 : vector<16x128xbf16> to vector<1x1x16x128xbf16>
    tpu.vector_store %arg9[%c0_20, %c0_21, %c0_22, %c0_23], %25 {strides = array<i32>} : memref<1x4x16x128xbf16, #tpu.memory_space<vmem>>, vector<1x1x16x128xbf16>,
    %26 = vector.extract_strided_slice %3 {offsets = [16, 0], sizes = [16, 128], strides = [1, 1]} : vector<64x128xf32> to vector<16x128xf32>
    %27 = vector.extract_strided_slice %5 {offsets = [16, 0], sizes = [16, 128], strides = [1, 1]} : vector<64x128xf32> to vector<16x128xf32>
    %c0_24 = arith.constant 0 : index
    %c0_25 = arith.constant 0 : index
    %28 = vector.load %arg5[%c0_24, %c0_25] : memref<16x16xbf16, #tpu.memory_space<vmem>>, vector<16x16xbf16>
    %cst_26 = arith.constant dense<0.000000e+00> : vector<16x128xf32>
    %29 = tpu.matmul %28, %26, %cst_26 {dimension_numbers = #tpu.dot_dimension_numbers<[1], [0], [0], [1], [0, 0, 1, 1], [], []>} : vector<16x16xbf16>, vector<16x128xf32>, vector<16x128xf32> -> vector<16x128xf32>
    %c0_27 = arith.constant 0 : index
    %c0_28 = arith.constant 0 : index
    %30 = vector.load %arg6[%c0_27, %c0_28] : memref<16x16xbf16, #tpu.memory_space<vmem>>, vector<16x16xbf16>
    %cst_29 = arith.constant dense<0.000000e+00> : vector<16x128xf32>
    %31 = tpu.matmul %30, %27, %cst_29 {dimension_numbers = #tpu.dot_dimension_numbers<[1], [0], [0], [1], [0, 0, 1, 1], [], []>} : vector<16x16xbf16>, vector<16x128xf32>, vector<16x128xf32> -> vector<16x128xf32>
    %c0_30 = arith.constant 0 : index
    %c0_31 = arith.constant 0 : index
    %32 = vector.load %arg7[%c0_30, %c0_31] : memref<16x16xbf16, #tpu.memory_space<vmem>>, vector<16x16xbf16>
    %33 = arith.addf %26, %27 : vector<16x128xf32>
    %cst_32 = arith.constant dense<0.000000e+00> : vector<16x128xf32>
    %34 = tpu.matmul %32, %33, %cst_32 {dimension_numbers = #tpu.dot_dimension_numbers<[1], [0], [0], [1], [0, 0, 1, 1], [], []>} : vector<16x16xbf16>, vector<16x128xf32>, vector<16x128xf32> -> vector<16x128xf32>
    %35 = arith.subf %29, %31 : vector<16x128xf32>
    %36 = arith.truncf %35 : vector<16x128xf32> to vector<16x128xbf16>
    %c0_33 = arith.constant 0 : index
    %c1 = arith.constant 1 : index
    %c0_34 = arith.constant 0 : index
    %c0_35 = arith.constant 0 : index
    %37 = vector.load %arg8[%c0_33, %c1, %c0_34, %c0_35] : memref<1x4x16x128xbf16, #tpu.memory_space<vmem>>, vector<1x1x16x128xbf16>
    %38 = vector.shape_cast %37 : vector<1x1x16x128xbf16> to vector<16x128xbf16>
    %39 = vector.shape_cast %36 : vector<16x128xbf16> to vector<1x1x16x128xbf16>
    tpu.vector_store %arg8[%c0_33, %c1, %c0_34, %c0_35], %39 {strides = array<i32>} : memref<1x4x16x128xbf16, #tpu.memory_space<vmem>>, vector<1x1x16x128xbf16>,
    %40 = arith.subf %34, %29 : vector<16x128xf32>
    %41 = arith.subf %40, %31 : vector<16x128xf32>
    %42 = arith.truncf %41 : vector<16x128xf32> to vector<16x128xbf16>
    %c0_36 = arith.constant 0 : index
    %c1_37 = arith.constant 1 : index
    %c0_38 = arith.constant 0 : index
    %c0_39 = arith.constant 0 : index
    %43 = vector.load %arg9[%c0_36, %c1_37, %c0_38, %c0_39] : memref<1x4x16x128xbf16, #tpu.memory_space<vmem>>, vector<1x1x16x128xbf16>
    %44 = vector.shape_cast %43 : vector<1x1x16x128xbf16> to vector<16x128xbf16>
    %45 = vector.shape_cast %42 : vector<16x128xbf16> to vector<1x1x16x128xbf16>
    tpu.vector_store %arg9[%c0_36, %c1_37, %c0_38, %c0_39], %45 {strides = array<i32>} : memref<1x4x16x128xbf16, #tpu.memory_space<vmem>>, vector<1x1x16x128xbf16>,
    %46 = vector.extract_strided_slice %3 {offsets = [32, 0], sizes = [16, 128], strides = [1, 1]} : vector<64x128xf32> to vector<16x128xf32>
    %47 = vector.extract_strided_slice %5 {offsets = [32, 0], sizes = [16, 128], strides = [1, 1]} : vector<64x128xf32> to vector<16x128xf32>
    %c0_40 = arith.constant 0 : index
    %c0_41 = arith.constant 0 : index
    %48 = vector.load %arg5[%c0_40, %c0_41] : memref<16x16xbf16, #tpu.memory_space<vmem>>, vector<16x16xbf16>
    %cst_42 = arith.constant dense<0.000000e+00> : vector<16x128xf32>
    %49 = tpu.matmul %48, %46, %cst_42 {dimension_numbers = #tpu.dot_dimension_numbers<[1], [0], [0], [1], [0, 0, 1, 1], [], []>} : vector<16x16xbf16>, vector<16x128xf32>, vector<16x128xf32> -> vector<16x128xf32>
    %c0_43 = arith.constant 0 : index
    %c0_44 = arith.constant 0 : index
    %50 = vector.load %arg6[%c0_43, %c0_44] : memref<16x16xbf16, #tpu.memory_space<vmem>>, vector<16x16xbf16>
    %cst_45 = arith.constant dense<0.000000e+00> : vector<16x128xf32>
    %51 = tpu.matmul %50, %47, %cst_45 {dimension_numbers = #tpu.dot_dimension_numbers<[1], [0], [0], [1], [0, 0, 1, 1], [], []>} : vector<16x16xbf16>, vector<16x128xf32>, vector<16x128xf32> -> vector<16x128xf32>
    %c0_46 = arith.constant 0 : index
    %c0_47 = arith.constant 0 : index
    %52 = vector.load %arg7[%c0_46, %c0_47] : memref<16x16xbf16, #tpu.memory_space<vmem>>, vector<16x16xbf16>
    %53 = arith.addf %46, %47 : vector<16x128xf32>
    %cst_48 = arith.constant dense<0.000000e+00> : vector<16x128xf32>
    %54 = tpu.matmul %52, %53, %cst_48 {dimension_numbers = #tpu.dot_dimension_numbers<[1], [0], [0], [1], [0, 0, 1, 1], [], []>} : vector<16x16xbf16>, vector<16x128xf32>, vector<16x128xf32> -> vector<16x128xf32>
    %55 = arith.subf %49, %51 : vector<16x128xf32>
    %56 = arith.truncf %55 : vector<16x128xf32> to vector<16x128xbf16>
    %c0_49 = arith.constant 0 : index
    %c2 = arith.constant 2 : index
    %c0_50 = arith.constant 0 : index
    %c0_51 = arith.constant 0 : index
    %57 = vector.load %arg8[%c0_49, %c2, %c0_50, %c0_51] : memref<1x4x16x128xbf16, #tpu.memory_space<vmem>>, vector<1x1x16x128xbf16>
    %58 = vector.shape_cast %57 : vector<1x1x16x128xbf16> to vector<16x128xbf16>
    %59 = vector.shape_cast %56 : vector<16x128xbf16> to vector<1x1x16x128xbf16>
    tpu.vector_store %arg8[%c0_49, %c2, %c0_50, %c0_51], %59 {strides = array<i32>} : memref<1x4x16x128xbf16, #tpu.memory_space<vmem>>, vector<1x1x16x128xbf16>,
    %60 = arith.subf %54, %49 : vector<16x128xf32>
    %61 = arith.subf %60, %51 : vector<16x128xf32>
    %62 = arith.truncf %61 : vector<16x128xf32> to vector<16x128xbf16>
    %c0_52 = arith.constant 0 : index
    %c2_53 = arith.constant 2 : index
    %c0_54 = arith.constant 0 : index
    %c0_55 = arith.constant 0 : index
    %63 = vector.load %arg9[%c0_52, %c2_53, %c0_54, %c0_55] : memref<1x4x16x128xbf16, #tpu.memory_space<vmem>>, vector<1x1x16x128xbf16>
    %64 = vector.shape_cast %63 : vector<1x1x16x128xbf16> to vector<16x128xbf16>
    %65 = vector.shape_cast %62 : vector<16x128xbf16> to vector<1x1x16x128xbf16>
    tpu.vector_store %arg9[%c0_52, %c2_53, %c0_54, %c0_55], %65 {strides = array<i32>} : memref<1x4x16x128xbf16, #tpu.memory_space<vmem>>, vector<1x1x16x128xbf16>,
    %66 = vector.extract_strided_slice %3 {offsets = [48, 0], sizes = [16, 128], strides = [1, 1]} : vector<64x128xf32> to vector<16x128xf32>
    %67 = vector.extract_strided_slice %5 {offsets = [48, 0], sizes = [16, 128], strides = [1, 1]} : vector<64x128xf32> to vector<16x128xf32>
    %c0_56 = arith.constant 0 : index
    %c0_57 = arith.constant 0 : index
    %68 = vector.load %arg5[%c0_56, %c0_57] : memref<16x16xbf16, #tpu.memory_space<vmem>>, vector<16x16xbf16>
    %cst_58 = arith.constant dense<0.000000e+00> : vector<16x128xf32>
    %69 = tpu.matmul %68, %66, %cst_58 {dimension_numbers = #tpu.dot_dimension_numbers<[1], [0], [0], [1], [0, 0, 1, 1], [], []>} : vector<16x16xbf16>, vector<16x128xf32>, vector<16x128xf32> -> vector<16x128xf32>
    %c0_59 = arith.constant 0 : index
    %c0_60 = arith.constant 0 : index
    %70 = vector.load %arg6[%c0_59, %c0_60] : memref<16x16xbf16, #tpu.memory_space<vmem>>, vector<16x16xbf16>
    %cst_61 = arith.constant dense<0.000000e+00> : vector<16x128xf32>
    %71 = tpu.matmul %70, %67, %cst_61 {dimension_numbers = #tpu.dot_dimension_numbers<[1], [0], [0], [1], [0, 0, 1, 1], [], []>} : vector<16x16xbf16>, vector<16x128xf32>, vector<16x128xf32> -> vector<16x128xf32>
    %c0_62 = arith.constant 0 : index
    %c0_63 = arith.constant 0 : index
    %72 = vector.load %arg7[%c0_62, %c0_63] : memref<16x16xbf16, #tpu.memory_space<vmem>>, vector<16x16xbf16>
    %73 = arith.addf %66, %67 : vector<16x128xf32>
    %cst_64 = arith.constant dense<0.000000e+00> : vector<16x128xf32>
    %74 = tpu.matmul %72, %73, %cst_64 {dimension_numbers = #tpu.dot_dimension_numbers<[1], [0], [0], [1], [0, 0, 1, 1], [], []>} : vector<16x16xbf16>, vector<16x128xf32>, vector<16x128xf32> -> vector<16x128xf32>
    %75 = arith.subf %69, %71 : vector<16x128xf32>
    %76 = arith.truncf %75 : vector<16x128xf32> to vector<16x128xbf16>
    %c0_65 = arith.constant 0 : index
    %c3 = arith.constant 3 : index
    %c0_66 = arith.constant 0 : index
    %c0_67 = arith.constant 0 : index
    %77 = vector.load %arg8[%c0_65, %c3, %c0_66, %c0_67] : memref<1x4x16x128xbf16, #tpu.memory_space<vmem>>, vector<1x1x16x128xbf16>
    %78 = vector.shape_cast %77 : vector<1x1x16x128xbf16> to vector<16x128xbf16>
    %79 = vector.shape_cast %76 : vector<16x128xbf16> to vector<1x1x16x128xbf16>
    tpu.vector_store %arg8[%c0_65, %c3, %c0_66, %c0_67], %79 {strides = array<i32>} : memref<1x4x16x128xbf16, #tpu.memory_space<vmem>>, vector<1x1x16x128xbf16>,
    %80 = arith.subf %74, %69 : vector<16x128xf32>
    %81 = arith.subf %80, %71 : vector<16x128xf32>
    %82 = arith.truncf %81 : vector<16x128xf32> to vector<16x128xbf16>
    %c0_68 = arith.constant 0 : index
    %c3_69 = arith.constant 3 : index
    %c0_70 = arith.constant 0 : index
    %c0_71 = arith.constant 0 : index
    %83 = vector.load %arg9[%c0_68, %c3_69, %c0_70, %c0_71] : memref<1x4x16x128xbf16, #tpu.memory_space<vmem>>, vector<1x1x16x128xbf16>
    %84 = vector.shape_cast %83 : vector<1x1x16x128xbf16> to vector<16x128xbf16>
    %85 = vector.shape_cast %82 : vector<16x128xbf16> to vector<1x1x16x128xbf16>
    tpu.vector_store %arg9[%c0_68, %c3_69, %c0_70, %c0_71], %85 {strides = array<i32>} : memref<1x4x16x128xbf16, #tpu.memory_space<vmem>>, vector<1x1x16x128xbf16>,
    return
  }
  func.func @transform_0(%arg0: i32, %arg1: i32) -> (i32, i32, i32) {
    %c0_i32 = arith.constant 0 : i32
    %c0_i32_0 = arith.constant 0 : i32
    return %arg0, %arg1, %c0_i32 : i32, i32, i32
  }
  func.func @transform_1(%arg0: i32, %arg1: i32) -> (i32, i32) {
    %c0_i32 = arith.constant 0 : i32
    %c0_i32_0 = arith.constant 0 : i32
    %c0_i32_1 = arith.constant 0 : i32
    return %c0_i32, %c0_i32_0 : i32, i32
  }
  func.func @transform_2(%arg0: i32, %arg1: i32) -> (i32, i32) {
    %c0_i32 = arith.constant 0 : i32
    %c0_i32_0 = arith.constant 0 : i32
    %c0_i32_1 = arith.constant 0 : i32
    return %c0_i32, %c0_i32_0 : i32, i32
  }
  func.func @transform_3(%arg0: i32, %arg1: i32) -> (i32, i32) {
    %c0_i32 = arith.constant 0 : i32
    %c0_i32_0 = arith.constant 0 : i32
    %c0_i32_1 = arith.constant 0 : i32
    return %c0_i32, %c0_i32_0 : i32, i32
  }
  func.func @transform_4(%arg0: i32, %arg1: i32) -> (i32, i32) {
    %c0_i32 = arith.constant 0 : i32
    %c0_i32_0 = arith.constant 0 : i32
    %c0_i32_1 = arith.constant 0 : i32
    return %c0_i32, %c0_i32_0 : i32, i32
  }
  func.func @transform_5(%arg0: i32, %arg1: i32) -> (i32, i32) {
    %c0_i32 = arith.constant 0 : i32
    %c0_i32_0 = arith.constant 0 : i32
    %c0_i32_1 = arith.constant 0 : i32
    return %c0_i32, %c0_i32_0 : i32, i32
  }
  func.func @transform_6(%arg0: i32, %arg1: i32) -> (i32, i32, i32, i32) {
    %c0_i32 = arith.constant 0 : i32
    %c0_i32_0 = arith.constant 0 : i32
    %c0_i32_1 = arith.constant 0 : i32
    return %arg0, %arg1, %c0_i32, %c0_i32_0 : i32, i32, i32, i32
  }
  func.func @transform_7(%arg0: i32, %arg1: i32) -> (i32, i32, i32, i32) {
    %c0_i32 = arith.constant 0 : i32
    %c0_i32_0 = arith.constant 0 : i32
    %c0_i32_1 = arith.constant 0 : i32
    return %arg0, %arg1, %c0_i32, %c0_i32_0 : i32, i32, i32, i32
  }
}

module attributes {stable_mosaic.version = 11 : i64} {
  func.func @_gram2_kernel(%arg0: i32, %arg1: i32, %arg2: memref<1x4x2048xbf16, #tpu.memory_space<vmem>>, %arg3: memref<1x4x2048xbf16, #tpu.memory_space<vmem>>, %arg4: memref<4x4xf32, #tpu.memory_space<vmem>>, %arg5: memref<4x4xf32, #tpu.memory_space<vmem>>, %arg6: memref<4x4xf32, #tpu.memory_space<vmem>>, %arg7: memref<4x1xf32, #tpu.memory_space<vmem>>, %arg8: memref<4x1xf32, #tpu.memory_space<vmem>>) attributes {dimension_semantics = [#tpu.dimension_semantics<arbitrary>, #tpu.dimension_semantics<arbitrary>], iteration_bounds = array<i64: 2, 1>, scalar_prefetch = 0 : i64, scratch_operands = 0 : i64, tpu.core_type = #tpu.core_type<tc>, window_params = [{transform_indices = @transform_0, window_bounds = array<i64: 1, 4, 2048>}, {transform_indices = @transform_1, window_bounds = array<i64: 1, 4, 2048>}, {pipeline_mode = #tpu.pipeline_mode<synchronous>, transform_indices = @transform_2, window_bounds = array<i64: 4, 4>}, {pipeline_mode = #tpu.pipeline_mode<synchronous>, transform_indices = @transform_3, window_bounds = array<i64: 4, 4>}, {pipeline_mode = #tpu.pipeline_mode<synchronous>, transform_indices = @transform_4, window_bounds = array<i64: 4, 4>}, {pipeline_mode = #tpu.pipeline_mode<synchronous>, transform_indices = @transform_5, window_bounds = array<i64: 4, 1>}, {pipeline_mode = #tpu.pipeline_mode<synchronous>, transform_indices = @transform_6, window_bounds = array<i64: 4, 1>}]} {
    %c0_i32 = arith.constant 0 : i32
    %0 = arith.cmpi eq, %arg0, %c0_i32 : i32
    %c0_i32_0 = arith.constant 0 : i32
    %1 = arith.cmpi eq, %arg1, %c0_i32_0 : i32
    %2 = arith.andi %0, %1 : i1
    %3 = arith.extui %2 : i1 to i32
    %c0_i32_1 = arith.constant 0 : i32
    %4 = arith.cmpi ne, %3, %c0_i32_1 : i32
    scf.if %4 {
      %cst_31 = arith.constant 0.000000e+00 : f32
      %33 = vector.broadcast %cst_31 : f32 to vector<4x4xf32>
      %c0_32 = arith.constant 0 : index
      %c0_33 = arith.constant 0 : index
      %34 = vector.load %arg4[%c0_32, %c0_33] : memref<4x4xf32, #tpu.memory_space<vmem>>, vector<4x4xf32>
      tpu.vector_store %arg4[%c0_32, %c0_33], %33 {strides = array<i32>} : memref<4x4xf32, #tpu.memory_space<vmem>>, vector<4x4xf32>,
      %cst_34 = arith.constant 0.000000e+00 : f32
      %35 = vector.broadcast %cst_34 : f32 to vector<4x4xf32>
      %c0_35 = arith.constant 0 : index
      %c0_36 = arith.constant 0 : index
      %36 = vector.load %arg5[%c0_35, %c0_36] : memref<4x4xf32, #tpu.memory_space<vmem>>, vector<4x4xf32>
      tpu.vector_store %arg5[%c0_35, %c0_36], %35 {strides = array<i32>} : memref<4x4xf32, #tpu.memory_space<vmem>>, vector<4x4xf32>,
      %cst_37 = arith.constant 0.000000e+00 : f32
      %37 = vector.broadcast %cst_37 : f32 to vector<4x4xf32>
      %c0_38 = arith.constant 0 : index
      %c0_39 = arith.constant 0 : index
      %38 = vector.load %arg6[%c0_38, %c0_39] : memref<4x4xf32, #tpu.memory_space<vmem>>, vector<4x4xf32>
      tpu.vector_store %arg6[%c0_38, %c0_39], %37 {strides = array<i32>} : memref<4x4xf32, #tpu.memory_space<vmem>>, vector<4x4xf32>,
      %cst_40 = arith.constant 0.000000e+00 : f32
      %39 = vector.broadcast %cst_40 : f32 to vector<4x1xf32>
      %c0_41 = arith.constant 0 : index
      %c0_42 = arith.constant 0 : index
      %40 = vector.load %arg7[%c0_41, %c0_42] : memref<4x1xf32, #tpu.memory_space<vmem>>, vector<4x1xf32>
      tpu.vector_store %arg7[%c0_41, %c0_42], %39 {strides = array<i32>} : memref<4x1xf32, #tpu.memory_space<vmem>>, vector<4x1xf32>,
      %cst_43 = arith.constant 0.000000e+00 : f32
      %41 = vector.broadcast %cst_43 : f32 to vector<4x1xf32>
      %c0_44 = arith.constant 0 : index
      %c0_45 = arith.constant 0 : index
      %42 = vector.load %arg8[%c0_44, %c0_45] : memref<4x1xf32, #tpu.memory_space<vmem>>, vector<4x1xf32>
      tpu.vector_store %arg8[%c0_44, %c0_45], %41 {strides = array<i32>} : memref<4x1xf32, #tpu.memory_space<vmem>>, vector<4x1xf32>,
    } else {
    }
    %c0 = arith.constant 0 : index
    %c0_2 = arith.constant 0 : index
    %c0_3 = arith.constant 0 : index
    %5 = vector.load %arg2[%c0, %c0_2, %c0_3] : memref<1x4x2048xbf16, #tpu.memory_space<vmem>>, vector<1x4x2048xbf16>
    %6 = vector.shape_cast %5 : vector<1x4x2048xbf16> to vector<4x2048xbf16>
    %c0_4 = arith.constant 0 : index
    %c0_5 = arith.constant 0 : index
    %c0_6 = arith.constant 0 : index
    %7 = vector.load %arg3[%c0_4, %c0_5, %c0_6] : memref<1x4x2048xbf16, #tpu.memory_space<vmem>>, vector<1x4x2048xbf16>
    %8 = vector.shape_cast %7 : vector<1x4x2048xbf16> to vector<4x2048xbf16>
    %c0_7 = arith.constant 0 : index
    %c0_8 = arith.constant 0 : index
    %9 = vector.load %arg4[%c0_7, %c0_8] : memref<4x4xf32, #tpu.memory_space<vmem>>, vector<4x4xf32>
    %cst = arith.constant dense<0.000000e+00> : vector<4x4xf32>
    %10 = tpu.matmul %6, %6, %cst {dimension_numbers = #tpu.dot_dimension_numbers<[1], [1], [0], [0], [0, 0, 1, 0], [], []>} : vector<4x2048xbf16>, vector<4x2048xbf16>, vector<4x4xf32> -> vector<4x4xf32>
    %11 = arith.addf %9, %10 : vector<4x4xf32>
    %c0_9 = arith.constant 0 : index
    %c0_10 = arith.constant 0 : index
    %12 = vector.load %arg4[%c0_9, %c0_10] : memref<4x4xf32, #tpu.memory_space<vmem>>, vector<4x4xf32>
    tpu.vector_store %arg4[%c0_9, %c0_10], %11 {strides = array<i32>} : memref<4x4xf32, #tpu.memory_space<vmem>>, vector<4x4xf32>,
    %c0_11 = arith.constant 0 : index
    %c0_12 = arith.constant 0 : index
    %13 = vector.load %arg5[%c0_11, %c0_12] : memref<4x4xf32, #tpu.memory_space<vmem>>, vector<4x4xf32>
    %cst_13 = arith.constant dense<0.000000e+00> : vector<4x4xf32>
    %14 = tpu.matmul %6, %8, %cst_13 {dimension_numbers = #tpu.dot_dimension_numbers<[1], [1], [0], [0], [0, 0, 1, 0], [], []>} : vector<4x2048xbf16>, vector<4x2048xbf16>, vector<4x4xf32> -> vector<4x4xf32>
    %15 = arith.addf %13, %14 : vector<4x4xf32>
    %c0_14 = arith.constant 0 : index
    %c0_15 = arith.constant 0 : index
    %16 = vector.load %arg5[%c0_14, %c0_15] : memref<4x4xf32, #tpu.memory_space<vmem>>, vector<4x4xf32>
    tpu.vector_store %arg5[%c0_14, %c0_15], %15 {strides = array<i32>} : memref<4x4xf32, #tpu.memory_space<vmem>>, vector<4x4xf32>,
    %c0_16 = arith.constant 0 : index
    %c0_17 = arith.constant 0 : index
    %17 = vector.load %arg6[%c0_16, %c0_17] : memref<4x4xf32, #tpu.memory_space<vmem>>, vector<4x4xf32>
    %cst_18 = arith.constant dense<0.000000e+00> : vector<4x4xf32>
    %18 = tpu.matmul %8, %8, %cst_18 {dimension_numbers = #tpu.dot_dimension_numbers<[1], [1], [0], [0], [0, 0, 1, 0], [], []>} : vector<4x2048xbf16>, vector<4x2048xbf16>, vector<4x4xf32> -> vector<4x4xf32>
    %19 = arith.addf %17, %18 : vector<4x4xf32>
    %c0_19 = arith.constant 0 : index
    %c0_20 = arith.constant 0 : index
    %20 = vector.load %arg6[%c0_19, %c0_20] : memref<4x4xf32, #tpu.memory_space<vmem>>, vector<4x4xf32>
    tpu.vector_store %arg6[%c0_19, %c0_20], %19 {strides = array<i32>} : memref<4x4xf32, #tpu.memory_space<vmem>>, vector<4x4xf32>,
    %c0_21 = arith.constant 0 : index
    %c0_22 = arith.constant 0 : index
    %21 = vector.load %arg7[%c0_21, %c0_22] : memref<4x1xf32, #tpu.memory_space<vmem>>, vector<4x1xf32>
    %22 = arith.extf %6 : vector<4x2048xbf16> to vector<4x2048xf32>
    %cst_23 = arith.constant dense<0.000000e+00> : vector<4xf32>
    %23 = vector.multi_reduction <add>, %22, %cst_23 [1] : vector<4x2048xf32> to vector<4xf32>
    %24 = vector.shape_cast %23 : vector<4xf32> to vector<4x1xf32>
    %25 = arith.addf %21, %24 : vector<4x1xf32>
    %c0_24 = arith.constant 0 : index
    %c0_25 = arith.constant 0 : index
    %26 = vector.load %arg7[%c0_24, %c0_25] : memref<4x1xf32, #tpu.memory_space<vmem>>, vector<4x1xf32>
    tpu.vector_store %arg7[%c0_24, %c0_25], %25 {strides = array<i32>} : memref<4x1xf32, #tpu.memory_space<vmem>>, vector<4x1xf32>,
    %c0_26 = arith.constant 0 : index
    %c0_27 = arith.constant 0 : index
    %27 = vector.load %arg8[%c0_26, %c0_27] : memref<4x1xf32, #tpu.memory_space<vmem>>, vector<4x1xf32>
    %28 = arith.extf %8 : vector<4x2048xbf16> to vector<4x2048xf32>
    %cst_28 = arith.constant dense<0.000000e+00> : vector<4xf32>
    %29 = vector.multi_reduction <add>, %28, %cst_28 [1] : vector<4x2048xf32> to vector<4xf32>
    %30 = vector.shape_cast %29 : vector<4xf32> to vector<4x1xf32>
    %31 = arith.addf %27, %30 : vector<4x1xf32>
    %c0_29 = arith.constant 0 : index
    %c0_30 = arith.constant 0 : index
    %32 = vector.load %arg8[%c0_29, %c0_30] : memref<4x1xf32, #tpu.memory_space<vmem>>, vector<4x1xf32>
    tpu.vector_store %arg8[%c0_29, %c0_30], %31 {strides = array<i32>} : memref<4x1xf32, #tpu.memory_space<vmem>>, vector<4x1xf32>,
    return
  }
  func.func @transform_0(%arg0: i32, %arg1: i32) -> (i32, i32, i32) {
    %c0_i32 = arith.constant 0 : i32
    %c0_i32_0 = arith.constant 0 : i32
    return %arg0, %c0_i32, %arg1 : i32, i32, i32
  }
  func.func @transform_1(%arg0: i32, %arg1: i32) -> (i32, i32, i32) {
    %c0_i32 = arith.constant 0 : i32
    %c0_i32_0 = arith.constant 0 : i32
    return %arg0, %c0_i32, %arg1 : i32, i32, i32
  }
  func.func @transform_2(%arg0: i32, %arg1: i32) -> (i32, i32) {
    %c0_i32 = arith.constant 0 : i32
    %c0_i32_0 = arith.constant 0 : i32
    %c0_i32_1 = arith.constant 0 : i32
    return %c0_i32, %c0_i32_0 : i32, i32
  }
  func.func @transform_3(%arg0: i32, %arg1: i32) -> (i32, i32) {
    %c0_i32 = arith.constant 0 : i32
    %c0_i32_0 = arith.constant 0 : i32
    %c0_i32_1 = arith.constant 0 : i32
    return %c0_i32, %c0_i32_0 : i32, i32
  }
  func.func @transform_4(%arg0: i32, %arg1: i32) -> (i32, i32) {
    %c0_i32 = arith.constant 0 : i32
    %c0_i32_0 = arith.constant 0 : i32
    %c0_i32_1 = arith.constant 0 : i32
    return %c0_i32, %c0_i32_0 : i32, i32
  }
  func.func @transform_5(%arg0: i32, %arg1: i32) -> (i32, i32) {
    %c0_i32 = arith.constant 0 : i32
    %c0_i32_0 = arith.constant 0 : i32
    %c0_i32_1 = arith.constant 0 : i32
    return %c0_i32, %c0_i32_0 : i32, i32
  }
  func.func @transform_6(%arg0: i32, %arg1: i32) -> (i32, i32) {
    %c0_i32 = arith.constant 0 : i32
    %c0_i32_0 = arith.constant 0 : i32
    %c0_i32_1 = arith.constant 0 : i32
    return %c0_i32, %c0_i32_0 : i32, i32
  }
}

module attributes {stable_mosaic.version = 11 : i64} {
  func.func @_spectrum_conv_kernel(%arg0: i32, %arg1: i32, %arg2: memref<1x4x2048xbf16, #tpu.memory_space<vmem>>, %arg3: memref<1x4x2048xbf16, #tpu.memory_space<vmem>>, %arg4: memref<4x4xbf16, #tpu.memory_space<vmem>>, %arg5: memref<4x4xbf16, #tpu.memory_space<vmem>>, %arg6: memref<4x4xbf16, #tpu.memory_space<vmem>>, %arg7: memref<4x4xbf16, #tpu.memory_space<vmem>>, %arg8: memref<4x1xf32, #tpu.memory_space<vmem>>, %arg9: memref<4x1xf32, #tpu.memory_space<vmem>>, %arg10: memref<1x4x2048xbf16, #tpu.memory_space<vmem>>, %arg11: memref<1x4x2048xbf16, #tpu.memory_space<vmem>>) attributes {dimension_semantics = [#tpu.dimension_semantics<parallel>, #tpu.dimension_semantics<parallel>], iteration_bounds = array<i64: 2, 1>, scalar_prefetch = 0 : i64, scratch_operands = 0 : i64, tpu.core_type = #tpu.core_type<tc>, window_params = [{transform_indices = @transform_0, window_bounds = array<i64: 1, 4, 2048>}, {transform_indices = @transform_1, window_bounds = array<i64: 1, 4, 2048>}, {pipeline_mode = #tpu.pipeline_mode<synchronous>, transform_indices = @transform_2, window_bounds = array<i64: 4, 4>}, {pipeline_mode = #tpu.pipeline_mode<synchronous>, transform_indices = @transform_3, window_bounds = array<i64: 4, 4>}, {pipeline_mode = #tpu.pipeline_mode<synchronous>, transform_indices = @transform_4, window_bounds = array<i64: 4, 4>}, {pipeline_mode = #tpu.pipeline_mode<synchronous>, transform_indices = @transform_5, window_bounds = array<i64: 4, 4>}, {pipeline_mode = #tpu.pipeline_mode<synchronous>, transform_indices = @transform_6, window_bounds = array<i64: 4, 1>}, {pipeline_mode = #tpu.pipeline_mode<synchronous>, transform_indices = @transform_7, window_bounds = array<i64: 4, 1>}, {transform_indices = @transform_8, window_bounds = array<i64: 1, 4, 2048>}, {transform_indices = @transform_9, window_bounds = array<i64: 1, 4, 2048>}]} {
    %c0 = arith.constant 0 : index
    %c0_0 = arith.constant 0 : index
    %c0_1 = arith.constant 0 : index
    %0 = vector.load %arg2[%c0, %c0_0, %c0_1] : memref<1x4x2048xbf16, #tpu.memory_space<vmem>>, vector<1x4x2048xbf16>
    %1 = vector.shape_cast %0 : vector<1x4x2048xbf16> to vector<4x2048xbf16>
    %c0_2 = arith.constant 0 : index
    %c0_3 = arith.constant 0 : index
    %c0_4 = arith.constant 0 : index
    %2 = vector.load %arg3[%c0_2, %c0_3, %c0_4] : memref<1x4x2048xbf16, #tpu.memory_space<vmem>>, vector<1x4x2048xbf16>
    %3 = vector.shape_cast %2 : vector<1x4x2048xbf16> to vector<4x2048xbf16>
    %c0_5 = arith.constant 0 : index
    %c0_6 = arith.constant 0 : index
    %4 = vector.load %arg4[%c0_5, %c0_6] : memref<4x4xbf16, #tpu.memory_space<vmem>>, vector<4x4xbf16>
    %cst = arith.constant dense<0.000000e+00> : vector<4x2048xf32>
    %5 = tpu.matmul %4, %1, %cst {dimension_numbers = #tpu.dot_dimension_numbers<[1], [0], [0], [1], [0, 0, 1, 1], [], []>} : vector<4x4xbf16>, vector<4x2048xbf16>, vector<4x2048xf32> -> vector<4x2048xf32>
    %c0_7 = arith.constant 0 : index
    %c0_8 = arith.constant 0 : index
    %6 = vector.load %arg5[%c0_7, %c0_8] : memref<4x4xbf16, #tpu.memory_space<vmem>>, vector<4x4xbf16>
    %cst_9 = arith.constant dense<0.000000e+00> : vector<4x2048xf32>
    %7 = tpu.matmul %6, %3, %cst_9 {dimension_numbers = #tpu.dot_dimension_numbers<[1], [0], [0], [1], [0, 0, 1, 1], [], []>} : vector<4x4xbf16>, vector<4x2048xbf16>, vector<4x2048xf32> -> vector<4x2048xf32>
    %8 = arith.addf %5, %7 : vector<4x2048xf32>
    %c0_10 = arith.constant 0 : index
    %c0_11 = arith.constant 0 : index
    %9 = vector.load %arg8[%c0_10, %c0_11] : memref<4x1xf32, #tpu.memory_space<vmem>>, vector<4x1xf32>
    %10 = vector.broadcast %9 : vector<4x1xf32> to vector<4x2048xf32>
    %11 = arith.addf %8, %10 : vector<4x2048xf32>
    %c0_12 = arith.constant 0 : index
    %c0_13 = arith.constant 0 : index
    %12 = vector.load %arg6[%c0_12, %c0_13] : memref<4x4xbf16, #tpu.memory_space<vmem>>, vector<4x4xbf16>
    %cst_14 = arith.constant dense<0.000000e+00> : vector<4x2048xf32>
    %13 = tpu.matmul %12, %1, %cst_14 {dimension_numbers = #tpu.dot_dimension_numbers<[1], [0], [0], [1], [0, 0, 1, 1], [], []>} : vector<4x4xbf16>, vector<4x2048xbf16>, vector<4x2048xf32> -> vector<4x2048xf32>
    %c0_15 = arith.constant 0 : index
    %c0_16 = arith.constant 0 : index
    %14 = vector.load %arg7[%c0_15, %c0_16] : memref<4x4xbf16, #tpu.memory_space<vmem>>, vector<4x4xbf16>
    %cst_17 = arith.constant dense<0.000000e+00> : vector<4x2048xf32>
    %15 = tpu.matmul %14, %3, %cst_17 {dimension_numbers = #tpu.dot_dimension_numbers<[1], [0], [0], [1], [0, 0, 1, 1], [], []>} : vector<4x4xbf16>, vector<4x2048xbf16>, vector<4x2048xf32> -> vector<4x2048xf32>
    %16 = arith.addf %13, %15 : vector<4x2048xf32>
    %c0_18 = arith.constant 0 : index
    %c0_19 = arith.constant 0 : index
    %17 = vector.load %arg9[%c0_18, %c0_19] : memref<4x1xf32, #tpu.memory_space<vmem>>, vector<4x1xf32>
    %18 = vector.broadcast %17 : vector<4x1xf32> to vector<4x2048xf32>
    %19 = arith.addf %16, %18 : vector<4x2048xf32>
    %cst_20 = arith.constant 0.000000e+00 : f32
    %20 = vector.broadcast %cst_20 : f32 to vector<4x2048xf32>
    %21 = arith.maximumf %11, %20 : vector<4x2048xf32>
    %22 = arith.truncf %21 : vector<4x2048xf32> to vector<4x2048xbf16>
    %c0_21 = arith.constant 0 : index
    %c0_22 = arith.constant 0 : index
    %c0_23 = arith.constant 0 : index
    %23 = vector.load %arg10[%c0_21, %c0_22, %c0_23] : memref<1x4x2048xbf16, #tpu.memory_space<vmem>>, vector<1x4x2048xbf16>
    %24 = vector.shape_cast %23 : vector<1x4x2048xbf16> to vector<4x2048xbf16>
    %25 = vector.shape_cast %22 : vector<4x2048xbf16> to vector<1x4x2048xbf16>
    tpu.vector_store %arg10[%c0_21, %c0_22, %c0_23], %25 {strides = array<i32>} : memref<1x4x2048xbf16, #tpu.memory_space<vmem>>, vector<1x4x2048xbf16>,
    %cst_24 = arith.constant 0.000000e+00 : f32
    %26 = vector.broadcast %cst_24 : f32 to vector<4x2048xf32>
    %27 = arith.maximumf %19, %26 : vector<4x2048xf32>
    %28 = arith.truncf %27 : vector<4x2048xf32> to vector<4x2048xbf16>
    %c0_25 = arith.constant 0 : index
    %c0_26 = arith.constant 0 : index
    %c0_27 = arith.constant 0 : index
    %29 = vector.load %arg11[%c0_25, %c0_26, %c0_27] : memref<1x4x2048xbf16, #tpu.memory_space<vmem>>, vector<1x4x2048xbf16>
    %30 = vector.shape_cast %29 : vector<1x4x2048xbf16> to vector<4x2048xbf16>
    %31 = vector.shape_cast %28 : vector<4x2048xbf16> to vector<1x4x2048xbf16>
    tpu.vector_store %arg11[%c0_25, %c0_26, %c0_27], %31 {strides = array<i32>} : memref<1x4x2048xbf16, #tpu.memory_space<vmem>>, vector<1x4x2048xbf16>,
    return
  }
  func.func @transform_0(%arg0: i32, %arg1: i32) -> (i32, i32, i32) {
    %c0_i32 = arith.constant 0 : i32
    %c0_i32_0 = arith.constant 0 : i32
    return %arg0, %c0_i32, %arg1 : i32, i32, i32
  }
  func.func @transform_1(%arg0: i32, %arg1: i32) -> (i32, i32, i32) {
    %c0_i32 = arith.constant 0 : i32
    %c0_i32_0 = arith.constant 0 : i32
    return %arg0, %c0_i32, %arg1 : i32, i32, i32
  }
  func.func @transform_2(%arg0: i32, %arg1: i32) -> (i32, i32) {
    %c0_i32 = arith.constant 0 : i32
    %c0_i32_0 = arith.constant 0 : i32
    %c0_i32_1 = arith.constant 0 : i32
    return %c0_i32, %c0_i32_0 : i32, i32
  }
  func.func @transform_3(%arg0: i32, %arg1: i32) -> (i32, i32) {
    %c0_i32 = arith.constant 0 : i32
    %c0_i32_0 = arith.constant 0 : i32
    %c0_i32_1 = arith.constant 0 : i32
    return %c0_i32, %c0_i32_0 : i32, i32
  }
  func.func @transform_4(%arg0: i32, %arg1: i32) -> (i32, i32) {
    %c0_i32 = arith.constant 0 : i32
    %c0_i32_0 = arith.constant 0 : i32
    %c0_i32_1 = arith.constant 0 : i32
    return %c0_i32, %c0_i32_0 : i32, i32
  }
  func.func @transform_5(%arg0: i32, %arg1: i32) -> (i32, i32) {
    %c0_i32 = arith.constant 0 : i32
    %c0_i32_0 = arith.constant 0 : i32
    %c0_i32_1 = arith.constant 0 : i32
    return %c0_i32, %c0_i32_0 : i32, i32
  }
  func.func @transform_6(%arg0: i32, %arg1: i32) -> (i32, i32) {
    %c0_i32 = arith.constant 0 : i32
    %c0_i32_0 = arith.constant 0 : i32
    %c0_i32_1 = arith.constant 0 : i32
    return %c0_i32, %c0_i32_0 : i32, i32
  }
  func.func @transform_7(%arg0: i32, %arg1: i32) -> (i32, i32) {
    %c0_i32 = arith.constant 0 : i32
    %c0_i32_0 = arith.constant 0 : i32
    %c0_i32_1 = arith.constant 0 : i32
    return %c0_i32, %c0_i32_0 : i32, i32
  }
  func.func @transform_8(%arg0: i32, %arg1: i32) -> (i32, i32, i32) {
    %c0_i32 = arith.constant 0 : i32
    %c0_i32_0 = arith.constant 0 : i32
    return %arg0, %c0_i32, %arg1 : i32, i32, i32
  }
  func.func @transform_9(%arg0: i32, %arg1: i32) -> (i32, i32, i32) {
    %c0_i32 = arith.constant 0 : i32
    %c0_i32_0 = arith.constant 0 : i32
    return %arg0, %c0_i32, %arg1 : i32, i32, i32
  }
}

module attributes {stable_mosaic.version = 11 : i64} {
  func.func @_irfft2_kernel(%arg0: i32, %arg1: i32, %arg2: memref<1x4x16x128xbf16, #tpu.memory_space<vmem>>, %arg3: memref<1x4x16x128xbf16, #tpu.memory_space<vmem>>, %arg4: memref<16x16xbf16, #tpu.memory_space<vmem>>, %arg5: memref<16x16xbf16, #tpu.memory_space<vmem>>, %arg6: memref<16x16xbf16, #tpu.memory_space<vmem>>, %arg7: memref<128x16xbf16, #tpu.memory_space<vmem>>, %arg8: memref<128x16xbf16, #tpu.memory_space<vmem>>, %arg9: memref<1x64x16xbf16, #tpu.memory_space<vmem>>, %arg10: memref<64x128xf32, #tpu.memory_space<vmem>>, %arg11: memref<64x128xf32, #tpu.memory_space<vmem>>) attributes {dimension_semantics = [#tpu.dimension_semantics<parallel>, #tpu.dimension_semantics<parallel>], iteration_bounds = array<i64: 2, 1>, scalar_prefetch = 0 : i64, scratch_operands = 2 : i64, tpu.core_type = #tpu.core_type<tc>, window_params = [{transform_indices = @transform_0, window_bounds = array<i64: 1, 4, 16, 128>}, {transform_indices = @transform_1, window_bounds = array<i64: 1, 4, 16, 128>}, {pipeline_mode = #tpu.pipeline_mode<synchronous>, transform_indices = @transform_2, window_bounds = array<i64: 16, 16>}, {pipeline_mode = #tpu.pipeline_mode<synchronous>, transform_indices = @transform_3, window_bounds = array<i64: 16, 16>}, {pipeline_mode = #tpu.pipeline_mode<synchronous>, transform_indices = @transform_4, window_bounds = array<i64: 16, 16>}, {pipeline_mode = #tpu.pipeline_mode<synchronous>, transform_indices = @transform_5, window_bounds = array<i64: 128, 16>}, {pipeline_mode = #tpu.pipeline_mode<synchronous>, transform_indices = @transform_6, window_bounds = array<i64: 128, 16>}, {transform_indices = @transform_7, window_bounds = array<i64: 1, 64, 16>}]} {
    %c0 = arith.constant 0 : index
    %c0_0 = arith.constant 0 : index
    %c0_1 = arith.constant 0 : index
    %c0_2 = arith.constant 0 : index
    %0 = vector.load %arg2[%c0, %c0_0, %c0_1, %c0_2] : memref<1x4x16x128xbf16, #tpu.memory_space<vmem>>, vector<1x1x16x128xbf16>
    %1 = vector.shape_cast %0 : vector<1x1x16x128xbf16> to vector<16x128xbf16>
    %2 = arith.extf %1 : vector<16x128xbf16> to vector<16x128xf32>
    %c0_3 = arith.constant 0 : index
    %c0_4 = arith.constant 0 : index
    %c0_5 = arith.constant 0 : index
    %c0_6 = arith.constant 0 : index
    %3 = vector.load %arg3[%c0_3, %c0_4, %c0_5, %c0_6] : memref<1x4x16x128xbf16, #tpu.memory_space<vmem>>, vector<1x1x16x128xbf16>
    %4 = vector.shape_cast %3 : vector<1x1x16x128xbf16> to vector<16x128xbf16>
    %5 = arith.extf %4 : vector<16x128xbf16> to vector<16x128xf32>
    %c0_7 = arith.constant 0 : index
    %c0_8 = arith.constant 0 : index
    %6 = vector.load %arg4[%c0_7, %c0_8] : memref<16x16xbf16, #tpu.memory_space<vmem>>, vector<16x16xbf16>
    %cst = arith.constant dense<0.000000e+00> : vector<16x128xf32>
    %7 = tpu.matmul %6, %2, %cst {dimension_numbers = #tpu.dot_dimension_numbers<[1], [0], [0], [1], [0, 0, 1, 1], [], []>} : vector<16x16xbf16>, vector<16x128xf32>, vector<16x128xf32> -> vector<16x128xf32>
    %c0_9 = arith.constant 0 : index
    %c0_10 = arith.constant 0 : index
    %8 = vector.load %arg5[%c0_9, %c0_10] : memref<16x16xbf16, #tpu.memory_space<vmem>>, vector<16x16xbf16>
    %cst_11 = arith.constant dense<0.000000e+00> : vector<16x128xf32>
    %9 = tpu.matmul %8, %5, %cst_11 {dimension_numbers = #tpu.dot_dimension_numbers<[1], [0], [0], [1], [0, 0, 1, 1], [], []>} : vector<16x16xbf16>, vector<16x128xf32>, vector<16x128xf32> -> vector<16x128xf32>
    %c0_12 = arith.constant 0 : index
    %c0_13 = arith.constant 0 : index
    %10 = vector.load %arg6[%c0_12, %c0_13] : memref<16x16xbf16, #tpu.memory_space<vmem>>, vector<16x16xbf16>
    %11 = arith.addf %2, %5 : vector<16x128xf32>
    %cst_14 = arith.constant dense<0.000000e+00> : vector<16x128xf32>
    %12 = tpu.matmul %10, %11, %cst_14 {dimension_numbers = #tpu.dot_dimension_numbers<[1], [0], [0], [1], [0, 0, 1, 1], [], []>} : vector<16x16xbf16>, vector<16x128xf32>, vector<16x128xf32> -> vector<16x128xf32>
    %13 = arith.subf %7, %9 : vector<16x128xf32>
    %c0_15 = arith.constant 0 : index
    %c0_16 = arith.constant 0 : index
    %14 = vector.load %arg10[%c0_15, %c0_16] : memref<64x128xf32, #tpu.memory_space<vmem>>, vector<16x128xf32>
    tpu.vector_store %arg10[%c0_15, %c0_16], %13 {strides = array<i32>} : memref<64x128xf32, #tpu.memory_space<vmem>>, vector<16x128xf32>,
    %15 = arith.subf %12, %7 : vector<16x128xf32>
    %16 = arith.subf %15, %9 : vector<16x128xf32>
    %c0_17 = arith.constant 0 : index
    %c0_18 = arith.constant 0 : index
    %17 = vector.load %arg11[%c0_17, %c0_18] : memref<64x128xf32, #tpu.memory_space<vmem>>, vector<16x128xf32>
    tpu.vector_store %arg11[%c0_17, %c0_18], %16 {strides = array<i32>} : memref<64x128xf32, #tpu.memory_space<vmem>>, vector<16x128xf32>,
    %c0_19 = arith.constant 0 : index
    %c1 = arith.constant 1 : index
    %c0_20 = arith.constant 0 : index
    %c0_21 = arith.constant 0 : index
    %18 = vector.load %arg2[%c0_19, %c1, %c0_20, %c0_21] : memref<1x4x16x128xbf16, #tpu.memory_space<vmem>>, vector<1x1x16x128xbf16>
    %19 = vector.shape_cast %18 : vector<1x1x16x128xbf16> to vector<16x128xbf16>
    %20 = arith.extf %19 : vector<16x128xbf16> to vector<16x128xf32>
    %c0_22 = arith.constant 0 : index
    %c1_23 = arith.constant 1 : index
    %c0_24 = arith.constant 0 : index
    %c0_25 = arith.constant 0 : index
    %21 = vector.load %arg3[%c0_22, %c1_23, %c0_24, %c0_25] : memref<1x4x16x128xbf16, #tpu.memory_space<vmem>>, vector<1x1x16x128xbf16>
    %22 = vector.shape_cast %21 : vector<1x1x16x128xbf16> to vector<16x128xbf16>
    %23 = arith.extf %22 : vector<16x128xbf16> to vector<16x128xf32>
    %c0_26 = arith.constant 0 : index
    %c0_27 = arith.constant 0 : index
    %24 = vector.load %arg4[%c0_26, %c0_27] : memref<16x16xbf16, #tpu.memory_space<vmem>>, vector<16x16xbf16>
    %cst_28 = arith.constant dense<0.000000e+00> : vector<16x128xf32>
    %25 = tpu.matmul %24, %20, %cst_28 {dimension_numbers = #tpu.dot_dimension_numbers<[1], [0], [0], [1], [0, 0, 1, 1], [], []>} : vector<16x16xbf16>, vector<16x128xf32>, vector<16x128xf32> -> vector<16x128xf32>
    %c0_29 = arith.constant 0 : index
    %c0_30 = arith.constant 0 : index
    %26 = vector.load %arg5[%c0_29, %c0_30] : memref<16x16xbf16, #tpu.memory_space<vmem>>, vector<16x16xbf16>
    %cst_31 = arith.constant dense<0.000000e+00> : vector<16x128xf32>
    %27 = tpu.matmul %26, %23, %cst_31 {dimension_numbers = #tpu.dot_dimension_numbers<[1], [0], [0], [1], [0, 0, 1, 1], [], []>} : vector<16x16xbf16>, vector<16x128xf32>, vector<16x128xf32> -> vector<16x128xf32>
    %c0_32 = arith.constant 0 : index
    %c0_33 = arith.constant 0 : index
    %28 = vector.load %arg6[%c0_32, %c0_33] : memref<16x16xbf16, #tpu.memory_space<vmem>>, vector<16x16xbf16>
    %29 = arith.addf %20, %23 : vector<16x128xf32>
    %cst_34 = arith.constant dense<0.000000e+00> : vector<16x128xf32>
    %30 = tpu.matmul %28, %29, %cst_34 {dimension_numbers = #tpu.dot_dimension_numbers<[1], [0], [0], [1], [0, 0, 1, 1], [], []>} : vector<16x16xbf16>, vector<16x128xf32>, vector<16x128xf32> -> vector<16x128xf32>
    %31 = arith.subf %25, %27 : vector<16x128xf32>
    %c16 = arith.constant 16 : index
    %c0_35 = arith.constant 0 : index
    %32 = vector.load %arg10[%c16, %c0_35] : memref<64x128xf32, #tpu.memory_space<vmem>>, vector<16x128xf32>
    tpu.vector_store %arg10[%c16, %c0_35], %31 {strides = array<i32>} : memref<64x128xf32, #tpu.memory_space<vmem>>, vector<16x128xf32>,
    %33 = arith.subf %30, %25 : vector<16x128xf32>
    %34 = arith.subf %33, %27 : vector<16x128xf32>
    %c16_36 = arith.constant 16 : index
    %c0_37 = arith.constant 0 : index
    %35 = vector.load %arg11[%c16_36, %c0_37] : memref<64x128xf32, #tpu.memory_space<vmem>>, vector<16x128xf32>
    tpu.vector_store %arg11[%c16_36, %c0_37], %34 {strides = array<i32>} : memref<64x128xf32, #tpu.memory_space<vmem>>, vector<16x128xf32>,
    %c0_38 = arith.constant 0 : index
    %c2 = arith.constant 2 : index
    %c0_39 = arith.constant 0 : index
    %c0_40 = arith.constant 0 : index
    %36 = vector.load %arg2[%c0_38, %c2, %c0_39, %c0_40] : memref<1x4x16x128xbf16, #tpu.memory_space<vmem>>, vector<1x1x16x128xbf16>
    %37 = vector.shape_cast %36 : vector<1x1x16x128xbf16> to vector<16x128xbf16>
    %38 = arith.extf %37 : vector<16x128xbf16> to vector<16x128xf32>
    %c0_41 = arith.constant 0 : index
    %c2_42 = arith.constant 2 : index
    %c0_43 = arith.constant 0 : index
    %c0_44 = arith.constant 0 : index
    %39 = vector.load %arg3[%c0_41, %c2_42, %c0_43, %c0_44] : memref<1x4x16x128xbf16, #tpu.memory_space<vmem>>, vector<1x1x16x128xbf16>
    %40 = vector.shape_cast %39 : vector<1x1x16x128xbf16> to vector<16x128xbf16>
    %41 = arith.extf %40 : vector<16x128xbf16> to vector<16x128xf32>
    %c0_45 = arith.constant 0 : index
    %c0_46 = arith.constant 0 : index
    %42 = vector.load %arg4[%c0_45, %c0_46] : memref<16x16xbf16, #tpu.memory_space<vmem>>, vector<16x16xbf16>
    %cst_47 = arith.constant dense<0.000000e+00> : vector<16x128xf32>
    %43 = tpu.matmul %42, %38, %cst_47 {dimension_numbers = #tpu.dot_dimension_numbers<[1], [0], [0], [1], [0, 0, 1, 1], [], []>} : vector<16x16xbf16>, vector<16x128xf32>, vector<16x128xf32> -> vector<16x128xf32>
    %c0_48 = arith.constant 0 : index
    %c0_49 = arith.constant 0 : index
    %44 = vector.load %arg5[%c0_48, %c0_49] : memref<16x16xbf16, #tpu.memory_space<vmem>>, vector<16x16xbf16>
    %cst_50 = arith.constant dense<0.000000e+00> : vector<16x128xf32>
    %45 = tpu.matmul %44, %41, %cst_50 {dimension_numbers = #tpu.dot_dimension_numbers<[1], [0], [0], [1], [0, 0, 1, 1], [], []>} : vector<16x16xbf16>, vector<16x128xf32>, vector<16x128xf32> -> vector<16x128xf32>
    %c0_51 = arith.constant 0 : index
    %c0_52 = arith.constant 0 : index
    %46 = vector.load %arg6[%c0_51, %c0_52] : memref<16x16xbf16, #tpu.memory_space<vmem>>, vector<16x16xbf16>
    %47 = arith.addf %38, %41 : vector<16x128xf32>
    %cst_53 = arith.constant dense<0.000000e+00> : vector<16x128xf32>
    %48 = tpu.matmul %46, %47, %cst_53 {dimension_numbers = #tpu.dot_dimension_numbers<[1], [0], [0], [1], [0, 0, 1, 1], [], []>} : vector<16x16xbf16>, vector<16x128xf32>, vector<16x128xf32> -> vector<16x128xf32>
    %49 = arith.subf %43, %45 : vector<16x128xf32>
    %c32 = arith.constant 32 : index
    %c0_54 = arith.constant 0 : index
    %50 = vector.load %arg10[%c32, %c0_54] : memref<64x128xf32, #tpu.memory_space<vmem>>, vector<16x128xf32>
    tpu.vector_store %arg10[%c32, %c0_54], %49 {strides = array<i32>} : memref<64x128xf32, #tpu.memory_space<vmem>>, vector<16x128xf32>,
    %51 = arith.subf %48, %43 : vector<16x128xf32>
    %52 = arith.subf %51, %45 : vector<16x128xf32>
    %c32_55 = arith.constant 32 : index
    %c0_56 = arith.constant 0 : index
    %53 = vector.load %arg11[%c32_55, %c0_56] : memref<64x128xf32, #tpu.memory_space<vmem>>, vector<16x128xf32>
    tpu.vector_store %arg11[%c32_55, %c0_56], %52 {strides = array<i32>} : memref<64x128xf32, #tpu.memory_space<vmem>>, vector<16x128xf32>,
    %c0_57 = arith.constant 0 : index
    %c3 = arith.constant 3 : index
    %c0_58 = arith.constant 0 : index
    %c0_59 = arith.constant 0 : index
    %54 = vector.load %arg2[%c0_57, %c3, %c0_58, %c0_59] : memref<1x4x16x128xbf16, #tpu.memory_space<vmem>>, vector<1x1x16x128xbf16>
    %55 = vector.shape_cast %54 : vector<1x1x16x128xbf16> to vector<16x128xbf16>
    %56 = arith.extf %55 : vector<16x128xbf16> to vector<16x128xf32>
    %c0_60 = arith.constant 0 : index
    %c3_61 = arith.constant 3 : index
    %c0_62 = arith.constant 0 : index
    %c0_63 = arith.constant 0 : index
    %57 = vector.load %arg3[%c0_60, %c3_61, %c0_62, %c0_63] : memref<1x4x16x128xbf16, #tpu.memory_space<vmem>>, vector<1x1x16x128xbf16>
    %58 = vector.shape_cast %57 : vector<1x1x16x128xbf16> to vector<16x128xbf16>
    %59 = arith.extf %58 : vector<16x128xbf16> to vector<16x128xf32>
    %c0_64 = arith.constant 0 : index
    %c0_65 = arith.constant 0 : index
    %60 = vector.load %arg4[%c0_64, %c0_65] : memref<16x16xbf16, #tpu.memory_space<vmem>>, vector<16x16xbf16>
    %cst_66 = arith.constant dense<0.000000e+00> : vector<16x128xf32>
    %61 = tpu.matmul %60, %56, %cst_66 {dimension_numbers = #tpu.dot_dimension_numbers<[1], [0], [0], [1], [0, 0, 1, 1], [], []>} : vector<16x16xbf16>, vector<16x128xf32>, vector<16x128xf32> -> vector<16x128xf32>
    %c0_67 = arith.constant 0 : index
    %c0_68 = arith.constant 0 : index
    %62 = vector.load %arg5[%c0_67, %c0_68] : memref<16x16xbf16, #tpu.memory_space<vmem>>, vector<16x16xbf16>
    %cst_69 = arith.constant dense<0.000000e+00> : vector<16x128xf32>
    %63 = tpu.matmul %62, %59, %cst_69 {dimension_numbers = #tpu.dot_dimension_numbers<[1], [0], [0], [1], [0, 0, 1, 1], [], []>} : vector<16x16xbf16>, vector<16x128xf32>, vector<16x128xf32> -> vector<16x128xf32>
    %c0_70 = arith.constant 0 : index
    %c0_71 = arith.constant 0 : index
    %64 = vector.load %arg6[%c0_70, %c0_71] : memref<16x16xbf16, #tpu.memory_space<vmem>>, vector<16x16xbf16>
    %65 = arith.addf %56, %59 : vector<16x128xf32>
    %cst_72 = arith.constant dense<0.000000e+00> : vector<16x128xf32>
    %66 = tpu.matmul %64, %65, %cst_72 {dimension_numbers = #tpu.dot_dimension_numbers<[1], [0], [0], [1], [0, 0, 1, 1], [], []>} : vector<16x16xbf16>, vector<16x128xf32>, vector<16x128xf32> -> vector<16x128xf32>
    %67 = arith.subf %61, %63 : vector<16x128xf32>
    %c48 = arith.constant 48 : index
    %c0_73 = arith.constant 0 : index
    %68 = vector.load %arg10[%c48, %c0_73] : memref<64x128xf32, #tpu.memory_space<vmem>>, vector<16x128xf32>
    tpu.vector_store %arg10[%c48, %c0_73], %67 {strides = array<i32>} : memref<64x128xf32, #tpu.memory_space<vmem>>, vector<16x128xf32>,
    %69 = arith.subf %66, %61 : vector<16x128xf32>
    %70 = arith.subf %69, %63 : vector<16x128xf32>
    %c48_74 = arith.constant 48 : index
    %c0_75 = arith.constant 0 : index
    %71 = vector.load %arg11[%c48_74, %c0_75] : memref<64x128xf32, #tpu.memory_space<vmem>>, vector<16x128xf32>
    tpu.vector_store %arg11[%c48_74, %c0_75], %70 {strides = array<i32>} : memref<64x128xf32, #tpu.memory_space<vmem>>, vector<16x128xf32>,
    %c0_76 = arith.constant 0 : index
    %c0_77 = arith.constant 0 : index
    %72 = vector.load %arg10[%c0_76, %c0_77] : memref<64x128xf32, #tpu.memory_space<vmem>>, vector<64x128xf32>
    %c0_78 = arith.constant 0 : index
    %c0_79 = arith.constant 0 : index
    %73 = vector.load %arg7[%c0_78, %c0_79] : memref<128x16xbf16, #tpu.memory_space<vmem>>, vector<128x16xbf16>
    %cst_80 = arith.constant dense<0.000000e+00> : vector<64x16xf32>
    %74 = tpu.matmul %72, %73, %cst_80 {dimension_numbers = #tpu.dot_dimension_numbers<[1], [0], [0], [1], [0, 0, 1, 1], [], []>} : vector<64x128xf32>, vector<128x16xbf16>, vector<64x16xf32> -> vector<64x16xf32>
    %c0_81 = arith.constant 0 : index
    %c0_82 = arith.constant 0 : index
    %75 = vector.load %arg11[%c0_81, %c0_82] : memref<64x128xf32, #tpu.memory_space<vmem>>, vector<64x128xf32>
    %c0_83 = arith.constant 0 : index
    %c0_84 = arith.constant 0 : index
    %76 = vector.load %arg8[%c0_83, %c0_84] : memref<128x16xbf16, #tpu.memory_space<vmem>>, vector<128x16xbf16>
    %cst_85 = arith.constant dense<0.000000e+00> : vector<64x16xf32>
    %77 = tpu.matmul %75, %76, %cst_85 {dimension_numbers = #tpu.dot_dimension_numbers<[1], [0], [0], [1], [0, 0, 1, 1], [], []>} : vector<64x128xf32>, vector<128x16xbf16>, vector<64x16xf32> -> vector<64x16xf32>
    %78 = arith.addf %74, %77 : vector<64x16xf32>
    %79 = arith.truncf %78 : vector<64x16xf32> to vector<64x16xbf16>
    %c0_86 = arith.constant 0 : index
    %c0_87 = arith.constant 0 : index
    %c0_88 = arith.constant 0 : index
    %80 = vector.load %arg9[%c0_86, %c0_87, %c0_88] : memref<1x64x16xbf16, #tpu.memory_space<vmem>>, vector<1x64x16xbf16>
    %81 = vector.shape_cast %80 : vector<1x64x16xbf16> to vector<64x16xbf16>
    %82 = vector.shape_cast %79 : vector<64x16xbf16> to vector<1x64x16xbf16>
    tpu.vector_store %arg9[%c0_86, %c0_87, %c0_88], %82 {strides = array<i32>} : memref<1x64x16xbf16, #tpu.memory_space<vmem>>, vector<1x64x16xbf16>,
    return
  }
  func.func @transform_0(%arg0: i32, %arg1: i32) -> (i32, i32, i32, i32) {
    %c0_i32 = arith.constant 0 : i32
    %c0_i32_0 = arith.constant 0 : i32
    %c0_i32_1 = arith.constant 0 : i32
    return %arg0, %arg1, %c0_i32, %c0_i32_0 : i32, i32, i32, i32
  }
  func.func @transform_1(%arg0: i32, %arg1: i32) -> (i32, i32, i32, i32) {
    %c0_i32 = arith.constant 0 : i32
    %c0_i32_0 = arith.constant 0 : i32
    %c0_i32_1 = arith.constant 0 : i32
    return %arg0, %arg1, %c0_i32, %c0_i32_0 : i32, i32, i32, i32
  }
  func.func @transform_2(%arg0: i32, %arg1: i32) -> (i32, i32) {
    %c0_i32 = arith.constant 0 : i32
    %c0_i32_0 = arith.constant 0 : i32
    %c0_i32_1 = arith.constant 0 : i32
    return %c0_i32, %c0_i32_0 : i32, i32
  }
  func.func @transform_3(%arg0: i32, %arg1: i32) -> (i32, i32) {
    %c0_i32 = arith.constant 0 : i32
    %c0_i32_0 = arith.constant 0 : i32
    %c0_i32_1 = arith.constant 0 : i32
    return %c0_i32, %c0_i32_0 : i32, i32
  }
  func.func @transform_4(%arg0: i32, %arg1: i32) -> (i32, i32) {
    %c0_i32 = arith.constant 0 : i32
    %c0_i32_0 = arith.constant 0 : i32
    %c0_i32_1 = arith.constant 0 : i32
    return %c0_i32, %c0_i32_0 : i32, i32
  }
  func.func @transform_5(%arg0: i32, %arg1: i32) -> (i32, i32) {
    %c0_i32 = arith.constant 0 : i32
    %c0_i32_0 = arith.constant 0 : i32
    %c0_i32_1 = arith.constant 0 : i32
    return %c0_i32, %c0_i32_0 : i32, i32
  }
  func.func @transform_6(%arg0: i32, %arg1: i32) -> (i32, i32) {
    %c0_i32 = arith.constant 0 : i32
    %c0_i32_0 = arith.constant 0 : i32
    %c0_i32_1 = arith.constant 0 : i32
    return %c0_i32, %c0_i32_0 : i32, i32
  }
  func.func @transform_7(%arg0: i32, %arg1: i32) -> (i32, i32, i32) {
    %c0_i32 = arith.constant 0 : i32
    %c0_i32_0 = arith.constant 0 : i32
    return %arg0, %arg1, %c0_i32 : i32, i32, i32
  }
}

module attributes {stable_mosaic.version = 11 : i64} {
  func.func @_residual_conv_kernel(%arg0: i32, %arg1: i32, %arg2: memref<1x4x256xbf16, #tpu.memory_space<vmem>>, %arg3: memref<1x4x256xbf16, #tpu.memory_space<vmem>>, %arg4: memref<8x4xf32, #tpu.memory_space<vmem>>, %arg5: memref<1x8x256xf32, #tpu.memory_space<vmem>>) attributes {dimension_semantics = [#tpu.dimension_semantics<parallel>, #tpu.dimension_semantics<parallel>], iteration_bounds = array<i64: 2, 1>, scalar_prefetch = 0 : i64, scratch_operands = 0 : i64, tpu.core_type = #tpu.core_type<tc>, window_params = [{transform_indices = @transform_0, window_bounds = array<i64: 1, 4, 256>}, {transform_indices = @transform_1, window_bounds = array<i64: 1, 4, 256>}, {pipeline_mode = #tpu.pipeline_mode<synchronous>, transform_indices = @transform_2, window_bounds = array<i64: 8, 4>}, {transform_indices = @transform_3, window_bounds = array<i64: 1, 8, 256>}]} {
    %c0 = arith.constant 0 : index
    %c0_0 = arith.constant 0 : index
    %c0_1 = arith.constant 0 : index
    %0 = vector.load %arg2[%c0, %c0_0, %c0_1] : memref<1x4x256xbf16, #tpu.memory_space<vmem>>, vector<1x4x256xbf16>
    %1 = vector.shape_cast %0 : vector<1x4x256xbf16> to vector<4x256xbf16>
    %2 = arith.extf %1 : vector<4x256xbf16> to vector<4x256xf32>
    %c0_2 = arith.constant 0 : index
    %c0_3 = arith.constant 0 : index
    %c0_4 = arith.constant 0 : index
    %3 = vector.load %arg3[%c0_2, %c0_3, %c0_4] : memref<1x4x256xbf16, #tpu.memory_space<vmem>>, vector<1x4x256xbf16>
    %4 = vector.shape_cast %3 : vector<1x4x256xbf16> to vector<4x256xbf16>
    %5 = arith.extf %4 : vector<4x256xbf16> to vector<4x256xf32>
    %6 = arith.addf %2, %5 : vector<4x256xf32>
    %c0_5 = arith.constant 0 : index
    %c0_6 = arith.constant 0 : index
    %7 = vector.load %arg4[%c0_5, %c0_6] : memref<8x4xf32, #tpu.memory_space<vmem>>, vector<8x4xf32>
    %cst = arith.constant dense<0.000000e+00> : vector<8x256xf32>
    %8 = tpu.matmul %7, %6, %cst {dimension_numbers = #tpu.dot_dimension_numbers<[1], [0], [0], [1], [0, 0, 1, 1], [], []>} : vector<8x4xf32>, vector<4x256xf32>, vector<8x256xf32> -> vector<8x256xf32>
    %c0_7 = arith.constant 0 : index
    %c0_8 = arith.constant 0 : index
    %c0_9 = arith.constant 0 : index
    %9 = vector.load %arg5[%c0_7, %c0_8, %c0_9] : memref<1x8x256xf32, #tpu.memory_space<vmem>>, vector<1x8x256xf32>
    %10 = vector.shape_cast %9 : vector<1x8x256xf32> to vector<8x256xf32>
    %11 = vector.shape_cast %8 : vector<8x256xf32> to vector<1x8x256xf32>
    tpu.vector_store %arg5[%c0_7, %c0_8, %c0_9], %11 {strides = array<i32>} : memref<1x8x256xf32, #tpu.memory_space<vmem>>, vector<1x8x256xf32>,
    return
  }
  func.func @transform_0(%arg0: i32, %arg1: i32) -> (i32, i32, i32) {
    %c0_i32 = arith.constant 0 : i32
    %c0_i32_0 = arith.constant 0 : i32
    return %arg0, %c0_i32, %arg1 : i32, i32, i32
  }
  func.func @transform_1(%arg0: i32, %arg1: i32) -> (i32, i32, i32) {
    %c0_i32 = arith.constant 0 : i32
    %c0_i32_0 = arith.constant 0 : i32
    return %arg0, %c0_i32, %arg1 : i32, i32, i32
  }
  func.func @transform_2(%arg0: i32, %arg1: i32) -> (i32, i32) {
    %c0_i32 = arith.constant 0 : i32
    %c0_i32_0 = arith.constant 0 : i32
    %c0_i32_1 = arith.constant 0 : i32
    return %c0_i32, %c0_i32_0 : i32, i32
  }
  func.func @transform_3(%arg0: i32, %arg1: i32) -> (i32, i32, i32) {
    %c0_i32 = arith.constant 0 : i32
    %c0_i32_0 = arith.constant 0 : i32
    return %arg0, %c0_i32, %arg1 : i32, i32, i32
  }
}

</mosaic_0001>

<bundles_post_ra>
// kernel: spectral_transform_forward.7
= control target key start
LH: loop header
LB: loop body
LE: loop exit
PB: predicated region body
PF: predicated region fallthrough
CT: control target
= control target key end

     0   :  { %s378_s9 = smov 0   ;;  %s380_s10 = smov 0   ;;  %s426_s0 = inlined_call_operand.vmem [shape: f32[2,4,256], index: 0, kind: input, shape index: {}]   ;;  %s427_s1 = inlined_call_operand.vmem [shape: f32[4,4], index: 1, kind: output, shape index: {0}]   ;;  %s428_s2 = inlined_call_operand.vmem [shape: f32[4,1], index: 2, kind: output, shape index: {1}]  }
   0x1   :  { %s382_s11 = smov 0  }
   0x2 LB: > { %s25_s12 = sadd.s32 1, %s356_s10  ;;  %p304_p0 = scmp.ge.s32.totalorder %s360_s11, 1  ;;  %s360_s11 = sphi %s382_s11, %s13_s11   ;;  %s356_s10 = sphi %s380_s10, %s430_s10   ;;  %s352_s9 = sphi %s378_s9, %s429_s9  }
   0x3   : > { %p27_p1 = scmp.ge.s32.totalorder %s25_s12, 2  ;;  %p124_p2 = scmp.lt.s32.totalorder %s360_s11, 3 }
   0x5   : > { %s432_s12 = smov (%p27_p1, %s25_s12), 0  ;;  %p125_p3 = pnand %p304_p0, %p124_p2 }
   0x6   : > { %p146_p4 = scmp.lt.s32.totalorder (!%p125_p3), %s352_s9, 1  ;;  %p155_p5 = scmp.eq.s32.totalorder (!%p125_p3), %s352_s9, 0 }
   0x7   : > { %128 = sbr.rel (%p125_p3) target bundleno = 243 (0xf3), region = 24 }
   0xe   : > { %s434_s9 = smov (!%p146_p4, %s352_s9), 1  ;;  %160 = sbr.rel (!%p155_p5) target bundleno = 21 (0x15), region = 28 }
   0xf   : > { %s310_s13 = sshll.u32 %s434_s9, 3  ;;  %vm161_vm0 = vcmask (%p155_p5), 27648   ;;  %vm163_vm1 = vcmask (%p155_p5), 3072   ;;  %v362_v0 = vmov (%p155_p5), 0.0  }
  0x10   : > { %s153_s16 = scalar_lea.vmem %s426_s0, %s310_s13  ;;  %162 = vst.msk [vmem:[%s427_s1] sm:$0xf] (%p155_p5), %vm161_vm0, %v362_v0 }
  0x11   : > { %164 = vst.msk [vmem:[%s428_s2] sm:$0xf] (%p155_p5), %vm163_vm1, %v362_v0 }
  0x15 PF: > { %v165_v1 = vld [vmem:[%s153_s16] sm:$0xff]  ;;  %vm244_vm2 = vcmask 1043456   ;;  %vm251_vm3 = vcmask 3072   ;;  %vm241_vm4 = vcmask 27648  }
  0x16   : > { %v168_v2 = vcombine.high %v165_v1, %v165_v1  ;;  %v245_v3 = vsel %vm244_vm2, %v165_v1, 0.0 }
  0x17   : > { %v166_v9 = vld [vmem:[%s427_s1] sm:$0xf] }
  0x18   : > { %170 = vmatprep.subr.mxu0 %v168_v2  ;;  %234 = vmatprep.mubr.f32.mxu0 %v168_v2  ;;  %v246_v4 = vsel %vm244_vm2, %v168_v2, 0.0  ;;  %v243_v6 = vld [vmem:[%s428_s2] sm:$0xf] }
  0x19   : > { %171 = vmatpush1.xpose.msra.mxu0 %v165_v1  ;;  %v247_v5 = vadd.f32 %v246_v4, %v245_v3 }
  0x1b   : > { %248 = vadd.xlane.f32.xlu0 %v247_v5 }
  0x1c   : > { %235 = vmatmul.mubr.f32.vlgmr.msra.gmra.mrb[0].mxu0 %v165_v1 }
  0xa8   : > { %v249_v7 = vpop.xlane.xlu0 %248 }
  0xa9   : > { %v250_v8 = vadd.f32 %v249_v7, %v243_v6 }
  0xab   : > { %252 = vst.msk [vmem:[%s428_s2] sm:$0xf] %vm251_vm3, %v250_v8 }
  0xef   : > { %v236_v10 = vpop.f32.mrb[0].mxu0 }
  0xf0   : > { %v240_v11 = vadd.f32 %v236_v10, %v166_v9  ;;  %v238_v12 = vpop.f32.mrb[1].mxu0 }
  0xf2   : > { %242 = vst.msk [vmem:[%s427_s1] sm:$0xf] %vm241_vm4, %v240_v11 }
  0xf3 PF: > { %s13_s11 = sadd.s32 1, %s360_s11   ;;  %s429_s9 = smov %s356_s10 }
  0xf4   : > { %p10_p6 = scmp.ge.s32.totalorder %s13_s11, 4   ;;  %s430_s10 = smov %s432_s12 }
  0xf6   :  { %12 = sbr.rel (!%p10_p6) target bundleno = 2 (0x2), region = 62 }

// kernel: spectral_transform_forward.8
= control target key start
LH: loop header
LB: loop body
LE: loop exit
PB: predicated region body
PF: predicated region fallthrough
CT: control target
= control target key end

     0   :  { %s495_s12 = smov 0   ;;  %s497_s13 = smov 0   ;;  %s534_s0 = inlined_call_operand.vmem [shape: f32[2,4,256], index: 0, kind: input, shape index: {}]   ;;  %s535_s1 = inlined_call_operand.vmem [shape: f32[4,4], index: 1, kind: input, shape index: {}]   ;;  %s536_s2 = inlined_call_operand.vmem [shape: f32[4,1], index: 2, kind: input, shape index: {}]   ;;  %s537_s3 = inlined_call_operand.vmem [shape: bf16[2,4,256], index: 3, kind: output, shape index: {}]  }
   0x1   :  { %s499_s14 = smov 0  }
   0x2 LB: > { %s25_s15 = sadd.s32 1, %s467_s13  ;;  %p407_p0 = scmp.ge.s32.totalorder %s471_s14, 1  ;;  %s471_s14 = sphi %s499_s14, %s13_s14   ;;  %s467_s13 = sphi %s497_s13, %s539_s13   ;;  %s463_s12 = sphi %s495_s12, %s538_s12  }
   0x3   : > { %p27_p1 = scmp.ge.s32.totalorder %s25_s15, 2  ;;  %p158_p2 = scmp.lt.s32.totalorder %s471_s14, 3 }
   0x5   : > { %s541_s15 = smov (%p27_p1, %s25_s15), 0  ;;  %p159_p3 = pnand %p407_p0, %p158_p2 }
   0x6   : > { %p191_p4 = scmp.lt.s32.totalorder (!%p159_p3), %s463_s12, 1  ;;  %v473_v0 = vmov (!%p159_p3), 0.0   ;;  %v212_v1 = vld [vmem:[%s536_s2] sm:$0xf] (!%p159_p3)  ;;  %v474_v2 = vmov (!%p159_p3), 0   ;;  %vm224_vm0 = vcmask (!%p159_p3), 1043456  }
   0x7   : > { %162 = sbr.rel (%p159_p3) target bundleno = 242 (0xf2), region = 32  ;;  %293 = vmatprep.mubr.f32.mxu0 (!%p159_p3), %v473_v0  ;;  %447 = vset.pattern.permute.xlu0 (!%p159_p3), %v474_v2  ;;  %v210_v5 = vld [vmem:[%s535_s1] sm:$0xf] (!%p159_p3)  ;;  %vm220_vm1 = vcmask (!%p159_p3), 31744  }
   0x8   : > { %215 = vperm.xlu0 (!%p159_p3), %447, %v212_v1  }
   0xe   : > { %s543_s12 = smov (!%p191_p4, %s463_s12), 1 }
   0xf   : > { %s419_s18 = sshll.u32 %s543_s12, 3  ;;  %s420_s24 = sshll.u32 %s543_s12, 2 }
  0x10   : > { %s198_s21 = scalar_lea.vmem %s534_s0, %s419_s18  ;;  %s208_s27 = scalar_lea.vmem %s537_s3, %s420_s24 }
  0x11   : > { %v211_v3 = vld [vmem:[%s198_s21] sm:$0xff] }
  0x12   : > { %v219_v4 = vcombine.high %v211_v3, %v211_v3 }
  0x14   : > { %412 = vmatprep.subr.msk.mxu0 %vm224_vm0, %v219_v4 }
  0x15   : > { %413 = vmatpush1.msk.msra.mxu0 %vm224_vm0, %v211_v3 }
  0x16   : > { %414 = vmatmul.mubr.msk.f32.vlgmr.msra.gmra.mrb[0].mxu0 %vm220_vm1, %v210_v5 }
  0x87   : > { %v216_v6 = vpop.permute.xlu0 %215 }
  0xe9   : > { %v295_v7 = vpop.f32.mrb[0].mxu0 }
  0xea   : > { %v296_v8 = vadd.f32 %v295_v7, %v216_v6  ;;  %v297_v9 = vpop.f32.mrb[1].mxu0 }
  0xeb   : > { %v298_v10 = vadd.f32 %v297_v9, %v216_v6 }
  0xec   : > { %v300_v11 = vmax.f32 %v296_v8, 0.0 }
  0xed   : > { %v301_v12 = vmax.f32 %v298_v10, 0.0 }
  0xef   : > { %v415_v13 = vpack.c.bf16 %v301_v12, %v300_v11 }
  0xf1   : > { %416 = vst.sshfl [vmem:[%s208_s27] sm:$0x33 pattern:$0x76325410] %v415_v13 }
  0xf2 PF: > { %s13_s14 = sadd.s32 1, %s471_s14   ;;  %s538_s12 = smov %s467_s13 }
  0xf3   : > { %p10_p5 = scmp.ge.s32.totalorder %s13_s14, 4   ;;  %s539_s13 = smov %s541_s15 }
  0xf5   :  { %12 = sbr.rel (!%p10_p5) target bundleno = 2 (0x2), region = 62 }

// kernel: spectral_transform_forward.9
= control target key start
LH: loop header
LB: loop body
LE: loop exit
PB: predicated region body
PF: predicated region fallthrough
CT: control target
= control target key end

     0   :  { %s2251_s24 = smov 0   ;;  %s2253_s25 = smov 0   ;;  %s2402_s0 = inlined_call_operand.vmem [shape: bf16[2,64,16], index: 0, kind: input, shape index: {}]   ;;  %s2403_s1 = inlined_call_operand.vmem [shape: bf16[16,128], index: 1, kind: input, shape index: {}]   ;;  %s2404_s2 = inlined_call_operand.vmem [shape: bf16[16,128], index: 2, kind: input, shape index: {}]   ;;  %s2405_s3 = inlined_call_operand.vmem [shape: bf16[16,16], index: 3, kind: input, shape index: {}]   ;;  %s2406_s4 = inlined_call_operand.vmem [shape: bf16[16,16], index: 4, kind: input, shape index: {}]   ;;  %s2407_s5 = inlined_call_operand.vmem [shape: bf16[16,16], index: 5, kind: input, shape index: {}]   ;;  %s2408_s6 = inlined_call_operand.vmem [shape: bf16[2,4,16,128], index: 6, kind: output, shape index: {0}]   ;;  %s2409_s7 = inlined_call_operand.vmem [shape: bf16[2,4,16,128], index: 7, kind: output, shape index: {1}]  }
   0x1   :  { %s2255_s26 = smov 0  }
   0x2 LB: > { %s30_s27 = sadd.s32 1, %s2202_s25  ;;  %p1801_p0 = scmp.ge.s32.totalorder %s2206_s26, 1  ;;  %s2206_s26 = sphi %s2255_s26, %s18_s26   ;;  %s2202_s25 = sphi %s2253_s25, %s2411_s25   ;;  %s2198_s24 = sphi %s2251_s24, %s2410_s24  }
   0x3   : > { %p32_p1 = scmp.ge.s32.totalorder %s30_s27, 2  ;;  %p263_p2 = scmp.lt.s32.totalorder %s2206_s26, 3 }
   0x5   : > { %s2413_s27 = smov (%p32_p1, %s30_s27), 0  ;;  %p264_p3 = pnand %p1801_p0, %p263_p2 }
   0x6   : > { %v2166_v0 = vld [vmem:[%s2403_s1] sm:$0xff] (!%p264_p3)   ;;  %p315_p4 = scmp.lt.s32.totalorder (!%p264_p3), %s2198_s24, 1  ;;  %vm383_vm0 = vcmask (!%p264_p3), 130048   ;;  %v2208_v6 = vmov (!%p264_p3), 0.0|0.0   ;;  %vm2209_vm1 = vmmov (!%p264_p3), 0   ;;  %v2210_v7 = vmov (!%p264_p3), 0.0  }
   0x7   : > { %267 = sbr.rel (%p264_p3) target bundleno = 500 (0x1f4), region = 44  ;;  %v2167_v1 = vld [vmem:[%s2404_s2] sm:$0xff] (!%p264_p3)   ;;  %1987 = vmatprep.subr.bf16.mxu0 (!%p264_p3), %v2166_v0 }
   0x8   : > { %1997 = vmatprep.subr.bf16.mxu1 (!%p264_p3), %v2167_v1  ;;  %1988 = vmatpush3.bf16.msra.mxu0 (!%p264_p3), %v2166_v0  ;;  %v2172_v25 = vld [vmem:[%s2405_s3] sm:$0xff] (!%p264_p3)  }
   0x9   : > { %1998 = vmatpush3.bf16.msra.mxu1 (!%p264_p3), %v2167_v1  ;;  %2103 = vmatprep.subr.bf16.mxu0 (!%p264_p3), %v2208_v6  ;;  %v2173_v26 = vld [vmem:[%s2406_s4] sm:$0xff] (!%p264_p3)  }
   0xa   : > { %2106 = vmatprep.subr.bf16.mxu1 (!%p264_p3), %v2208_v6  ;;  %v2174_v44 = vld [vmem:[%s2407_s5] sm:$0xff] (!%p264_p3)  }
   0xb   : > { %v2175_v45 = vld [vmem:[%s2405_s3] sm:$0xff] (!%p264_p3)  }
   0xc   : > { %v2176_v48 = vld [vmem:[%s2406_s4] sm:$0xff] (!%p264_p3)  }
   0xd   : > { %v2177_v49 = vld [vmem:[%s2407_s5] sm:$0xff] (!%p264_p3)  }
   0xe   : > { %s2415_s24 = smov (!%p315_p4, %s2198_s24), 1  ;;  %v2178_v50 = vld [vmem:[%s2405_s3] sm:$0xff]  }
   0xf   : > { %s2275_s9 = sshll.u32 %s2415_s24, 5  ;;  %v2179_v51 = vld [vmem:[%s2406_s4] sm:$0xff]  }
  0x10   : > { %s322_s12 = scalar_lea.vmem %s2402_s0, %s2275_s9  ;;  %v2180_v52 = vld [vmem:[%s2407_s5] sm:$0xff]   ;;  %s2377_s20 = scalar_lea.vmem %s2408_s6, %s2275_s9 }
  0x11   : > { %v2168_v2 = vld [vmem:[%s322_s12] sm:$0xff]   ;;  %v2169_v3 = vld [vmem:[%s322_s12 + $0x8] sm:$0xff]   ;;  %v2170_v4 = vld [vmem:[%s322_s12 + $0x10] sm:$0xff]   ;;  %s2384_s23 = scalar_lea.vmem %s2409_s7, %s2275_s9 }
  0x12   : > { %1989 = vmatprep.mubr.msk.bf16.mxu0 %vm383_vm0, %v2168_v2  ;;  %1999 = vmatprep.mubr.msk.bf16.mxu1 %vm383_vm0, %v2168_v2  ;;  %v2171_v5 = vld [vmem:[%s322_s12 + $0x18] sm:$0xff]   ;;  %v2181_v53 = vld [vmem:[%s2405_s3] sm:$0xff]  }
  0x13   : > { %1990 = vmatmul.mubr.msk.bf16.vlgmr.msra.gmra.mrb[0].mxu0 %vm383_vm0, %v2169_v3  ;;  %2000 = vmatmul.mubr.msk.bf16.vlgmr.msra.gmra.mrb[0].mxu1 %vm383_vm0, %v2169_v3  ;;  %v2182_v54 = vld [vmem:[%s2406_s4] sm:$0xff]  }
  0x14   : > { %1993 = vmatprep.mubr.msk.bf16.mxu0 %vm383_vm0, %v2170_v4  ;;  %2003 = vmatprep.mubr.msk.bf16.mxu1 %vm383_vm0, %v2170_v4  ;;  %v2183_v55 = vld [vmem:[%s2407_s5] sm:$0xff]  }
  0x1b   : > { %1994 = vmatmul.mubr.msk.bf16.gmra.mrb[4].mxu0 %vm383_vm0, %v2171_v5  ;;  %2004 = vmatmul.mubr.msk.bf16.gmra.mrb[4].mxu1 %vm383_vm0, %v2171_v5 }
  0x1c   : > { %2011 = vmatprep.mubr.msk.bf16.mxu0 %vm2209_vm1, %v2210_v7  ;;  %2019 = vmatprep.mubr.msk.bf16.mxu1 %vm2209_vm1, %v2210_v7 }
  0xe6   : > { %v1991_v8 = vpop.f32.mrb[0].mxu0  ;;  %v2001_v9 = vpop.f32.mrb[0].mxu1 }
  0xe7   : > { %v979_v10 = vadd.f32 %v2001_v9, %v1991_v8  ;;  %v430_v11 = vpop.f32.mrb[1].mxu0  ;;  %v503_v12 = vpop.f32.mrb[1].mxu1 }
  0xe8   : > { %v702_v13 = vadd.f32 %v503_v12, %v430_v11  ;;  %v1992_v14 = vpop.f32.mrb[2].mxu0  ;;  %v2002_v15 = vpop.f32.mrb[2].mxu1 }
  0xe9   : > { %v2113_v16 = vpack.c.bf16 %v1992_v14, %v1991_v8  ;;  %v2116_v17 = vpack.c.bf16 %v2002_v15, %v2001_v9  ;;  %v980_v18 = vadd.f32 %v2002_v15, %v1992_v14  ;;  %v433_v19 = vpop.f32.mrb[3].mxu0  ;;  %v506_v20 = vpop.f32.mrb[3].mxu1 }
  0xea   : > { %v2104_v21 = vpack.c.bf16 %v433_v19, %v430_v11  ;;  %v2107_v22 = vpack.c.bf16 %v506_v20, %v503_v12  ;;  %v703_v23 = vadd.f32 %v506_v20, %v433_v19 }
  0xeb   : > { %v2119_v24 = vpack.c.bf16 %v980_v18, %v979_v10 }
  0xec   : > { %v2110_v27 = vpack.c.bf16 %v703_v23, %v702_v13  ;;  %2105 = vmatpush3.bf16.msra.mxu0 %v2104_v21  ;;  %2108 = vmatpush3.bf16.msra.mxu1 %v2107_v22 }
  0xed   : > { %2109 = vmatprep.subr.bf16.mxu0 %v2208_v6  ;;  %2112 = vmatprep.subr.bf16.mxu1 %v2208_v6 }
  0xee   : > { %v1995_v28 = vpop.f32.mrb[4].mxu0  ;;  %v2005_v29 = vpop.f32.mrb[4].mxu1 }
  0xef   : > { %2012 = vmatmul.mubr.msk.bf16.vlgmr.msra.gmra.mrb[8].mxu0 %vm383_vm0, %v2172_v25  ;;  %2020 = vmatmul.mubr.msk.bf16.vlgmr.msra.gmra.mrb[8].mxu1 %vm383_vm0, %v2173_v26  ;;  %v1537_v30 = vadd.f32 %v2005_v29, %v1995_v28  ;;  %v446_v31 = vpop.f32.mrb[5].mxu0  ;;  %v519_v32 = vpop.f32.mrb[5].mxu1 }
  0xf0   : > { %2111 = vmatpush3.bf16.msra.mxu0 %v2110_v27  ;;  %2114 = vmatpush3.bf16.msra.mxu1 %v2113_v16  ;;  %v1258_v33 = vadd.f32 %v519_v32, %v446_v31  ;;  %v1996_v34 = vpop.f32.mrb[6].mxu0  ;;  %v2006_v35 = vpop.f32.mrb[6].mxu1 }
  0xf1   : > { %2027 = vmatprep.mubr.msk.bf16.mxu0 %vm2209_vm1, %v2210_v7  ;;  %2035 = vmatprep.mubr.msk.bf16.mxu1 %vm2209_vm1, %v2210_v7  ;;  %v2131_v36 = vpack.c.bf16 %v1996_v34, %v1995_v28  ;;  %v2134_v37 = vpack.c.bf16 %v2006_v35, %v2005_v29  ;;  %v1538_v38 = vadd.f32 %v2006_v35, %v1996_v34  ;;  %v449_v39 = vpop.f32.mrb[7].mxu0  ;;  %v522_v40 = vpop.f32.mrb[7].mxu1 }
  0xf2   : > { %2115 = vmatprep.subr.bf16.mxu0 %v2208_v6  ;;  %2118 = vmatprep.subr.bf16.mxu1 %v2208_v6  ;;  %v2122_v41 = vpack.c.bf16 %v449_v39, %v446_v31  ;;  %v2125_v42 = vpack.c.bf16 %v522_v40, %v519_v32  ;;  %v1259_v43 = vadd.f32 %v522_v40, %v449_v39 }
  0xf3   : > { %v2137_v46 = vpack.c.bf16 %v1538_v38, %v1537_v30 }
  0xf4   : > { %v2128_v47 = vpack.c.bf16 %v1259_v43, %v1258_v33 }
  0xf7   : > { %2028 = vmatmul.mubr.msk.bf16.vlgmr.msra.gmra.mrb[12].mxu0 %vm383_vm0, %v2174_v44  ;;  %2036 = vmatmul.mubr.msk.bf16.vlgmr.msra.gmra.mrb[12].mxu1 %vm383_vm0, %v2175_v45 }
  0xf8   : > { %2117 = vmatpush3.bf16.msra.mxu0 %v2116_v17  ;;  %2120 = vmatpush3.bf16.msra.mxu1 %v2119_v24 }
  0xf9   : > { %2043 = vmatprep.mubr.msk.bf16.mxu0 %vm2209_vm1, %v2210_v7  ;;  %2051 = vmatprep.mubr.msk.bf16.mxu1 %vm2209_vm1, %v2210_v7 }
  0xfa   : > { %2121 = vmatprep.subr.bf16.mxu0 %v2208_v6  ;;  %2124 = vmatprep.subr.bf16.mxu1 %v2208_v6 }
  0xff   : > { %2044 = vmatmul.mubr.msk.bf16.vlgmr.msra.gmra.mrb[16].mxu0 %vm383_vm0, %v2176_v48  ;;  %2052 = vmatmul.mubr.msk.bf16.vlgmr.msra.gmra.mrb[16].mxu1 %vm383_vm0, %v2177_v49 }
 0x100   : > { %2123 = vmatpush3.bf16.msra.mxu0 %v2122_v41  ;;  %2126 = vmatpush3.bf16.msra.mxu1 %v2125_v42 }
 0x101   : > { %2059 = vmatprep.mubr.msk.bf16.mxu0 %vm2209_vm1, %v2210_v7  ;;  %2067 = vmatprep.mubr.msk.bf16.mxu1 %vm2209_vm1, %v2210_v7 }
 0x102   : > { %2127 = vmatprep.subr.bf16.mxu0 %v2208_v6  ;;  %2130 = vmatprep.subr.bf16.mxu1 %v2208_v6 }
 0x107   : > { %2060 = vmatmul.mubr.msk.bf16.vlgmr.msra.gmra.mrb[20].mxu0 %vm383_vm0, %v2178_v50  ;;  %2068 = vmatmul.mubr.msk.bf16.vlgmr.msra.gmra.mrb[20].mxu1 %vm383_vm0, %v2179_v51 }
 0x108   : > { %2129 = vmatpush3.bf16.msra.mxu0 %v2128_v47  ;;  %2132 = vmatpush3.bf16.msra.mxu1 %v2131_v36 }
 0x109   : > { %2075 = vmatprep.mubr.msk.bf16.mxu0 %vm2209_vm1, %v2210_v7  ;;  %2083 = vmatprep.mubr.msk.bf16.mxu1 %vm2209_vm1, %v2210_v7 }
 0x10a   : > { %2133 = vmatprep.subr.bf16.mxu0 %v2208_v6  ;;  %2136 = vmatprep.subr.bf16.mxu1 %v2208_v6 }
 0x10f   : > { %2076 = vmatmul.mubr.msk.bf16.vlgmr.msra.gmra.mrb[24].mxu0 %vm383_vm0, %v2180_v52  ;;  %2084 = vmatmul.mubr.msk.bf16.vlgmr.msra.gmra.mrb[24].mxu1 %vm383_vm0, %v2181_v53 }
 0x110   : > { %2135 = vmatpush3.bf16.msra.mxu0 %v2134_v37  ;;  %2138 = vmatpush3.bf16.msra.mxu1 %v2137_v46 }
 0x111   : > { %2091 = vmatprep.mubr.msk.bf16.mxu0 %vm2209_vm1, %v2210_v7  ;;  %2099 = vmatprep.mubr.msk.bf16.mxu1 %vm2209_vm1, %v2210_v7 }
 0x117   : > { %2092 = vmatmul.mubr.msk.bf16.vlgmr.msra.gmra.mrb[28].mxu0 %vm383_vm0, %v2182_v54  ;;  %2100 = vmatmul.mubr.msk.bf16.vlgmr.msra.gmra.mrb[28].mxu1 %vm383_vm0, %v2183_v55 }
 0x1c2   : > { %v610_v56 = vpop.f32.mrb[8].mxu0  ;;  %v693_v57 = vpop.f32.mrb[8].mxu1 }
 0x1c3   : > { %v2013_v58 = vpop.f32.mrb[9].mxu0  ;;  %v785_v59 = vsub.f32 %v610_v56, %v693_v57  ;;  %v2021_v60 = vpop.f32.mrb[9].mxu1 }
 0x1c4   : > { %v613_v61 = vpop.f32.mrb[10].mxu0  ;;  %v696_v62 = vpop.f32.mrb[10].mxu1 }
 0x1c5   : > { %v2014_v63 = vpop.f32.mrb[11].mxu0  ;;  %v786_v0 = vsub.f32 %v613_v61, %v696_v62  ;;  %v2022_v1 = vpop.f32.mrb[11].mxu1 }
 0x1c7   : > { %v1898_v2 = vpack.c.bf16 %v786_v0, %v785_v59 }
 0x1c9   : > { %1899 = vst [vmem:[%s2377_s20] sm:$0xff] %v1898_v2  }
 0x1ca   : > { %v778_v3 = vpop.f32.mrb[12].mxu0  ;;  %v887_v4 = vpop.f32.mrb[12].mxu1 }
 0x1cb   : > { %v797_v5 = vsub.f32 %v778_v3, %v610_v56  ;;  %v2029_v6 = vpop.f32.mrb[13].mxu0  ;;  %v2037_v7 = vpop.f32.mrb[13].mxu1 }
 0x1cc   : > { %v781_v8 = vpop.f32.mrb[14].mxu0  ;;  %v890_v9 = vpop.f32.mrb[14].mxu1 }
 0x1cd   : > { %v799_v10 = vsub.f32 %v797_v5, %v693_v57  ;;  %v798_v11 = vsub.f32 %v781_v8, %v613_v61  ;;  %v2030_v12 = vpop.f32.mrb[15].mxu0  ;;  %v2038_v13 = vpop.f32.mrb[15].mxu1 }
 0x1cf   : > { %v800_v14 = vsub.f32 %v798_v11, %v696_v62 }
 0x1d1   : > { %v1903_v15 = vpack.c.bf16 %v800_v14, %v799_v10 }
 0x1d2   : > { %v970_v16 = vpop.f32.mrb[16].mxu0  ;;  %v1055_v17 = vpop.f32.mrb[16].mxu1 }
 0x1d3   : > { %1904 = vst [vmem:[%s2384_s23] sm:$0xff] %v1903_v15   ;;  %v1062_v18 = vsub.f32 %v887_v4, %v970_v16  ;;  %v1075_v19 = vsub.f32 %v1055_v17, %v887_v4  ;;  %v2045_v20 = vpop.f32.mrb[17].mxu0  ;;  %v2053_v21 = vpop.f32.mrb[17].mxu1 }
 0x1d4   : > { %v973_v22 = vpop.f32.mrb[18].mxu0  ;;  %v1058_v23 = vpop.f32.mrb[18].mxu1 }
 0x1d5   : > { %v1077_v24 = vsub.f32 %v1075_v19, %v970_v16  ;;  %v1063_v25 = vsub.f32 %v890_v9, %v973_v22  ;;  %v1076_v26 = vsub.f32 %v1058_v23, %v890_v9  ;;  %v2046_v27 = vpop.f32.mrb[19].mxu0  ;;  %v2054_v28 = vpop.f32.mrb[19].mxu1 }
 0x1d7   : > { %v1908_v29 = vpack.c.bf16 %v1063_v25, %v1062_v18  ;;  %v1078_v30 = vsub.f32 %v1076_v26, %v973_v22 }
 0x1d9   : > { %1935 = vst [vmem:[%s2377_s20 + $0x8] sm:$0xff] %v1908_v29   ;;  %v1913_v31 = vpack.c.bf16 %v1078_v30, %v1077_v24 }
 0x1da   : > { %v1166_v32 = vpop.f32.mrb[20].mxu0  ;;  %v1249_v33 = vpop.f32.mrb[20].mxu1 }
 0x1db   : > { %1936 = vst [vmem:[%s2384_s23 + $0x8] sm:$0xff] %v1913_v31   ;;  %v2061_v34 = vpop.f32.mrb[21].mxu0  ;;  %v1341_v35 = vsub.f32 %v1166_v32, %v1249_v33  ;;  %v2069_v36 = vpop.f32.mrb[21].mxu1 }
 0x1dc   : > { %v1169_v37 = vpop.f32.mrb[22].mxu0  ;;  %v1252_v38 = vpop.f32.mrb[22].mxu1 }
 0x1dd   : > { %v2062_v39 = vpop.f32.mrb[23].mxu0  ;;  %v1342_v40 = vsub.f32 %v1169_v37, %v1252_v38  ;;  %v2070_v41 = vpop.f32.mrb[23].mxu1 }
 0x1df   : > { %v1918_v42 = vpack.c.bf16 %v1342_v40, %v1341_v35 }
 0x1e1   : > { %1937 = vst [vmem:[%s2377_s20 + $0x10] sm:$0xff] %v1918_v42  }
 0x1e2   : > { %v1334_v43 = vpop.f32.mrb[24].mxu0  ;;  %v1445_v44 = vpop.f32.mrb[24].mxu1 }
 0x1e3   : > { %v1354_v45 = vsub.f32 %v1334_v43, %v1166_v32  ;;  %v2077_v46 = vpop.f32.mrb[25].mxu0  ;;  %v2085_v47 = vpop.f32.mrb[25].mxu1 }
 0x1e4   : > { %v1337_v48 = vpop.f32.mrb[26].mxu0  ;;  %v1448_v49 = vpop.f32.mrb[26].mxu1 }
 0x1e5   : > { %v1356_v50 = vsub.f32 %v1354_v45, %v1249_v33  ;;  %v1355_v51 = vsub.f32 %v1337_v48, %v1169_v37  ;;  %v2078_v52 = vpop.f32.mrb[27].mxu0  ;;  %v2086_v53 = vpop.f32.mrb[27].mxu1 }
 0x1e7   : > { %v1357_v54 = vsub.f32 %v1355_v51, %v1252_v38 }
 0x1e9   : > { %v1923_v55 = vpack.c.bf16 %v1357_v54, %v1356_v50 }
 0x1ea   : > { %v1528_v56 = vpop.f32.mrb[28].mxu0  ;;  %v1613_v57 = vpop.f32.mrb[28].mxu1 }
 0x1eb   : > { %1938 = vst [vmem:[%s2384_s23 + $0x10] sm:$0xff] %v1923_v55   ;;  %v1620_v58 = vsub.f32 %v1445_v44, %v1528_v56  ;;  %v1633_v59 = vsub.f32 %v1613_v57, %v1445_v44  ;;  %v2093_v60 = vpop.f32.mrb[29].mxu0  ;;  %v2101_v61 = vpop.f32.mrb[29].mxu1 }
 0x1ec   : > { %v1531_v62 = vpop.f32.mrb[30].mxu0  ;;  %v1616_v63 = vpop.f32.mrb[30].mxu1 }
 0x1ed   : > { %v1635_v0 = vsub.f32 %v1633_v59, %v1528_v56  ;;  %v1621_v1 = vsub.f32 %v1448_v49, %v1531_v62  ;;  %v1634_v2 = vsub.f32 %v1616_v63, %v1448_v49  ;;  %v2102_v3 = vpop.f32.mrb[31].mxu1  ;;  %v2094_v4 = vpop.f32.mrb[31].mxu0 }
 0x1ef   : > { %v1928_v5 = vpack.c.bf16 %v1621_v1, %v1620_v58  ;;  %v1636_v6 = vsub.f32 %v1634_v2, %v1531_v62 }
 0x1f1   : > { %1939 = vst [vmem:[%s2377_s20 + $0x18] sm:$0xff] %v1928_v5   ;;  %v1933_v7 = vpack.c.bf16 %v1636_v6, %v1635_v0 }
 0x1f3   : > { %1940 = vst [vmem:[%s2384_s23 + $0x18] sm:$0xff] %v1933_v7  }
 0x1f4 PF: > { %s18_s26 = sadd.s32 1, %s2206_s26   ;;  %s2410_s24 = smov %s2202_s25 }
 0x1f5   : > { %p15_p5 = scmp.ge.s32.totalorder %s18_s26, 4   ;;  %s2411_s25 = smov %s2413_s27 }
 0x1f7   :  { %17 = sbr.rel (!%p15_p5) target bundleno = 2 (0x2), region = 92 }

// kernel: spectral_transform_forward.10
= control target key start
LH: loop header
LB: loop body
LE: loop exit
PB: predicated region body
PF: predicated region fallthrough
CT: control target
= control target key end

     0   :  { %s1789_s21 = smov 0   ;;  %s1791_s22 = smov 0   ;;  %s2118_s0 = inlined_call_operand.vmem [shape: bf16[2,4,2048], index: 0, kind: input, shape index: {}]   ;;  %s2119_s1 = inlined_call_operand.vmem [shape: bf16[2,4,2048], index: 1, kind: input, shape index: {}]   ;;  %s2120_s2 = inlined_call_operand.vmem [shape: f32[4,4], index: 2, kind: output, shape index: {0}]   ;;  %s2121_s3 = inlined_call_operand.vmem [shape: f32[4,4], index: 3, kind: output, shape index: {1}]   ;;  %s2122_s4 = inlined_call_operand.vmem [shape: f32[4,4], index: 4, kind: output, shape index: {2}]   ;;  %s2123_s5 = inlined_call_operand.vmem [shape: f32[4,1], index: 5, kind: output, shape index: {3}]   ;;  %s2124_s6 = inlined_call_operand.vmem [shape: f32[4,1], index: 6, kind: output, shape index: {4}]  }
   0x1   :  { %s1793_s23 = smov 0  }
   0x2 LB: > { %s29_s24 = sadd.s32 1, %s1746_s22  ;;  %p1683_p0 = scmp.ge.s32.totalorder %s1750_s23, 1  ;;  %s1750_s23 = sphi %s1793_s23, %s17_s23   ;;  %s1746_s22 = sphi %s1791_s22, %s2126_s22   ;;  %s1742_s21 = sphi %s1789_s21, %s2125_s21  }
   0x3   : > { %p31_p1 = scmp.ge.s32.totalorder %s29_s24, 2  ;;  %p232_p2 = scmp.lt.s32.totalorder %s1750_s23, 3 }
   0x5   : > { %s2128_s24 = smov (%p31_p1, %s29_s24), 0  ;;  %p233_p3 = pnand %p1683_p0, %p232_p2 }
   0x6   : > { %p271_p4 = scmp.lt.s32.totalorder (!%p233_p3), %s1742_s21, 1  ;;  %p291_p5 = scmp.eq.s32.totalorder (!%p233_p3), %s1742_s21, 0 }
   0x7   : > { %236 = sbr.rel (%p233_p3) target bundleno = 347 (0x15b), region = 28 }
   0xe   : > { %s2130_s21 = smov (!%p271_p4, %s1742_s21), 1  ;;  %296 = sbr.rel (!%p291_p5) target bundleno = 21 (0x15), region = 32 }
   0xf   : > { %s1691_s25 = sshll.u32 %s2130_s21, 5  ;;  %vm297_vm0 = vcmask (%p291_p5), 27648   ;;  %vm301_vm1 = vcmask (%p291_p5), 3072   ;;  %v1752_v0 = vmov (%p291_p5), 0.0  }
  0x10   : > { %s1810_s28 = scalar_lea.vmem %s2118_s0, %s1691_s25  ;;  %s1815_s7 = scalar_lea.vmem %s2119_s1, %s1691_s25  ;;  %298 = vst.msk [vmem:[%s2120_s2] sm:$0xf] (%p291_p5), %vm297_vm0, %v1752_v0  ;;  %299 = vst.msk [vmem:[%s2121_s3] sm:$0xf] (%p291_p5), %vm297_vm0, %v1752_v0 }
  0x11   : > { %300 = vst.msk [vmem:[%s2122_s4] sm:$0xf] (%p291_p5), %vm297_vm0, %v1752_v0 }
  0x12   : > { %302 = vst.msk [vmem:[%s2123_s5] sm:$0xf] (%p291_p5), %vm301_vm1, %v1752_v0  ;;  %303 = vst.msk [vmem:[%s2124_s6] sm:$0xf] (%p291_p5), %vm301_vm1, %v1752_v0 }
  0x15 PF: > { %v304_v1 = vld [vmem:[%s1810_s28] sm:$0xff]  ;;  %v321_v2 = vlaneseq  ;;  %v305_v3 = vld [vmem:[%s1810_s28 + $0x8] sm:$0xff]  ;;  %v1753_v4 = vmov 1983009808   ;;  %vm1491_vm2 = vcmask 1043456   ;;  %v1853_v19 = vld [vmem:[%s1810_s28 + $0x10] sm:$0xff] }
  0x16   : > { %v319_v5 = vunpack.c.l.s4 %v1753_v4  ;;  %v1459_v7 = vunpack.c.l.bf16 %v304_v1  ;;  %v317_v9 = vcombine.high %v304_v1, %v304_v1  ;;  %v334_v10 = vcombine.high %v305_v3, %v305_v3  ;;  %v1837_v12 = vld [vmem:[%s1815_s7] sm:$0xff]  ;;  %v1896_v41 = vld [vmem:[%s1810_s28 + $0x18] sm:$0xff]  ;;  %v1899_v43 = vld [vmem:[%s1815_s7 + $0x8] sm:$0xff] }
  0x17   : > { %v322_v6 = vshrl.u32 %v321_v2, 7  ;;  %v1529_v14 = vunpack.c.l.bf16 %v1837_v12  ;;  %v1530_v23 = vunpack.c.h.bf16 %v1837_v12  ;;  %v351_v27 = vcombine.high %v1853_v19, %v1853_v19 }
  0x18   : > { %v320_v8 = vunpack.c.0.s8 %v319_v5  ;;  %v1475_v13 = vcombine.high %v1459_v7, %v1459_v7  ;;  %v1492_v21 = vsel %vm1491_vm2, %v1459_v7, 0.0  ;;  %v1460_v28 = vunpack.c.h.bf16 %v304_v1 }
  0x19   : > { %v1545_v29 = vcombine.high %v1529_v14, %v1529_v14  ;;  %v1561_v30 = vsel %vm1491_vm2, %v1529_v14, 0.0  ;;  %v1546_v32 = vcombine.high %v1530_v23, %v1530_v23  ;;  %v1564_v34 = vsel %vm1491_vm2, %v1530_v23, 0.0 }
  0x1a   : > { %v1834_v11 = vsub.s32 %v320_v8, %v322_v6  ;;  %v1493_v24 = vsel %vm1491_vm2, %v1475_v13, 0.0  ;;  %v1476_v38 = vcombine.high %v1460_v28, %v1460_v28  ;;  %v1495_v39 = vsel %vm1491_vm2, %v1460_v28, 0.0 }
  0x1b   : > { %v1494_v31 = vadd.f32 %v1493_v24, %v1492_v21  ;;  %v1562_v33 = vsel %vm1491_vm2, %v1545_v29, 0.0  ;;  %v1461_v40 = vunpack.c.l.bf16 %v305_v3  ;;  %v1566_v44 = vsel %vm1491_vm2, %v1546_v32, 0.0 }
  0x1c   : > { %v1841_v15 = vrot.slane %v304_v1, %v1834_v11  ;;  %v1844_v16 = vrot.slane %v317_v9, %v1834_v11  ;;  %v1847_v17 = vrot.slane %v305_v3, %v1834_v11  ;;  %v1850_v18 = vrot.slane %v334_v10, %v1834_v11  ;;  %v1935_v1 = vld [vmem:[%s1815_s7 + $0x10] sm:$0xff] }
  0x1d   : > { %v1889_v35 = vrot.slane %v1853_v19, %v1834_v11  ;;  %v1892_v36 = vrot.slane %v351_v27, %v1834_v11  ;;  %v1563_v37 = vadd.f32 %v1562_v33, %v1561_v30  ;;  %v1531_v45 = vunpack.c.l.bf16 %v1899_v43 }
  0x1e   : > { %v1857_v20 = vcombine.high %v1841_v15, %v1841_v15  ;;  %v1862_v22 = vcombine.high %v1844_v16, %v1844_v16  ;;  %v1868_v25 = vcombine.high %v1847_v17, %v1847_v17  ;;  %v1872_v26 = vcombine.high %v1850_v18, %v1850_v18 }
  0x1f   : > { %v1565_v42 = vadd.f32 %v1564_v34, %v1563_v37  ;;  %v1496_v46 = vadd.f32 %v1495_v39, %v1494_v31  ;;  %v1905_v47 = vcombine.high %v1889_v35, %v1889_v35  ;;  %v1909_v48 = vcombine.high %v1892_v36, %v1892_v36 }
  0x20   : > { %401 = vmatprep.subr.bf16.mxu0 %v1857_v20  ;;  %441 = vmatprep.subr.bf16.mxu1 %v1862_v22  ;;  %v368_v49 = vcombine.high %v1896_v41, %v1896_v41  ;;  %v1497_v50 = vsel %vm1491_vm2, %v1476_v38, 0.0  ;;  %v1462_v51 = vunpack.c.h.bf16 %v305_v3  ;;  %v1477_v52 = vcombine.high %v1461_v40, %v1461_v40 }
  0x21   : > { %402 = vmatpush1.bf16.xpose.msra.mxu0 %v1841_v15  ;;  %442 = vmatpush1.bf16.xpose.msra.mxu1 %v1844_v16  ;;  %v1567_v53 = vadd.f32 %v1566_v44, %v1565_v42  ;;  %v1499_v54 = vsel %vm1491_vm2, %v1461_v40, 0.0  ;;  %v1923_v55 = vrot.slane %v1896_v41, %v1834_v11  ;;  %v1568_v56 = vsel %vm1491_vm2, %v1531_v45, 0.0  ;;  %v1979_v42 = vld [vmem:[%s1815_s7 + $0x18] sm:$0xff] }
  0x22   : > { %433 = vmatprep.mubr.bf16.mxu0 %v1857_v20  ;;  %473 = vmatprep.mubr.bf16.mxu1 %v1862_v22  ;;  %v1929_v57 = vrot.slane %v368_v49, %v1834_v11  ;;  %v1532_v58 = vunpack.c.h.bf16 %v1899_v43  ;;  %v1547_v59 = vcombine.high %v1531_v45, %v1531_v45  ;;  %v1498_v60 = vadd.f32 %v1497_v50, %v1496_v46 }
  0x23   : > { %481 = vmatprep.subr.bf16.mxu0 %v1868_v25  ;;  %521 = vmatprep.subr.bf16.mxu1 %v1872_v26  ;;  %v1463_v61 = vunpack.c.l.bf16 %v1853_v19  ;;  %v1478_v62 = vcombine.high %v1462_v51, %v1462_v51  ;;  %v1501_v63 = vsel %vm1491_vm2, %v1477_v52, 0.0  ;;  %v1569_v0 = vadd.f32 %v1568_v56, %v1567_v53 }
  0x24   : > { %v1500_v2 = vadd.f32 %v1499_v54, %v1498_v60  ;;  %v1939_v3 = vcombine.high %v1923_v55, %v1923_v55  ;;  %v729_v4 = vcombine.high %v1837_v12, %v1837_v12  ;;  %v1503_v5 = vsel %vm1491_vm2, %v1462_v51, 0.0 }
  0x25   : > { %v1533_v6 = vunpack.c.l.bf16 %v1935_v1  ;;  %v1947_v7 = vcombine.high %v1929_v57, %v1929_v57  ;;  %v1548_v9 = vcombine.high %v1532_v58, %v1532_v58  ;;  %v1570_v10 = vsel %vm1491_vm2, %v1547_v59, 0.0 }
  0x26   : > { %v1502_v8 = vadd.f32 %v1501_v63, %v1500_v2  ;;  %v1464_v13 = vunpack.c.h.bf16 %v1853_v19  ;;  %v1479_v14 = vcombine.high %v1463_v61, %v1463_v61  ;;  %v1505_v21 = vsel %vm1491_vm2, %v1478_v62, 0.0 }
  0x27   : > { %v1572_v23 = vsel %vm1491_vm2, %v1532_v58, 0.0  ;;  %v1959_v24 = vrot.slane %v1837_v12, %v1834_v11  ;;  %v1571_v28 = vadd.f32 %v1570_v10, %v1569_v0  ;;  %v1507_v19 = vsel %vm1491_vm2, %v1463_v61, 0.0 }
  0x28   : > { %434 = vmatmul.mubr.bf16.vlgmr.msra.gmra.mrb[0].mxu0 %v1841_v15  ;;  %474 = vmatmul.mubr.bf16.vlgmr.msra.gmra.mrb[0].mxu1 %v1844_v16  ;;  %v1504_v27 = vadd.f32 %v1503_v5, %v1502_v8  ;;  %v1534_v29 = vunpack.c.h.bf16 %v1935_v1  ;;  %v1549_v30 = vcombine.high %v1533_v6, %v1533_v6  ;;  %v1574_v31 = vsel %vm1491_vm2, %v1548_v9, 0.0 }
  0x29   : > { %482 = vmatpush1.bf16.xpose.msra.mxu0 %v1847_v17  ;;  %522 = vmatpush1.bf16.xpose.msra.mxu1 %v1850_v18  ;;  %v1969_v12 = vrot.slane %v729_v4, %v1834_v11  ;;  %v1573_v33 = vadd.f32 %v1572_v23, %v1571_v28  ;;  %v1465_v34 = vunpack.c.l.bf16 %v1896_v41  ;;  %v1480_v37 = vcombine.high %v1464_v13, %v1464_v13 }
  0x2a   : > { %513 = vmatprep.mubr.bf16.mxu0 %v1868_v25  ;;  %553 = vmatprep.mubr.bf16.mxu1 %v1872_v26  ;;  %v1506_v32 = vadd.f32 %v1505_v21, %v1504_v27  ;;  %v1509_v38 = vsel %vm1491_vm2, %v1479_v14, 0.0  ;;  %v1576_v39 = vsel %vm1491_vm2, %v1533_v6, 0.0  ;;  %v1976_v40 = vcombine.high %v1959_v24, %v1959_v24 }
  0x2b   : > { %561 = vmatprep.subr.bf16.mxu0 %v1905_v47  ;;  %601 = vmatprep.subr.bf16.mxu1 %v1909_v48  ;;  %v1575_v45 = vadd.f32 %v1574_v31, %v1573_v33  ;;  %v1511_v46 = vsel %vm1491_vm2, %v1464_v13, 0.0  ;;  %v1535_v49 = vunpack.c.l.bf16 %v1979_v42  ;;  %v1550_v50 = vcombine.high %v1534_v29, %v1534_v29 }
  0x2c   : > { %v1508_v44 = vadd.f32 %v1507_v19, %v1506_v32  ;;  %v1578_v51 = vsel %vm1491_vm2, %v1549_v30, 0.0  ;;  %v1986_v52 = vcombine.high %v1969_v12, %v1969_v12  ;;  %v746_v53 = vcombine.high %v1899_v43, %v1899_v43 }
  0x2d   : > { %v1577_v56 = vadd.f32 %v1576_v39, %v1575_v45  ;;  %v1466_v58 = vunpack.c.h.bf16 %v1896_v41  ;;  %v1481_v59 = vcombine.high %v1465_v34, %v1465_v34  ;;  %v1513_v60 = vsel %vm1491_vm2, %v1480_v37, 0.0 }
  0x2e   : > { %v1510_v54 = vadd.f32 %v1509_v38, %v1508_v44  ;;  %v1580_v61 = vsel %vm1491_vm2, %v1534_v29, 0.0  ;;  %v2001_v0 = vrot.slane %v1899_v43, %v1834_v11  ;;  %v1515_v41 = vsel %vm1491_vm2, %v1465_v34, 0.0 }
  0x2f   : > { %v1579_v63 = vadd.f32 %v1578_v51, %v1577_v56  ;;  %v1551_v2 = vcombine.high %v1535_v49, %v1535_v49  ;;  %v1582_v4 = vsel %vm1491_vm2, %v1550_v50, 0.0  ;;  %v2008_v5 = vrot.slane %v746_v53, %v1834_v11 }
  0x30   : > { %514 = vmatmul.mubr.bf16.vlgmr.msra.gmra.mrb[4].mxu0 %v1847_v17  ;;  %554 = vmatmul.mubr.bf16.vlgmr.msra.gmra.mrb[4].mxu1 %v1850_v18  ;;  %v1512_v62 = vadd.f32 %v1511_v46, %v1510_v54  ;;  %v1482_v9 = vcombine.high %v1466_v58, %v1466_v58  ;;  %v1517_v10 = vsel %vm1491_vm2, %v1481_v59, 0.0  ;;  %v1584_v43 = vsel %vm1491_vm2, %v1535_v49, 0.0 }
  0x31   : > { %562 = vmatpush1.bf16.xpose.msra.mxu0 %v1889_v35  ;;  %602 = vmatpush1.bf16.xpose.msra.mxu1 %v1892_v36  ;;  %v1581_v8 = vadd.f32 %v1580_v61, %v1579_v63  ;;  %v1536_v14 = vunpack.c.h.bf16 %v1979_v42  ;;  %v2015_v23 = vcombine.high %v2001_v0, %v2001_v0  ;;  %v1519_v27 = vsel %vm1491_vm2, %v1466_v58, 0.0 }
  0x32   : > { %593 = vmatprep.mubr.bf16.mxu0 %v1905_v47  ;;  %633 = vmatprep.mubr.bf16.mxu1 %v1909_v48  ;;  %v1514_v6 = vadd.f32 %v1513_v60, %v1512_v62  ;;  %v1586_v28 = vsel %vm1491_vm2, %v1551_v2, 0.0  ;;  %v2021_v19 = vcombine.high %v2008_v5, %v2008_v5  ;;  %v763_v29 = vcombine.high %v1935_v1, %v1935_v1 }
  0x33   : > { %641 = vmatprep.subr.bf16.mxu0 %v1939_v3  ;;  %681 = vmatprep.subr.bf16.mxu1 %v1947_v7  ;;  %v1583_v21 = vadd.f32 %v1582_v4, %v1581_v8  ;;  %v1521_v32 = vsel %vm1491_vm2, %v1482_v9, 0.0  ;;  %v1552_v34 = vcombine.high %v1536_v14, %v1536_v14  ;;  %v1588_v38 = vsel %vm1491_vm2, %v1536_v14, 0.0 }
  0x34   : > { %v1516_v13 = vadd.f32 %v1515_v41, %v1514_v6  ;;  %v770_v39 = vrot.slane %v1935_v1, %v1834_v11  ;;  %v777_v44 = vrot.slane %v763_v29, %v1834_v11  ;;  %v787_v1 = vrot.slane %v1979_v42, %v1834_v11 }
  0x35   : > { %v1585_v31 = vadd.f32 %v1584_v43, %v1583_v21  ;;  %v1590_v49 = vsel %vm1491_vm2, %v1552_v34, 0.0  ;;  %vm1526_vm3 = vcmask 3072   ;;  %vm722_vm4 = vcmask 27648  }
  0x36   : > { %v1518_v30 = vadd.f32 %v1517_v10, %v1516_v13  ;;  %v778_v50 = vcombine.high %v770_v39, %v770_v39  ;;  %v779_v51 = vcombine.high %v777_v44, %v777_v44 }
  0x37   : > { %v1587_v37 = vadd.f32 %v1586_v28, %v1585_v31 }
  0x38   : > { %594 = vmatmul.mubr.bf16.vlgmr.msra.gmra.mrb[8].mxu0 %v1889_v35  ;;  %634 = vmatmul.mubr.bf16.vlgmr.msra.gmra.mrb[8].mxu1 %v1892_v36  ;;  %v1520_v33 = vadd.f32 %v1519_v27, %v1518_v30  ;;  %v312_v27 = vld [vmem:[%s2120_s2] sm:$0xf] }
  0x39   : > { %642 = vmatpush1.bf16.xpose.msra.mxu0 %v1923_v55  ;;  %682 = vmatpush1.bf16.xpose.msra.mxu1 %v1929_v57  ;;  %v1589_v46 = vadd.f32 %v1588_v38, %v1587_v37 }
  0x3a   : > { %673 = vmatprep.mubr.bf16.mxu0 %v1939_v3  ;;  %713 = vmatprep.mubr.bf16.mxu1 %v1947_v7  ;;  %v1522_v45 = vadd.f32 %v1521_v32, %v1520_v33 }
  0x3b   : > { %813 = vmatprep.subr.bf16.mxu0 %v1976_v40  ;;  %853 = vmatprep.subr.bf16.mxu1 %v1986_v52 }
  0x3c   : > { %1523 = vadd.xlane.f32.xlu0 %v1522_v45 }
  0x40   : > { %674 = vmatmul.mubr.bf16.vlgmr.msra.gmra.mrb[12].mxu0 %v1923_v55  ;;  %714 = vmatmul.mubr.bf16.vlgmr.msra.gmra.mrb[12].mxu1 %v1929_v57 }
  0x41   : > { %814 = vmatpush1.bf16.xpose.msra.mxu0 %v1959_v24  ;;  %854 = vmatpush1.bf16.xpose.msra.mxu1 %v1969_v12 }
  0x42   : > { %845 = vmatprep.mubr.bf16.mxu0 %v1857_v20  ;;  %885 = vmatprep.mubr.bf16.mxu1 %v1862_v22  ;;  %v780_v20 = vcombine.high %v1979_v42, %v1979_v42  ;;  %v1591_v22 = vadd.f32 %v1590_v49, %v1589_v46 }
  0x43   : > { %893 = vmatprep.subr.bf16.mxu0 %v2015_v23  ;;  %933 = vmatprep.subr.bf16.mxu1 %v2021_v19 }
  0x44   : > { %v794_v53 = vrot.slane %v780_v20, %v1834_v11  ;;  %1592 = vadd.xlane.f32.xlu0 %v1591_v22  ;;  %v1458_v11 = vld [vmem:[%s2123_s5] sm:$0xf] }
  0x46   : > { %v796_v54 = vcombine.high %v794_v53, %v794_v53 }
  0x48   : > { %846 = vmatmul.mubr.bf16.vlgmr.msra.gmra.mrb[16].mxu0 %v1841_v15  ;;  %886 = vmatmul.mubr.bf16.vlgmr.msra.gmra.mrb[16].mxu1 %v1844_v16  ;;  %v795_v15 = vcombine.high %v787_v1, %v787_v1 }
  0x49   : > { %894 = vmatpush1.bf16.xpose.msra.mxu0 %v2001_v0  ;;  %934 = vmatpush1.bf16.xpose.msra.mxu1 %v2008_v5 }
  0x4a   : > { %925 = vmatprep.mubr.bf16.mxu0 %v1868_v25  ;;  %965 = vmatprep.mubr.bf16.mxu1 %v1872_v26 }
  0x4b   : > { %973 = vmatprep.subr.bf16.mxu0 %v778_v50  ;;  %1013 = vmatprep.subr.bf16.mxu1 %v779_v51 }
  0x50   : > { %926 = vmatmul.mubr.bf16.vlgmr.msra.gmra.mrb[20].mxu0 %v1847_v17  ;;  %966 = vmatmul.mubr.bf16.vlgmr.msra.gmra.mrb[20].mxu1 %v1850_v18  ;;  %v1528_v18 = vld [vmem:[%s2124_s6] sm:$0xf] }
  0x51   : > { %974 = vmatpush1.bf16.xpose.msra.mxu0 %v770_v39  ;;  %1014 = vmatpush1.bf16.xpose.msra.mxu1 %v777_v44 }
  0x52   : > { %1005 = vmatprep.mubr.bf16.mxu0 %v1905_v47  ;;  %1045 = vmatprep.mubr.bf16.mxu1 %v1909_v48 }
  0x53   : > { %1053 = vmatprep.subr.bf16.mxu0 %v795_v15  ;;  %1093 = vmatprep.subr.bf16.mxu1 %v796_v54 }
  0x58   : > { %1006 = vmatmul.mubr.bf16.vlgmr.msra.gmra.mrb[24].mxu0 %v1889_v35  ;;  %1046 = vmatmul.mubr.bf16.vlgmr.msra.gmra.mrb[24].mxu1 %v1892_v36 }
  0x59   : > { %1054 = vmatpush1.bf16.xpose.msra.mxu0 %v787_v1  ;;  %1094 = vmatpush1.bf16.xpose.msra.mxu1 %v794_v53 }
  0x5a   : > { %1085 = vmatprep.mubr.bf16.mxu0 %v1939_v3  ;;  %1125 = vmatprep.mubr.bf16.mxu1 %v1947_v7 }
  0x5b   : > { %1136 = vmatprep.subr.bf16.mxu0 %v1976_v40  ;;  %1176 = vmatprep.subr.bf16.mxu1 %v1986_v52 }
  0x60   : > { %1086 = vmatmul.mubr.bf16.vlgmr.msra.gmra.mrb[28].mxu0 %v1923_v55  ;;  %1126 = vmatmul.mubr.bf16.vlgmr.msra.gmra.mrb[28].mxu1 %v1929_v57 }
  0x61   : > { %1137 = vmatpush1.bf16.xpose.msra.mxu0 %v1959_v24  ;;  %1177 = vmatpush1.bf16.xpose.msra.mxu1 %v1969_v12 }
  0x62   : > { %1168 = vmatprep.mubr.bf16.mxu0 %v1976_v40  ;;  %1208 = vmatprep.mubr.bf16.mxu1 %v1986_v52 }
  0x63   : > { %1216 = vmatprep.subr.bf16.mxu0 %v2015_v23  ;;  %1256 = vmatprep.subr.bf16.mxu1 %v2021_v19 }
  0x68   : > { %1169 = vmatmul.mubr.bf16.vlgmr.msra.gmra.mrb[32].mxu0 %v1959_v24  ;;  %1209 = vmatmul.mubr.bf16.vlgmr.msra.gmra.mrb[32].mxu1 %v1969_v12 }
  0x69   : > { %1217 = vmatpush1.bf16.xpose.msra.mxu0 %v2001_v0  ;;  %1257 = vmatpush1.bf16.xpose.msra.mxu1 %v2008_v5 }
  0x6a   : > { %1248 = vmatprep.mubr.bf16.mxu0 %v2015_v23  ;;  %1288 = vmatprep.mubr.bf16.mxu1 %v2021_v19 }
  0x6b   : > { %1296 = vmatprep.subr.bf16.mxu0 %v778_v50  ;;  %1336 = vmatprep.subr.bf16.mxu1 %v779_v51 }
  0x70   : > { %1249 = vmatmul.mubr.bf16.vlgmr.msra.gmra.mrb[36].mxu0 %v2001_v0  ;;  %1289 = vmatmul.mubr.bf16.vlgmr.msra.gmra.mrb[36].mxu1 %v2008_v5 }
  0x71   : > { %1297 = vmatpush1.bf16.xpose.msra.mxu0 %v770_v39  ;;  %1337 = vmatpush1.bf16.xpose.msra.mxu1 %v777_v44 }
  0x72   : > { %1328 = vmatprep.mubr.bf16.mxu0 %v778_v50  ;;  %1368 = vmatprep.mubr.bf16.mxu1 %v779_v51 }
  0x73   : > { %1376 = vmatprep.subr.bf16.mxu0 %v795_v15  ;;  %1416 = vmatprep.subr.bf16.mxu1 %v796_v54 }
  0x78   : > { %1329 = vmatmul.mubr.bf16.vlgmr.msra.gmra.mrb[40].mxu0 %v770_v39  ;;  %1369 = vmatmul.mubr.bf16.vlgmr.msra.gmra.mrb[40].mxu1 %v777_v44 }
  0x79   : > { %1377 = vmatpush1.bf16.xpose.msra.mxu0 %v787_v1  ;;  %1417 = vmatpush1.bf16.xpose.msra.mxu1 %v794_v53 }
  0x7a   : > { %1408 = vmatprep.mubr.bf16.mxu0 %v795_v15  ;;  %1448 = vmatprep.mubr.bf16.mxu1 %v796_v54 }
  0x80   : > { %1409 = vmatmul.mubr.bf16.vlgmr.msra.gmra.mrb[44].mxu0 %v787_v1  ;;  %1449 = vmatmul.mubr.bf16.vlgmr.msra.gmra.mrb[44].mxu1 %v794_v53 }
  0xc9   : > { %v1524_v16 = vpop.xlane.xlu0 %1523 }
  0xca   : > { %v1525_v17 = vadd.f32 %v1524_v16, %v1458_v11 }
  0xcc   : > { %1527 = vst.msk [vmem:[%s2123_s5] sm:$0xf] %vm1526_vm3, %v1525_v17 }
  0xd1   : > { %v1593_v25 = vpop.xlane.xlu0 %1592 }
  0xd2   : > { %v1594_v26 = vadd.f32 %v1593_v25, %v1528_v18 }
  0xd4   : > { %1595 = vst.msk [vmem:[%s2124_s6] sm:$0xf] %vm1526_vm3, %v1594_v26 }
  0xfb   : > { %v435_v35 = vpop.f32.mrb[0].mxu0  ;;  %v475_v36 = vpop.f32.mrb[0].mxu1 }
  0xfc   : > { %v476_v47 = vadd.f32 %v475_v36, %v435_v35  ;;  %v437_v48 = vpop.f32.mrb[1].mxu0  ;;  %v477_v55 = vpop.f32.mrb[1].mxu1 }
  0xfd   : > { %v438_v57 = vpop.f32.mrb[2].mxu0  ;;  %v478_v3 = vpop.f32.mrb[2].mxu1 }
  0xfe   : > { %v439_v7 = vpop.f32.mrb[3].mxu0  ;;  %v479_v24 = vpop.f32.mrb[3].mxu1 }
 0x103   : > { %v515_v12 = vpop.f32.mrb[4].mxu0  ;;  %v555_v40 = vpop.f32.mrb[4].mxu1 }
 0x104   : > { %v516_v42 = vadd.f32 %v515_v12, %v476_v47  ;;  %v517_v52 = vpop.f32.mrb[5].mxu0  ;;  %v557_v56 = vpop.f32.mrb[5].mxu1 }
 0x105   : > { %v518_v58 = vpop.f32.mrb[6].mxu0  ;;  %v558_v59 = vpop.f32.mrb[6].mxu1 }
 0x106   : > { %v556_v60 = vadd.f32 %v555_v40, %v516_v42  ;;  %v519_v61 = vpop.f32.mrb[7].mxu0  ;;  %v559_v62 = vpop.f32.mrb[7].mxu1  ;;  %v724_v42 = vld [vmem:[%s2121_s3] sm:$0xf] }
 0x10b   : > { %v595_v63 = vpop.f32.mrb[8].mxu0  ;;  %v635_v0 = vpop.f32.mrb[8].mxu1 }
 0x10c   : > { %v596_v41 = vadd.f32 %v595_v63, %v556_v60  ;;  %v597_v2 = vpop.f32.mrb[9].mxu0  ;;  %v637_v4 = vpop.f32.mrb[9].mxu1 }
 0x10d   : > { %v598_v5 = vpop.f32.mrb[10].mxu0  ;;  %v638_v6 = vpop.f32.mrb[10].mxu1 }
 0x10e   : > { %v636_v8 = vadd.f32 %v635_v0, %v596_v41  ;;  %v599_v9 = vpop.f32.mrb[11].mxu0  ;;  %v639_v10 = vpop.f32.mrb[11].mxu1 }
 0x113   : > { %v675_v43 = vpop.f32.mrb[12].mxu0  ;;  %v715_v13 = vpop.f32.mrb[12].mxu1 }
 0x114   : > { %v676_v14 = vadd.f32 %v675_v43, %v636_v8  ;;  %v677_v21 = vpop.f32.mrb[13].mxu0  ;;  %v717_v23 = vpop.f32.mrb[13].mxu1 }
 0x115   : > { %v678_v28 = vpop.f32.mrb[14].mxu0  ;;  %v718_v19 = vpop.f32.mrb[14].mxu1 }
 0x116   : > { %v716_v29 = vadd.f32 %v715_v13, %v676_v14  ;;  %v679_v30 = vpop.f32.mrb[15].mxu0  ;;  %v719_v31 = vpop.f32.mrb[15].mxu1 }
 0x118   : > { %v721_v32 = vadd.f32 %v716_v29, %v312_v27 }
 0x11a   : > { %723 = vst.msk [vmem:[%s2120_s2] sm:$0xf] %vm722_vm4, %v721_v32 }
 0x11b   : > { %v847_v33 = vpop.f32.mrb[16].mxu0  ;;  %v887_v34 = vpop.f32.mrb[16].mxu1 }
 0x11c   : > { %v888_v37 = vadd.f32 %v887_v34, %v847_v33  ;;  %v849_v38 = vpop.f32.mrb[17].mxu0  ;;  %v889_v39 = vpop.f32.mrb[17].mxu1 }
 0x11d   : > { %v850_v44 = vpop.f32.mrb[18].mxu0  ;;  %v890_v45 = vpop.f32.mrb[18].mxu1 }
 0x11e   : > { %v851_v46 = vpop.f32.mrb[19].mxu0  ;;  %v891_v49 = vpop.f32.mrb[19].mxu1 }
 0x123   : > { %v927_v50 = vpop.f32.mrb[20].mxu0  ;;  %v967_v51 = vpop.f32.mrb[20].mxu1 }
 0x124   : > { %v928_v20 = vadd.f32 %v927_v50, %v888_v37  ;;  %v929_v22 = vpop.f32.mrb[21].mxu0  ;;  %v969_v1 = vpop.f32.mrb[21].mxu1 }
 0x125   : > { %v930_v53 = vpop.f32.mrb[22].mxu0  ;;  %v970_v15 = vpop.f32.mrb[22].mxu1 }
 0x126   : > { %v968_v54 = vadd.f32 %v967_v51, %v928_v20  ;;  %v931_v11 = vpop.f32.mrb[23].mxu0  ;;  %v971_v16 = vpop.f32.mrb[23].mxu1  ;;  %v1135_v20 = vld [vmem:[%s2122_s4] sm:$0xf] }
 0x12b   : > { %v1007_v17 = vpop.f32.mrb[24].mxu0  ;;  %v1047_v18 = vpop.f32.mrb[24].mxu1 }
 0x12c   : > { %v1008_v25 = vadd.f32 %v1007_v17, %v968_v54  ;;  %v1009_v26 = vpop.f32.mrb[25].mxu0  ;;  %v1049_v35 = vpop.f32.mrb[25].mxu1 }
 0x12d   : > { %v1010_v36 = vpop.f32.mrb[26].mxu0  ;;  %v1050_v47 = vpop.f32.mrb[26].mxu1 }
 0x12e   : > { %v1048_v48 = vadd.f32 %v1047_v18, %v1008_v25  ;;  %v1011_v55 = vpop.f32.mrb[27].mxu0  ;;  %v1051_v57 = vpop.f32.mrb[27].mxu1 }
 0x133   : > { %v1087_v3 = vpop.f32.mrb[28].mxu0  ;;  %v1127_v7 = vpop.f32.mrb[28].mxu1 }
 0x134   : > { %v1088_v24 = vadd.f32 %v1087_v3, %v1048_v48  ;;  %v1089_v12 = vpop.f32.mrb[29].mxu0  ;;  %v1129_v40 = vpop.f32.mrb[29].mxu1 }
 0x135   : > { %v1090_v52 = vpop.f32.mrb[30].mxu0  ;;  %v1130_v56 = vpop.f32.mrb[30].mxu1 }
 0x136   : > { %v1128_v58 = vadd.f32 %v1127_v7, %v1088_v24  ;;  %v1091_v59 = vpop.f32.mrb[31].mxu0  ;;  %v1131_v60 = vpop.f32.mrb[31].mxu1 }
 0x138   : > { %v1133_v61 = vadd.f32 %v1128_v58, %v724_v42 }
 0x13a   : > { %1134 = vst.msk [vmem:[%s2121_s3] sm:$0xf] %vm722_vm4, %v1133_v61 }
 0x13b   : > { %v1170_v62 = vpop.f32.mrb[32].mxu0  ;;  %v1210_v63 = vpop.f32.mrb[32].mxu1 }
 0x13c   : > { %v1211_v0 = vadd.f32 %v1210_v63, %v1170_v62  ;;  %v1172_v41 = vpop.f32.mrb[33].mxu0  ;;  %v1212_v2 = vpop.f32.mrb[33].mxu1 }
 0x13d   : > { %v1173_v4 = vpop.f32.mrb[34].mxu0  ;;  %v1213_v5 = vpop.f32.mrb[34].mxu1 }
 0x13e   : > { %v1174_v6 = vpop.f32.mrb[35].mxu0  ;;  %v1214_v8 = vpop.f32.mrb[35].mxu1 }
 0x143   : > { %v1250_v9 = vpop.f32.mrb[36].mxu0  ;;  %v1290_v10 = vpop.f32.mrb[36].mxu1 }
 0x144   : > { %v1251_v43 = vadd.f32 %v1250_v9, %v1211_v0  ;;  %v1252_v13 = vpop.f32.mrb[37].mxu0  ;;  %v1292_v14 = vpop.f32.mrb[37].mxu1 }
 0x145   : > { %v1253_v21 = vpop.f32.mrb[38].mxu0  ;;  %v1293_v23 = vpop.f32.mrb[38].mxu1 }
 0x146   : > { %v1291_v27 = vadd.f32 %v1290_v10, %v1251_v43  ;;  %v1254_v28 = vpop.f32.mrb[39].mxu0  ;;  %v1294_v19 = vpop.f32.mrb[39].mxu1 }
 0x14b   : > { %v1330_v29 = vpop.f32.mrb[40].mxu0  ;;  %v1370_v30 = vpop.f32.mrb[40].mxu1 }
 0x14c   : > { %v1331_v31 = vadd.f32 %v1330_v29, %v1291_v27  ;;  %v1332_v32 = vpop.f32.mrb[41].mxu0  ;;  %v1372_v33 = vpop.f32.mrb[41].mxu1 }
 0x14d   : > { %v1333_v34 = vpop.f32.mrb[42].mxu0  ;;  %v1373_v37 = vpop.f32.mrb[42].mxu1 }
 0x14e   : > { %v1371_v38 = vadd.f32 %v1370_v30, %v1331_v31  ;;  %v1334_v39 = vpop.f32.mrb[43].mxu0  ;;  %v1374_v44 = vpop.f32.mrb[43].mxu1 }
 0x153   : > { %v1410_v45 = vpop.f32.mrb[44].mxu0  ;;  %v1450_v46 = vpop.f32.mrb[44].mxu1 }
 0x154   : > { %v1411_v49 = vadd.f32 %v1410_v45, %v1371_v38  ;;  %v1412_v50 = vpop.f32.mrb[45].mxu0  ;;  %v1452_v51 = vpop.f32.mrb[45].mxu1 }
 0x155   : > { %v1413_v22 = vpop.f32.mrb[46].mxu0  ;;  %v1453_v1 = vpop.f32.mrb[46].mxu1 }
 0x156   : > { %v1451_v53 = vadd.f32 %v1450_v46, %v1411_v49  ;;  %v1414_v15 = vpop.f32.mrb[47].mxu0  ;;  %v1454_v54 = vpop.f32.mrb[47].mxu1 }
 0x158   : > { %v1456_v11 = vadd.f32 %v1451_v53, %v1135_v20 }
 0x15a   : > { %1457 = vst.msk [vmem:[%s2122_s4] sm:$0xf] %vm722_vm4, %v1456_v11 }
 0x15b PF: > { %s17_s23 = sadd.s32 1, %s1750_s23   ;;  %s2125_s21 = smov %s1746_s22 }
 0x15c   : > { %p14_p6 = scmp.ge.s32.totalorder %s17_s23, 4   ;;  %s2126_s22 = smov %s2128_s24 }
 0x15e   :  { %16 = sbr.rel (!%p14_p6) target bundleno = 2 (0x2), region = 93 }

// kernel: spectral_transform_forward.13
= control target key start
LH: loop header
LB: loop body
LE: loop exit
PB: predicated region body
PF: predicated region fallthrough
CT: control target
= control target key end

     0   :  { %s530_s12 = smov 0   ;;  %s532_s13 = smov 0   ;;  %s569_s0 = inlined_call_operand.vmem [shape: bf16[2,4,256], index: 0, kind: input, shape index: {}]   ;;  %s570_s1 = inlined_call_operand.vmem [shape: bf16[2,4,256], index: 1, kind: input, shape index: {}]   ;;  %s571_s2 = inlined_call_operand.vmem [shape: f32[8,4], index: 2, kind: input, shape index: {}]   ;;  %s572_s3 = inlined_call_operand.vmem [shape: f32[2,8,256], index: 3, kind: output, shape index: {}]  }
   0x1   :  { %s534_s14 = smov 0  }
   0x2 LB: > { %s25_s15 = sadd.s32 1, %s503_s13  ;;  %p445_p0 = scmp.ge.s32.totalorder %s507_s14, 1  ;;  %s507_s14 = sphi %s534_s14, %s13_s14   ;;  %s503_s13 = sphi %s532_s13, %s574_s13   ;;  %s499_s12 = sphi %s530_s12, %s573_s12  }
   0x3   : > { %p27_p1 = scmp.ge.s32.totalorder %s25_s15, 2  ;;  %p175_p2 = scmp.lt.s32.totalorder %s507_s14, 3 }
   0x5   : > { %s576_s15 = smov (%p27_p1, %s25_s15), 0  ;;  %p176_p3 = pnand %p445_p0, %p175_p2 }
   0x6   : > { %p217_p4 = scmp.lt.s32.totalorder (!%p176_p3), %s499_s12, 1  ;;  %v509_v0 = vmov (!%p176_p3), 0.0   ;;  %vm258_vm0 = vcmask (!%p176_p3), 1043456   ;;  %v251_v7 = vld [vmem:[%s571_s2] sm:$0xff] (!%p176_p3)  ;;  %vm254_vm1 = vcmask (!%p176_p3), 31744  }
   0x7   : > { %179 = sbr.rel (%p176_p3) target bundleno = 241 (0xf1), region = 32  ;;  %327 = vmatprep.mubr.f32.mxu0 (!%p176_p3), %v509_v0 }
   0xe   : > { %s578_s12 = smov (!%p217_p4, %s499_s12), 1 }
   0xf   : > { %s457_s16 = sshll.u32 %s578_s12, 2  ;;  %s459_s25 = sshll.u32 %s578_s12, 4 }
  0x10   : > { %s224_s19 = scalar_lea.vmem %s569_s0, %s457_s16  ;;  %s234_s22 = scalar_lea.vmem %s570_s1, %s457_s16 }
  0x11   : > { %v246_v1 = vld [vmem:[%s224_s19] sm:$0xf]  ;;  %s244_s28 = scalar_lea.vmem %s572_s3, %s459_s25 }
  0x12   : > { %v248_v2 = vld [vmem:[%s234_s22] sm:$0xf]  ;;  %v247_v3 = vunpack.c.l.bf16 %v246_v1 }
  0x13   : > { %v249_v4 = vunpack.c.l.bf16 %v248_v2 }
  0x15   : > { %v250_v5 = vadd.f32 %v249_v4, %v247_v3 }
  0x17   : > { %v253_v6 = vcombine.high %v250_v5, %v250_v5 }
  0x19   : > { %452 = vmatprep.subr.msk.mxu0 %vm258_vm0, %v253_v6 }
  0x1a   : > { %453 = vmatpush1.msk.msra.mxu0 %vm258_vm0, %v250_v5 }
  0x1b   : > { %454 = vmatmul.mubr.msk.f32.vlgmr.msra.gmra.mrb[0].mxu0 %vm254_vm1, %v251_v7 }
  0xee   : > { %v329_v8 = vpop.f32.mrb[0].mxu0 }
  0xef   : > { %334 = vst [vmem:[%s244_s28] sm:$0xff] %v329_v8  ;;  %v331_v9 = vpop.f32.mrb[1].mxu0 }
  0xf0   : > { %335 = vst [vmem:[%s244_s28 + $0x8] sm:$0xff] %v331_v9 }
  0xf1 PF: > { %s13_s14 = sadd.s32 1, %s507_s14   ;;  %s573_s12 = smov %s503_s13 }
  0xf2   : > { %p10_p5 = scmp.ge.s32.totalorder %s13_s14, 4   ;;  %s574_s13 = smov %s576_s15 }
  0xf4   :  { %12 = sbr.rel (!%p10_p5) target bundleno = 2 (0x2), region = 65 }

// kernel: spectral_transform_forward.11
= control target key start
LH: loop header
LB: loop body
LE: loop exit
PB: predicated region body
PF: predicated region fallthrough
CT: control target
= control target key end

     0   :  { %s2668_s30 = smov 0   ;;  %s2670_s10 = smov 0   ;;  %s3118_s0 = inlined_call_operand.vmem [shape: bf16[2,4,2048], index: 0, kind: input, shape index: {}]   ;;  %s3119_s1 = inlined_call_operand.vmem [shape: bf16[2,4,2048], index: 1, kind: input, shape index: {}]   ;;  %s3120_s2 = inlined_call_operand.vmem [shape: bf16[4,4], index: 2, kind: input, shape index: {}]   ;;  %s3121_s3 = inlined_call_operand.vmem [shape: bf16[4,4], index: 3, kind: input, shape index: {}]   ;;  %s3122_s4 = inlined_call_operand.vmem [shape: bf16[4,4], index: 4, kind: input, shape index: {}]   ;;  %s3123_s5 = inlined_call_operand.vmem [shape: bf16[4,4], index: 5, kind: input, shape index: {}]   ;;  %s3124_s6 = inlined_call_operand.vmem [shape: f32[4,1], index: 6, kind: input, shape index: {}]   ;;  %s3125_s7 = inlined_call_operand.vmem [shape: f32[4,1], index: 7, kind: input, shape index: {}]   ;;  %s3126_s8 = inlined_call_operand.vmem [shape: bf16[2,4,2048], index: 8, kind: output, shape index: {0}]   ;;  %s3127_s9 = inlined_call_operand.vmem [shape: bf16[2,4,2048], index: 9, kind: output, shape index: {1}]  }
   0x1   :  { %s2672_s11 = smov 0  }
   0x2 LB: > { %s32_s12 = sadd.s32 1, %s2610_s10  ;;  %p2462_p0 = scmp.ge.s32.totalorder %s2614_s11, 1  ;;  %s2614_s11 = sphi %s2672_s11, %s20_s11   ;;  %s2610_s10 = sphi %s2670_s10, %s3129_s10   ;;  %s2606_s30 = sphi %s2668_s30, %s3128_s30  }
   0x3   : > { %p34_p1 = scmp.ge.s32.totalorder %s32_s12, 2  ;;  %p330_p2 = scmp.lt.s32.totalorder %s2614_s11, 3 }
   0x5   : > { %s3131_s12 = smov (%p34_p1, %s32_s12), 0  ;;  %p331_p3 = pnand %p2462_p0, %p330_p2 }
   0x6   : > { %p393_p4 = scmp.lt.s32.totalorder (!%p331_p3), %s2606_s30, 1  ;;  %v451_v0 = vlaneseq (!%p331_p3)  ;;  %v2616_v1 = vmov (!%p331_p3), 1983009808   ;;  %v2617_v3 = vmov (!%p331_p3), 0   ;;  %v1347_v6 = vld [vmem:[%s3124_s6] sm:$0xf] (!%p331_p3) }
   0x7   : > { %334 = sbr.rel (%p331_p3) target bundleno = 374 (0x176), region = 52  ;;  %v449_v2 = vunpack.c.l.s4 (!%p331_p3), %v2616_v1  ;;  %600 = vmatprep.mubr.bf16.mxu0 (!%p331_p3), %v2617_v3  ;;  %641 = vmatprep.mubr.bf16.mxu1 (!%p331_p3), %v2617_v3  ;;  %vm519_vm0 = vcmask (!%p331_p3), 1041408   ;;  %v2033_v21 = vld [vmem:[%s3125_s7] sm:$0xf] (!%p331_p3)  ;;  %vm515_vm1 = vcmask (!%p331_p3), 31744  }
   0x8   : > { %v452_v4 = vshrl.u32 (!%p331_p3), %v451_v0, 7  ;;  %2583 = vset.pattern.permute.xlu0 (!%p331_p3), %v2617_v3  ;;  %v2727_v26 = vld [vmem:[%s3121_s3] sm:$0x3] (!%p331_p3) }
   0x9   : > { %v450_v5 = vunpack.c.0.s8 (!%p331_p3), %v449_v2  ;;  %1350 = vperm.xlu0 (!%p331_p3), %2583, %v1347_v6   ;;  %v441_v60 = vld [vmem:[%s3120_s2] sm:$0x3] (!%p331_p3) }
   0xb   : > { %v2698_v7 = vsub.s32 (!%p331_p3), %v450_v5, %v452_v4 }
   0xd   : > { %2036 = vperm.xlu0 (!%p331_p3), %2583, %v2033_v21  }
   0xe   : > { %s3133_s30 = smov (!%p393_p4, %s2606_s30), 1 }
   0xf   : > { %s2692_s15 = sshll.u32 %s3133_s30, 5 }
  0x10   : > { %s410_s18 = scalar_lea.vmem %s3119_s1, %s2692_s15  ;;  %s2761_s25 = scalar_lea.vmem %s3118_s0, %s2692_s15 }
  0x11   : > { %v437_v8 = vld [vmem:[%s410_s18] sm:$0xff]  ;;  %v438_v9 = vld [vmem:[%s410_s18 + $0x8] sm:$0xff]  ;;  %v439_v10 = vld [vmem:[%s410_s18 + $0x10] sm:$0xff]  ;;  %s3019_s17 = scalar_lea.vmem %s3126_s8, %s2692_s15  ;;  %s3079_s20 = scalar_lea.vmem %s3127_s9, %s2692_s15 }
  0x12   : > { %v454_v11 = vrot.slane %v437_v8, %v2698_v7  ;;  %v447_v12 = vcombine.high %v437_v8, %v437_v8  ;;  %v471_v13 = vrot.slane %v438_v9, %v2698_v7  ;;  %v464_v14 = vcombine.high %v438_v9, %v438_v9  ;;  %v440_v28 = vld [vmem:[%s410_s18 + $0x18] sm:$0xff]  ;;  %v433_v36 = vld [vmem:[%s2761_s25] sm:$0xff]  ;;  %v434_v44 = vld [vmem:[%s2761_s25 + $0x8] sm:$0xff] }
  0x13   : > { %v488_v15 = vrot.slane %v439_v10, %v2698_v7  ;;  %v481_v16 = vcombine.high %v439_v10, %v439_v10  ;;  %v498_v33 = vcombine.high %v440_v28, %v440_v28  ;;  %v505_v34 = vrot.slane %v440_v28, %v2698_v7  ;;  %v435_v52 = vld [vmem:[%s2761_s25 + $0x10] sm:$0xff]  ;;  %v436_v61 = vld [vmem:[%s2761_s25 + $0x18] sm:$0xff] }
  0x14   : > { %v2703_v17 = vcombine.high %v454_v11, %v454_v11  ;;  %v2706_v18 = vsel %vm519_vm0, %v454_v11, 0  ;;  %v461_v19 = vrot.slane %v447_v12, %v2698_v7  ;;  %v2709_v20 = vcombine.high %v471_v13, %v471_v13 }
  0x15   : > { %v478_v22 = vrot.slane %v464_v14, %v2698_v7  ;;  %v495_v25 = vrot.slane %v481_v16, %v2698_v7  ;;  %v2736_v29 = vsel %vm519_vm0, %v471_v13, 0  ;;  %v2738_v30 = vcombine.high %v488_v15, %v488_v15  ;;  %v1370_v13 = vld [vmem:[%s3123_s5] sm:$0x3] }
  0x16   : > { %2471 = vmatprep.subr.msk.bf16.mxu0 %vm519_vm0, %v2703_v17  ;;  %v2717_v23 = vcombine.high %v461_v19, %v461_v19  ;;  %v2720_v24 = vsel %vm519_vm0, %v461_v19, 0  ;;  %v512_v35 = vrot.slane %v498_v33, %v2698_v7  ;;  %v2770_v37 = vsel %vm519_vm0, %v488_v15, 0  ;;  %v1369_v14 = vld [vmem:[%s3122_s4] sm:$0x3] }
  0x17   : > { %569 = vmatpush1.bf16.msra.mxu0 %v2706_v18  ;;  %v2729_v27 = vcombine.high %v478_v22, %v478_v22  ;;  %v2746_v31 = vsel %vm519_vm0, %v478_v22, 0  ;;  %v2748_v32 = vcombine.high %v495_v25, %v495_v25  ;;  %v2772_v38 = vcombine.high %v505_v34, %v505_v34 }
  0x18   : > { %2473 = vmatprep.subr.msk.bf16.mxu1 %vm519_vm0, %v2717_v23  ;;  %2475 = vmatprep.subr.msk.bf16.mxu0 %vm519_vm0, %v2709_v20  ;;  %v2777_v39 = vsel %vm519_vm0, %v495_v25, 0  ;;  %v2779_v40 = vcombine.high %v512_v35, %v512_v35  ;;  %v900_v41 = vcombine.high %v433_v36, %v433_v36  ;;  %v907_v42 = vrot.slane %v433_v36, %v2698_v7 }
  0x19   : > { %610 = vmatpush1.bf16.msra.mxu1 %v2720_v24  ;;  %v2795_v45 = vsel %vm519_vm0, %v505_v34, 0  ;;  %v2802_v47 = vsel %vm519_vm0, %v512_v35, 0  ;;  %v917_v49 = vcombine.high %v434_v44, %v434_v44  ;;  %v924_v50 = vrot.slane %v434_v44, %v2698_v7 }
  0x1a   : > { %2472 = vmatmul.mubr.msk.bf16.vlgmr.msra.gmra.mrb[0].mxu0 %vm515_vm1, %v2727_v26  ;;  %2477 = vmatprep.subr.msk.bf16.mxu1 %vm519_vm0, %v2729_v27  ;;  %v914_v43 = vrot.slane %v900_v41, %v2698_v7  ;;  %v2797_v46 = vcombine.high %v907_v42, %v907_v42  ;;  %v2820_v53 = vsel %vm519_vm0, %v907_v42, 0  ;;  %v934_v57 = vcombine.high %v435_v52, %v435_v52 }
  0x1b   : > { %651 = vmatpush1.bf16.msra.mxu0 %v2736_v29  ;;  %682 = vmatprep.mubr.bf16.mxu0 %v2617_v3  ;;  %v931_v51 = vrot.slane %v917_v49, %v2698_v7  ;;  %v2822_v54 = vcombine.high %v924_v50, %v924_v50  ;;  %v941_v58 = vrot.slane %v435_v52, %v2698_v7  ;;  %v2848_v62 = vsel %vm519_vm0, %v924_v50, 0 }
  0x1c   : > { %2474 = vmatmul.mubr.msk.bf16.vlgmr.msra.gmra.mrb[0].mxu1 %vm515_vm1, %v2727_v26  ;;  %2479 = vmatprep.subr.msk.bf16.mxu0 %vm519_vm0, %v2738_v30  ;;  %v2804_v48 = vcombine.high %v914_v43, %v914_v43  ;;  %v2827_v55 = vsel %vm519_vm0, %v914_v43, 0  ;;  %v948_v59 = vrot.slane %v934_v57, %v2698_v7  ;;  %v951_v2 = vcombine.high %v436_v61, %v436_v61 }
  0x1d   : > { %692 = vmatpush1.bf16.msra.mxu1 %v2746_v31  ;;  %723 = vmatprep.mubr.bf16.mxu1 %v2617_v3  ;;  %v2829_v56 = vcombine.high %v931_v51, %v931_v51  ;;  %v2850_v63 = vcombine.high %v941_v58, %v941_v58  ;;  %v2854_v0 = vsel %vm519_vm0, %v931_v51, 0  ;;  %v958_v4 = vrot.slane %v436_v61, %v2698_v7 }
  0x1e   : > { %2481 = vmatprep.subr.msk.bf16.mxu1 %vm519_vm0, %v2748_v32  ;;  %v2856_v1 = vcombine.high %v948_v59, %v948_v59  ;;  %v965_v5 = vrot.slane %v951_v2, %v2698_v7  ;;  %v2870_v6 = vsel %vm519_vm0, %v941_v58, 0  ;;  %v2876_v9 = vsel %vm519_vm0, %v948_v59, 0 }
  0x1f   : > { %v2872_v8 = vcombine.high %v958_v4, %v958_v4  ;;  %v2890_v11 = vsel %vm519_vm0, %v958_v4, 0 }
  0x20   : > { %v2878_v10 = vcombine.high %v965_v5, %v965_v5  ;;  %v2894_v12 = vsel %vm519_vm0, %v965_v5, 0 }
  0x22   : > { %2476 = vmatmul.mubr.msk.bf16.vlgmr.msra.gmra.mrb[4].mxu0 %vm515_vm1, %v2727_v26 }
  0x23   : > { %733 = vmatpush1.bf16.msra.mxu0 %v2770_v37  ;;  %764 = vmatprep.mubr.bf16.mxu0 %v2617_v3 }
  0x24   : > { %2478 = vmatmul.mubr.msk.bf16.vlgmr.msra.gmra.mrb[4].mxu1 %vm515_vm1, %v2727_v26  ;;  %2483 = vmatprep.subr.msk.bf16.mxu0 %vm519_vm0, %v2772_v38 }
  0x25   : > { %774 = vmatpush1.bf16.msra.mxu1 %v2777_v39  ;;  %805 = vmatprep.mubr.bf16.mxu1 %v2617_v3 }
  0x26   : > { %2485 = vmatprep.subr.msk.bf16.mxu1 %vm519_vm0, %v2779_v40 }
  0x2a   : > { %2480 = vmatmul.mubr.msk.bf16.vlgmr.msra.gmra.mrb[8].mxu0 %vm515_vm1, %v2727_v26 }
  0x2b   : > { %815 = vmatpush1.bf16.msra.mxu0 %v2795_v45  ;;  %846 = vmatprep.mubr.bf16.mxu0 %v2617_v3 }
  0x2c   : > { %2482 = vmatmul.mubr.msk.bf16.vlgmr.msra.gmra.mrb[8].mxu1 %vm515_vm1, %v2727_v26  ;;  %2487 = vmatprep.subr.msk.bf16.mxu0 %vm519_vm0, %v2797_v46 }
  0x2d   : > { %856 = vmatpush1.bf16.msra.mxu1 %v2802_v47  ;;  %887 = vmatprep.mubr.bf16.mxu1 %v2617_v3 }
  0x2e   : > { %2489 = vmatprep.subr.msk.bf16.mxu1 %vm519_vm0, %v2804_v48 }
  0x32   : > { %2484 = vmatmul.mubr.msk.bf16.vlgmr.msra.gmra.mrb[12].mxu0 %vm515_vm1, %v2727_v26 }
  0x33   : > { %1020 = vmatpush1.bf16.msra.mxu0 %v2820_v53  ;;  %1051 = vmatprep.mubr.bf16.mxu0 %v2617_v3 }
  0x34   : > { %2486 = vmatmul.mubr.msk.bf16.vlgmr.msra.gmra.mrb[12].mxu1 %vm515_vm1, %v2727_v26  ;;  %2491 = vmatprep.subr.msk.bf16.mxu0 %vm519_vm0, %v2822_v54 }
  0x35   : > { %1061 = vmatpush1.bf16.msra.mxu1 %v2827_v55  ;;  %1092 = vmatprep.mubr.bf16.mxu1 %v2617_v3 }
  0x36   : > { %2493 = vmatprep.subr.msk.bf16.mxu1 %vm519_vm0, %v2829_v56 }
  0x3a   : > { %2488 = vmatmul.mubr.msk.bf16.vlgmr.msra.gmra.mrb[16].mxu0 %vm515_vm1, %v441_v60 }
  0x3b   : > { %1102 = vmatpush1.bf16.msra.mxu0 %v2848_v62  ;;  %1133 = vmatprep.mubr.bf16.mxu0 %v2617_v3 }
  0x3c   : > { %2490 = vmatmul.mubr.msk.bf16.vlgmr.msra.gmra.mrb[16].mxu1 %vm515_vm1, %v441_v60  ;;  %2495 = vmatprep.subr.msk.bf16.mxu0 %vm519_vm0, %v2850_v63 }
  0x3d   : > { %1143 = vmatpush1.bf16.msra.mxu1 %v2854_v0  ;;  %1174 = vmatprep.mubr.bf16.mxu1 %v2617_v3 }
  0x3e   : > { %2497 = vmatprep.subr.msk.bf16.mxu1 %vm519_vm0, %v2856_v1 }
  0x42   : > { %2492 = vmatmul.mubr.msk.bf16.vlgmr.msra.gmra.mrb[20].mxu0 %vm515_vm1, %v441_v60 }
  0x43   : > { %1184 = vmatpush1.bf16.msra.mxu0 %v2870_v6  ;;  %1215 = vmatprep.mubr.bf16.mxu0 %v2617_v3 }
  0x44   : > { %2494 = vmatmul.mubr.msk.bf16.vlgmr.msra.gmra.mrb[20].mxu1 %vm515_vm1, %v441_v60  ;;  %2499 = vmatprep.subr.msk.bf16.mxu0 %vm519_vm0, %v2872_v8 }
  0x45   : > { %1225 = vmatpush1.bf16.msra.mxu1 %v2876_v9  ;;  %1256 = vmatprep.mubr.bf16.mxu1 %v2617_v3 }
  0x46   : > { %2501 = vmatprep.subr.msk.bf16.mxu1 %vm519_vm0, %v2878_v10 }
  0x4a   : > { %2496 = vmatmul.mubr.msk.bf16.vlgmr.msra.gmra.mrb[24].mxu0 %vm515_vm1, %v441_v60 }
  0x4b   : > { %1266 = vmatpush1.bf16.msra.mxu0 %v2890_v11  ;;  %1297 = vmatprep.mubr.bf16.mxu0 %v2617_v3 }
  0x4c   : > { %2498 = vmatmul.mubr.msk.bf16.vlgmr.msra.gmra.mrb[24].mxu1 %vm515_vm1, %v441_v60  ;;  %2503 = vmatprep.subr.msk.bf16.mxu0 %vm519_vm0, %v2703_v17 }
  0x4d   : > { %1307 = vmatpush1.bf16.msra.mxu1 %v2894_v12  ;;  %1338 = vmatprep.mubr.bf16.mxu1 %v2617_v3 }
  0x4e   : > { %2505 = vmatprep.subr.msk.bf16.mxu1 %vm519_vm0, %v2717_v23 }
  0x52   : > { %2500 = vmatmul.mubr.msk.bf16.vlgmr.msra.gmra.mrb[28].mxu0 %vm515_vm1, %v441_v60 }
  0x53   : > { %1375 = vmatpush1.bf16.msra.mxu0 %v2706_v18  ;;  %1406 = vmatprep.mubr.bf16.mxu0 %v2617_v3 }
  0x54   : > { %2502 = vmatmul.mubr.msk.bf16.vlgmr.msra.gmra.mrb[28].mxu1 %vm515_vm1, %v441_v60  ;;  %2507 = vmatprep.subr.msk.bf16.mxu0 %vm519_vm0, %v2709_v20 }
  0x55   : > { %1416 = vmatpush1.bf16.msra.mxu1 %v2720_v24  ;;  %1447 = vmatprep.mubr.bf16.mxu1 %v2617_v3 }
  0x56   : > { %2509 = vmatprep.subr.msk.bf16.mxu1 %vm519_vm0, %v2729_v27 }
  0x5a   : > { %2504 = vmatmul.mubr.msk.bf16.vlgmr.msra.gmra.mrb[32].mxu0 %vm515_vm1, %v1370_v13 }
  0x5b   : > { %1457 = vmatpush1.bf16.msra.mxu0 %v2736_v29  ;;  %1488 = vmatprep.mubr.bf16.mxu0 %v2617_v3 }
  0x5c   : > { %2506 = vmatmul.mubr.msk.bf16.vlgmr.msra.gmra.mrb[32].mxu1 %vm515_vm1, %v1370_v13  ;;  %2511 = vmatprep.subr.msk.bf16.mxu0 %vm519_vm0, %v2738_v30 }
  0x5d   : > { %1498 = vmatpush1.bf16.msra.mxu1 %v2746_v31  ;;  %1529 = vmatprep.mubr.bf16.mxu1 %v2617_v3 }
  0x5e   : > { %2513 = vmatprep.subr.msk.bf16.mxu1 %vm519_vm0, %v2748_v32 }
  0x62   : > { %2508 = vmatmul.mubr.msk.bf16.vlgmr.msra.gmra.mrb[36].mxu0 %vm515_vm1, %v1370_v13 }
  0x63   : > { %1539 = vmatpush1.bf16.msra.mxu0 %v2770_v37  ;;  %1570 = vmatprep.mubr.bf16.mxu0 %v2617_v3 }
  0x64   : > { %2510 = vmatmul.mubr.msk.bf16.vlgmr.msra.gmra.mrb[36].mxu1 %vm515_vm1, %v1370_v13  ;;  %2515 = vmatprep.subr.msk.bf16.mxu0 %vm519_vm0, %v2772_v38 }
  0x65   : > { %1580 = vmatpush1.bf16.msra.mxu1 %v2777_v39  ;;  %1611 = vmatprep.mubr.bf16.mxu1 %v2617_v3 }
  0x66   : > { %2517 = vmatprep.subr.msk.bf16.mxu1 %vm519_vm0, %v2779_v40 }
  0x6a   : > { %2512 = vmatmul.mubr.msk.bf16.vlgmr.msra.gmra.mrb[40].mxu0 %vm515_vm1, %v1370_v13 }
  0x6b   : > { %1621 = vmatpush1.bf16.msra.mxu0 %v2795_v45  ;;  %1652 = vmatprep.mubr.bf16.mxu0 %v2617_v3 }
  0x6c   : > { %2514 = vmatmul.mubr.msk.bf16.vlgmr.msra.gmra.mrb[40].mxu1 %vm515_vm1, %v1370_v13  ;;  %2519 = vmatprep.subr.msk.bf16.mxu0 %vm519_vm0, %v2797_v46 }
  0x6d   : > { %1662 = vmatpush1.bf16.msra.mxu1 %v2802_v47  ;;  %1693 = vmatprep.mubr.bf16.mxu1 %v2617_v3 }
  0x6e   : > { %2521 = vmatprep.subr.msk.bf16.mxu1 %vm519_vm0, %v2804_v48 }
  0x72   : > { %2516 = vmatmul.mubr.msk.bf16.vlgmr.msra.gmra.mrb[44].mxu0 %vm515_vm1, %v1370_v13 }
  0x73   : > { %1706 = vmatpush1.bf16.msra.mxu0 %v2820_v53  ;;  %1737 = vmatprep.mubr.bf16.mxu0 %v2617_v3 }
  0x74   : > { %2518 = vmatmul.mubr.msk.bf16.vlgmr.msra.gmra.mrb[44].mxu1 %vm515_vm1, %v1370_v13  ;;  %2523 = vmatprep.subr.msk.bf16.mxu0 %vm519_vm0, %v2822_v54 }
  0x75   : > { %1747 = vmatpush1.bf16.msra.mxu1 %v2827_v55  ;;  %1778 = vmatprep.mubr.bf16.mxu1 %v2617_v3 }
  0x76   : > { %2525 = vmatprep.subr.msk.bf16.mxu1 %vm519_vm0, %v2829_v56 }
  0x7a   : > { %2520 = vmatmul.mubr.msk.bf16.vlgmr.msra.gmra.mrb[48].mxu0 %vm515_vm1, %v1369_v14 }
  0x7b   : > { %1788 = vmatpush1.bf16.msra.mxu0 %v2848_v62  ;;  %1819 = vmatprep.mubr.bf16.mxu0 %v2617_v3 }
  0x7c   : > { %2522 = vmatmul.mubr.msk.bf16.vlgmr.msra.gmra.mrb[48].mxu1 %vm515_vm1, %v1369_v14  ;;  %2527 = vmatprep.subr.msk.bf16.mxu0 %vm519_vm0, %v2850_v63 }
  0x7d   : > { %1829 = vmatpush1.bf16.msra.mxu1 %v2854_v0  ;;  %1860 = vmatprep.mubr.bf16.mxu1 %v2617_v3 }
  0x7e   : > { %2529 = vmatprep.subr.msk.bf16.mxu1 %vm519_vm0, %v2856_v1 }
  0x82   : > { %2524 = vmatmul.mubr.msk.bf16.vlgmr.msra.gmra.mrb[52].mxu0 %vm515_vm1, %v1369_v14 }
  0x83   : > { %1870 = vmatpush1.bf16.msra.mxu0 %v2870_v6  ;;  %1901 = vmatprep.mubr.bf16.mxu0 %v2617_v3 }
  0x84   : > { %2526 = vmatmul.mubr.msk.bf16.vlgmr.msra.gmra.mrb[52].mxu1 %vm515_vm1, %v1369_v14  ;;  %2531 = vmatprep.subr.msk.bf16.mxu0 %vm519_vm0, %v2872_v8 }
  0x85   : > { %1911 = vmatpush1.bf16.msra.mxu1 %v2876_v9  ;;  %1942 = vmatprep.mubr.bf16.mxu1 %v2617_v3 }
  0x86   : > { %2533 = vmatprep.subr.msk.bf16.mxu1 %vm519_vm0, %v2878_v10 }
  0x88   : > { %v3005_v47 = vpop.permute.xlu0 %1350 }
  0x8a   : > { %2528 = vmatmul.mubr.msk.bf16.vlgmr.msra.gmra.mrb[56].mxu0 %vm515_vm1, %v1369_v14 }
  0x8b   : > { %1952 = vmatpush1.bf16.msra.mxu0 %v2890_v11  ;;  %1983 = vmatprep.mubr.bf16.mxu0 %v2617_v3 }
  0x8c   : > { %2530 = vmatmul.mubr.msk.bf16.vlgmr.msra.gmra.mrb[56].mxu1 %vm515_vm1, %v1369_v14 }
  0x8d   : > { %1993 = vmatpush1.bf16.msra.mxu1 %v2894_v12  ;;  %2024 = vmatprep.mubr.bf16.mxu1 %v2617_v3 }
  0x92   : > { %2532 = vmatmul.mubr.msk.bf16.vlgmr.msra.gmra.mrb[60].mxu0 %vm515_vm1, %v1369_v14 }
  0x94   : > { %2534 = vmatmul.mubr.msk.bf16.vlgmr.msra.gmra.mrb[60].mxu1 %vm515_vm1, %v1369_v14 }
  0xed   : > { %v602_v15 = vpop.f32.mrb[0].mxu0 }
  0xee   : > { %v604_v16 = vpop.f32.mrb[1].mxu0 }
  0xef   : > { %v606_v17 = vpop.f32.mrb[2].mxu0  ;;  %v643_v18 = vpop.f32.mrb[0].mxu1 }
  0xf0   : > { %v607_v19 = vpop.f32.mrb[3].mxu0  ;;  %v645_v20 = vpop.f32.mrb[1].mxu1 }
  0xf1   : > { %v647_v21 = vpop.f32.mrb[2].mxu1 }
  0xf2   : > { %v648_v22 = vpop.f32.mrb[3].mxu1 }
  0xf5   : > { %v684_v23 = vpop.f32.mrb[4].mxu0 }
  0xf6   : > { %v686_v24 = vpop.f32.mrb[5].mxu0 }
  0xf7   : > { %v688_v25 = vpop.f32.mrb[6].mxu0  ;;  %v725_v26 = vpop.f32.mrb[4].mxu1 }
  0xf8   : > { %v689_v27 = vpop.f32.mrb[7].mxu0  ;;  %v727_v28 = vpop.f32.mrb[5].mxu1 }
  0xf9   : > { %v729_v29 = vpop.f32.mrb[6].mxu1 }
  0xfa   : > { %v730_v3 = vpop.f32.mrb[7].mxu1 }
  0xfd   : > { %v2989_v30 = vpop.f32.mrb[8].mxu0 }
  0xfe   : > { %v2991_v31 = vpop.f32.mrb[9].mxu0 }
  0xff   : > { %v770_v32 = vpop.f32.mrb[10].mxu0  ;;  %v2993_v33 = vpop.f32.mrb[8].mxu1 }
 0x100   : > { %v771_v34 = vpop.f32.mrb[11].mxu0  ;;  %v2995_v35 = vpop.f32.mrb[9].mxu1 }
 0x101   : > { %v811_v36 = vpop.f32.mrb[10].mxu1 }
 0x102   : > { %v812_v37 = vpop.f32.mrb[11].mxu1 }
 0x105   : > { %v2997_v38 = vpop.f32.mrb[12].mxu0 }
 0x106   : > { %v2999_v39 = vpop.f32.mrb[13].mxu0 }
 0x107   : > { %v852_v40 = vpop.f32.mrb[14].mxu0  ;;  %v3001_v41 = vpop.f32.mrb[12].mxu1 }
 0x108   : > { %v853_v42 = vpop.f32.mrb[15].mxu0  ;;  %v3003_v43 = vpop.f32.mrb[13].mxu1 }
 0x109   : > { %v893_v44 = vpop.f32.mrb[14].mxu1 }
 0x10a   : > { %v894_v45 = vpop.f32.mrb[15].mxu1 }
 0x10d   : > { %v1053_v46 = vpop.f32.mrb[16].mxu0 }
 0x10e   : > { %v1054_v48 = vadd.f32 %v1053_v46, %v602_v15  ;;  %v1055_v49 = vpop.f32.mrb[17].mxu0 }
 0x10f   : > { %v1056_v50 = vadd.f32 %v1055_v49, %v604_v16  ;;  %v1057_v51 = vpop.f32.mrb[18].mxu0  ;;  %v1094_v52 = vpop.f32.mrb[16].mxu1 }
 0x110   : > { %v1095_v53 = vadd.f32 %v1094_v52, %v643_v18  ;;  %v1058_v54 = vpop.f32.mrb[19].mxu0  ;;  %v1096_v55 = vpop.f32.mrb[17].mxu1  ;;  %v1353_v56 = vadd.f32 %v3005_v47, %v1054_v48 }
 0x111   : > { %v1097_v57 = vadd.f32 %v1096_v55, %v645_v20  ;;  %v1354_v58 = vadd.f32 %v3005_v47, %v1056_v50  ;;  %v1098_v59 = vpop.f32.mrb[18].mxu1 }
 0x112   : > { %v1355_v60 = vadd.f32 %v3005_v47, %v1095_v53  ;;  %v2055_v61 = vmax.f32 %v1353_v56, 0.0  ;;  %v1099_v62 = vpop.f32.mrb[19].mxu1 }
 0x113   : > { %v1356_v63 = vadd.f32 %v3005_v47, %v1097_v57  ;;  %v2056_v0 = vmax.f32 %v1354_v58, 0.0 }
 0x114   : > { %v2057_v1 = vmax.f32 %v1355_v60, 0.0 }
 0x115   : > { %v2058_v2 = vmax.f32 %v1356_v63, 0.0  ;;  %v2535_v4 = vpack.c.bf16 %v2056_v0, %v2055_v61  ;;  %v1135_v5 = vpop.f32.mrb[20].mxu0 }
 0x116   : > { %v1136_v6 = vadd.f32 %v1135_v5, %v684_v23  ;;  %v1137_v8 = vpop.f32.mrb[21].mxu0 }
 0x117   : > { %v2536_v9 = vpack.c.bf16 %v2058_v2, %v2057_v1  ;;  %v1138_v10 = vadd.f32 %v1137_v8, %v686_v24  ;;  %v1139_v11 = vpop.f32.mrb[22].mxu0  ;;  %v1176_v12 = vpop.f32.mrb[20].mxu1  ;;  %v2111_v17 = vrot.slane %v2535_v4, %v2698_v7 }
 0x118   : > { %v1357_v13 = vadd.f32 %v3005_v47, %v1136_v6  ;;  %v1177_v14 = vadd.f32 %v1176_v12, %v725_v26  ;;  %v1140_v15 = vpop.f32.mrb[23].mxu0  ;;  %v1178_v16 = vpop.f32.mrb[21].mxu1 }
 0x119   : > { %v2118_v18 = vrot.slane %v2536_v9, %v2698_v7  ;;  %v1358_v19 = vadd.f32 %v3005_v47, %v1138_v10  ;;  %v1179_v20 = vadd.f32 %v1178_v16, %v727_v28  ;;  %v1180_v21 = vpop.f32.mrb[22].mxu1 }
 0x11a   : > { %v2059_v22 = vmax.f32 %v1357_v13, 0.0  ;;  %v1359_v23 = vadd.f32 %v3005_v47, %v1177_v14  ;;  %v1181_v24 = vpop.f32.mrb[23].mxu1 }
 0x11b   : > { %v2119_v25 = vcombine.low %v2111_v17, %v2118_v18  ;;  %v2060_v26 = vmax.f32 %v1358_v19, 0.0  ;;  %v1360_v27 = vadd.f32 %v3005_v47, %v1179_v20 }
 0x11c   : > { %v2061_v29 = vmax.f32 %v1359_v23, 0.0 }
 0x11d   : > { %2175 = vst [vmem:[%s3019_s17] sm:$0xff] %v2119_v25  ;;  %v2537_v3 = vpack.c.bf16 %v2060_v26, %v2059_v22  ;;  %v2062_v32 = vmax.f32 %v1360_v27, 0.0  ;;  %v1217_v28 = vpop.f32.mrb[24].mxu0 }
 0x11e   : > { %v1218_v34 = vadd.f32 %v1217_v28, %v2989_v30  ;;  %v1219_v36 = vpop.f32.mrb[25].mxu0 }
 0x11f   : > { %v2538_v37 = vpack.c.bf16 %v2062_v32, %v2061_v29  ;;  %v1220_v40 = vadd.f32 %v1219_v36, %v2991_v31  ;;  %v1221_v42 = vpop.f32.mrb[26].mxu0  ;;  %v1258_v44 = vpop.f32.mrb[24].mxu1  ;;  %v2128_v50 = vrot.slane %v2537_v3, %v2698_v7 }
 0x120   : > { %v1361_v45 = vadd.f32 %v3005_v47, %v1218_v34  ;;  %v1259_v46 = vadd.f32 %v1258_v44, %v2993_v33  ;;  %v1222_v48 = vpop.f32.mrb[27].mxu0  ;;  %v1260_v49 = vpop.f32.mrb[25].mxu1 }
 0x121   : > { %v2135_v51 = vrot.slane %v2538_v37, %v2698_v7  ;;  %v1362_v52 = vadd.f32 %v3005_v47, %v1220_v40  ;;  %v1261_v30 = vadd.f32 %v1260_v49, %v2995_v35  ;;  %v1262_v53 = vpop.f32.mrb[26].mxu1 }
 0x122   : > { %v2063_v54 = vmax.f32 %v1361_v45, 0.0  ;;  %v1363_v31 = vadd.f32 %v3005_v47, %v1259_v46  ;;  %v1263_v55 = vpop.f32.mrb[27].mxu1 }
 0x123   : > { %v2136_v56 = vcombine.low %v2128_v50, %v2135_v51  ;;  %v2064_v57 = vmax.f32 %v1362_v52, 0.0  ;;  %v1364_v58 = vadd.f32 %v3005_v47, %v1261_v30 }
 0x124   : > { %v2065_v33 = vmax.f32 %v1363_v31, 0.0 }
 0x125   : > { %2176 = vst [vmem:[%s3019_s17 + $0x8] sm:$0xff] %v2136_v56  ;;  %v2539_v59 = vpack.c.bf16 %v2064_v57, %v2063_v54  ;;  %v2066_v60 = vmax.f32 %v1364_v58, 0.0  ;;  %v1299_v61 = vpop.f32.mrb[28].mxu0 }
 0x126   : > { %v1300_v62 = vadd.f32 %v1299_v61, %v2997_v38  ;;  %v1301_v63 = vpop.f32.mrb[29].mxu0 }
 0x127   : > { %v2540_v0 = vpack.c.bf16 %v2066_v60, %v2065_v33  ;;  %v1302_v35 = vadd.f32 %v1301_v63, %v2999_v39  ;;  %v1303_v1 = vpop.f32.mrb[30].mxu0  ;;  %v1340_v2 = vpop.f32.mrb[28].mxu1  ;;  %v2145_v9 = vrot.slane %v2539_v59, %v2698_v7 }
 0x128   : > { %v1365_v4 = vadd.f32 %v3005_v47, %v1300_v62  ;;  %v1341_v5 = vadd.f32 %v1340_v2, %v3001_v41  ;;  %v1304_v6 = vpop.f32.mrb[31].mxu0  ;;  %v1342_v8 = vpop.f32.mrb[29].mxu1 }
 0x129   : > { %v2152_v10 = vrot.slane %v2540_v0, %v2698_v7  ;;  %v1366_v11 = vadd.f32 %v3005_v47, %v1302_v35  ;;  %v1343_v38 = vadd.f32 %v1342_v8, %v3003_v43  ;;  %v1344_v12 = vpop.f32.mrb[30].mxu1  ;;  %v3065_v60 = vpop.permute.xlu0 %2036 }
 0x12a   : > { %v2067_v13 = vmax.f32 %v1365_v4, 0.0  ;;  %v1367_v39 = vadd.f32 %v3005_v47, %v1341_v5  ;;  %v1345_v14 = vpop.f32.mrb[31].mxu1 }
 0x12b   : > { %v2153_v15 = vcombine.low %v2145_v9, %v2152_v10  ;;  %v2068_v16 = vmax.f32 %v1366_v11, 0.0  ;;  %v1368_v17 = vadd.f32 %v3005_v47, %v1343_v38 }
 0x12c   : > { %v2069_v41 = vmax.f32 %v1367_v39, 0.0 }
 0x12d   : > { %2177 = vst [vmem:[%s3019_s17 + $0x10] sm:$0xff] %v2153_v15  ;;  %v2541_v18 = vpack.c.bf16 %v2068_v16, %v2067_v13  ;;  %v2070_v19 = vmax.f32 %v1368_v17, 0.0  ;;  %v1408_v20 = vpop.f32.mrb[32].mxu0 }
 0x12e   : > { %v1410_v21 = vpop.f32.mrb[33].mxu0 }
 0x12f   : > { %v2542_v22 = vpack.c.bf16 %v2070_v19, %v2069_v41  ;;  %v1412_v23 = vpop.f32.mrb[34].mxu0  ;;  %v1449_v24 = vpop.f32.mrb[32].mxu1  ;;  %v2162_v26 = vrot.slane %v2541_v18, %v2698_v7 }
 0x130   : > { %v1413_v43 = vpop.f32.mrb[35].mxu0  ;;  %v1451_v25 = vpop.f32.mrb[33].mxu1 }
 0x131   : > { %v2169_v27 = vrot.slane %v2542_v22, %v2698_v7  ;;  %v1453_v29 = vpop.f32.mrb[34].mxu1 }
 0x132   : > { %v1454_v3 = vpop.f32.mrb[35].mxu1 }
 0x133   : > { %v2170_v32 = vcombine.low %v2162_v26, %v2169_v27 }
 0x135   : > { %2178 = vst [vmem:[%s3019_s17 + $0x18] sm:$0xff] %v2170_v32  ;;  %v1490_v47 = vpop.f32.mrb[36].mxu0 }
 0x136   : > { %v1492_v28 = vpop.f32.mrb[37].mxu0 }
 0x137   : > { %v1494_v34 = vpop.f32.mrb[38].mxu0  ;;  %v1531_v36 = vpop.f32.mrb[36].mxu1 }
 0x138   : > { %v1495_v37 = vpop.f32.mrb[39].mxu0  ;;  %v1533_v40 = vpop.f32.mrb[37].mxu1 }
 0x139   : > { %v1535_v42 = vpop.f32.mrb[38].mxu1 }
 0x13a   : > { %v1536_v44 = vpop.f32.mrb[39].mxu1 }
 0x13d   : > { %v3049_v45 = vpop.f32.mrb[40].mxu0 }
 0x13e   : > { %v3051_v46 = vpop.f32.mrb[41].mxu0 }
 0x13f   : > { %v1576_v48 = vpop.f32.mrb[42].mxu0  ;;  %v3053_v49 = vpop.f32.mrb[40].mxu1 }
 0x140   : > { %v1577_v50 = vpop.f32.mrb[43].mxu0  ;;  %v3055_v51 = vpop.f32.mrb[41].mxu1 }
 0x141   : > { %v1617_v52 = vpop.f32.mrb[42].mxu1 }
 0x142   : > { %v1618_v30 = vpop.f32.mrb[43].mxu1 }
 0x145   : > { %v3057_v53 = vpop.f32.mrb[44].mxu0 }
 0x146   : > { %v3059_v54 = vpop.f32.mrb[45].mxu0 }
 0x147   : > { %v1658_v31 = vpop.f32.mrb[46].mxu0  ;;  %v3061_v55 = vpop.f32.mrb[44].mxu1 }
 0x148   : > { %v1659_v56 = vpop.f32.mrb[47].mxu0  ;;  %v3063_v57 = vpop.f32.mrb[45].mxu1 }
 0x149   : > { %v1699_v58 = vpop.f32.mrb[46].mxu1 }
 0x14a   : > { %v1700_v33 = vpop.f32.mrb[47].mxu1 }
 0x14d   : > { %v1739_v59 = vpop.f32.mrb[48].mxu0 }
 0x14e   : > { %v1740_v61 = vadd.f32 %v1739_v59, %v1408_v20  ;;  %v1741_v62 = vpop.f32.mrb[49].mxu0 }
 0x14f   : > { %v1742_v63 = vadd.f32 %v1741_v62, %v1410_v21  ;;  %v1743_v0 = vpop.f32.mrb[50].mxu0  ;;  %v1780_v35 = vpop.f32.mrb[48].mxu1 }
 0x150   : > { %v1781_v1 = vadd.f32 %v1780_v35, %v1449_v24  ;;  %v1744_v2 = vpop.f32.mrb[51].mxu0  ;;  %v1782_v4 = vpop.f32.mrb[49].mxu1  ;;  %v2039_v5 = vadd.f32 %v3065_v60, %v1740_v61 }
 0x151   : > { %v1783_v6 = vadd.f32 %v1782_v4, %v1451_v25  ;;  %v2040_v8 = vadd.f32 %v3065_v60, %v1742_v63  ;;  %v1784_v9 = vpop.f32.mrb[50].mxu1 }
 0x152   : > { %v2041_v10 = vadd.f32 %v3065_v60, %v1781_v1  ;;  %v2179_v11 = vmax.f32 %v2039_v5, 0.0  ;;  %v1785_v38 = vpop.f32.mrb[51].mxu1 }
 0x153   : > { %v2042_v12 = vadd.f32 %v3065_v60, %v1783_v6  ;;  %v2180_v13 = vmax.f32 %v2040_v8, 0.0 }
 0x154   : > { %v2181_v39 = vmax.f32 %v2041_v10, 0.0 }
 0x155   : > { %v2182_v14 = vmax.f32 %v2042_v12, 0.0  ;;  %v2543_v15 = vpack.c.bf16 %v2180_v13, %v2179_v11  ;;  %v1821_v16 = vpop.f32.mrb[52].mxu0 }
 0x156   : > { %v1822_v17 = vadd.f32 %v1821_v16, %v1490_v47  ;;  %v1823_v41 = vpop.f32.mrb[53].mxu0 }
 0x157   : > { %v2544_v18 = vpack.c.bf16 %v2182_v14, %v2181_v39  ;;  %v1824_v19 = vadd.f32 %v1823_v41, %v1492_v28  ;;  %v1825_v20 = vpop.f32.mrb[54].mxu0  ;;  %v1862_v21 = vpop.f32.mrb[52].mxu1  ;;  %v2235_v25 = vrot.slane %v2543_v15, %v2698_v7 }
 0x158   : > { %v2043_v22 = vadd.f32 %v3065_v60, %v1822_v17  ;;  %v1863_v23 = vadd.f32 %v1862_v21, %v1531_v36  ;;  %v1826_v24 = vpop.f32.mrb[55].mxu0  ;;  %v1864_v43 = vpop.f32.mrb[53].mxu1 }
 0x159   : > { %v2242_v26 = vrot.slane %v2544_v18, %v2698_v7  ;;  %v2044_v27 = vadd.f32 %v3065_v60, %v1824_v19  ;;  %v1865_v29 = vadd.f32 %v1864_v43, %v1533_v40  ;;  %v1866_v3 = vpop.f32.mrb[54].mxu1 }
 0x15a   : > { %v2183_v32 = vmax.f32 %v2043_v22, 0.0  ;;  %v2045_v47 = vadd.f32 %v3065_v60, %v1863_v23  ;;  %v1867_v28 = vpop.f32.mrb[55].mxu1 }
 0x15b   : > { %v2243_v34 = vcombine.low %v2235_v25, %v2242_v26  ;;  %v2184_v36 = vmax.f32 %v2044_v27, 0.0  ;;  %v2046_v37 = vadd.f32 %v3065_v60, %v1865_v29 }
 0x15c   : > { %v2185_v42 = vmax.f32 %v2045_v47, 0.0 }
 0x15d   : > { %2299 = vst [vmem:[%s3079_s20] sm:$0xff] %v2243_v34  ;;  %v2545_v44 = vpack.c.bf16 %v2184_v36, %v2183_v32  ;;  %v2186_v48 = vmax.f32 %v2046_v37, 0.0  ;;  %v1903_v40 = vpop.f32.mrb[56].mxu0 }
 0x15e   : > { %v1904_v50 = vadd.f32 %v1903_v40, %v3049_v45  ;;  %v1905_v52 = vpop.f32.mrb[57].mxu0 }
 0x15f   : > { %v2546_v30 = vpack.c.bf16 %v2186_v48, %v2185_v42  ;;  %v1906_v31 = vadd.f32 %v1905_v52, %v3051_v46  ;;  %v1907_v56 = vpop.f32.mrb[58].mxu0  ;;  %v1944_v58 = vpop.f32.mrb[56].mxu1  ;;  %v2252_v63 = vrot.slane %v2545_v44, %v2698_v7 }
 0x160   : > { %v2047_v33 = vadd.f32 %v3065_v60, %v1904_v50  ;;  %v1945_v59 = vadd.f32 %v1944_v58, %v3053_v49  ;;  %v1908_v61 = vpop.f32.mrb[59].mxu0  ;;  %v1946_v62 = vpop.f32.mrb[57].mxu1 }
 0x161   : > { %v2259_v0 = vrot.slane %v2546_v30, %v2698_v7  ;;  %v2048_v35 = vadd.f32 %v3065_v60, %v1906_v31  ;;  %v1947_v45 = vadd.f32 %v1946_v62, %v3055_v51  ;;  %v1948_v1 = vpop.f32.mrb[58].mxu1 }
 0x162   : > { %v2187_v2 = vmax.f32 %v2047_v33, 0.0  ;;  %v2049_v46 = vadd.f32 %v3065_v60, %v1945_v59  ;;  %v1949_v4 = vpop.f32.mrb[59].mxu1 }
 0x163   : > { %v2260_v5 = vcombine.low %v2252_v63, %v2259_v0  ;;  %v2188_v6 = vmax.f32 %v2048_v35, 0.0  ;;  %v2050_v8 = vadd.f32 %v3065_v60, %v1947_v45 }
 0x164   : > { %v2189_v49 = vmax.f32 %v2049_v46, 0.0 }
 0x165   : > { %2300 = vst [vmem:[%s3079_s20 + $0x8] sm:$0xff] %v2260_v5  ;;  %v2547_v9 = vpack.c.bf16 %v2188_v6, %v2187_v2  ;;  %v2190_v10 = vmax.f32 %v2050_v8, 0.0  ;;  %v1985_v11 = vpop.f32.mrb[60].mxu0 }
 0x166   : > { %v1986_v38 = vadd.f32 %v1985_v11, %v3057_v53  ;;  %v1987_v12 = vpop.f32.mrb[61].mxu0 }
 0x167   : > { %v2548_v13 = vpack.c.bf16 %v2190_v10, %v2189_v49  ;;  %v1988_v51 = vadd.f32 %v1987_v12, %v3059_v54  ;;  %v1989_v39 = vpop.f32.mrb[62].mxu0  ;;  %v2026_v14 = vpop.f32.mrb[60].mxu1  ;;  %v2269_v18 = vrot.slane %v2547_v9, %v2698_v7 }
 0x168   : > { %v2051_v15 = vadd.f32 %v3065_v60, %v1986_v38  ;;  %v2027_v16 = vadd.f32 %v2026_v14, %v3061_v55  ;;  %v1990_v17 = vpop.f32.mrb[63].mxu0  ;;  %v2028_v41 = vpop.f32.mrb[61].mxu1 }
 0x169   : > { %v2276_v19 = vrot.slane %v2548_v13, %v2698_v7  ;;  %v2052_v20 = vadd.f32 %v3065_v60, %v1988_v51  ;;  %v2029_v53 = vadd.f32 %v2028_v41, %v3063_v57  ;;  %v2030_v21 = vpop.f32.mrb[62].mxu1 }
 0x16a   : > { %v2191_v54 = vmax.f32 %v2051_v15, 0.0  ;;  %v2053_v22 = vadd.f32 %v3065_v60, %v2027_v16  ;;  %v2031_v23 = vpop.f32.mrb[63].mxu1 }
 0x16b   : > { %v2277_v24 = vcombine.low %v2269_v18, %v2276_v19  ;;  %v2192_v43 = vmax.f32 %v2052_v20, 0.0  ;;  %v2054_v55 = vadd.f32 %v3065_v60, %v2029_v53 }
 0x16c   : > { %v2193_v25 = vmax.f32 %v2053_v22, 0.0 }
 0x16d   : > { %2301 = vst [vmem:[%s3079_s20 + $0x10] sm:$0xff] %v2277_v24  ;;  %v2549_v26 = vpack.c.bf16 %v2192_v43, %v2191_v54  ;;  %v2194_v27 = vmax.f32 %v2054_v55, 0.0 }
 0x16f   : > { %v2550_v29 = vpack.c.bf16 %v2194_v27, %v2193_v25  ;;  %v2286_v3 = vrot.slane %v2549_v26, %v2698_v7 }
 0x171   : > { %v2293_v32 = vrot.slane %v2550_v29, %v2698_v7 }
 0x173   : > { %v2294_v57 = vcombine.low %v2286_v3, %v2293_v32 }
 0x175   : > { %2302 = vst [vmem:[%s3079_s20 + $0x18] sm:$0xff] %v2294_v57 }
 0x176 PF: > { %s20_s11 = sadd.s32 1, %s2614_s11   ;;  %s3128_s30 = smov %s2610_s10 }
 0x177   : > { %p17_p5 = scmp.ge.s32.totalorder %s20_s11, 4   ;;  %s3129_s10 = smov %s3131_s12 }
 0x179   :  { %19 = sbr.rel (!%p17_p5) target bundleno = 2 (0x2), region = 97 }

// kernel: spectral_transform_forward.12
= control target key start
LH: loop header
LB: loop body
LE: loop exit
PB: predicated region body
PF: predicated region fallthrough
CT: control target
= control target key end

     0   :  { %s2394_s24 = smov 0   ;;  %s2396_s25 = smov 0   ;;  %s2597_s0 = inlined_call_operand.vmem [shape: bf16[2,4,16,128], index: 0, kind: input, shape index: {}]   ;;  %s2598_s1 = inlined_call_operand.vmem [shape: bf16[2,4,16,128], index: 1, kind: input, shape index: {}]   ;;  %s2599_s2 = inlined_call_operand.vmem [shape: bf16[16,16], index: 2, kind: input, shape index: {}]   ;;  %s2600_s3 = inlined_call_operand.vmem [shape: bf16[16,16], index: 3, kind: input, shape index: {}]   ;;  %s2601_s4 = inlined_call_operand.vmem [shape: bf16[16,16], index: 4, kind: input, shape index: {}]   ;;  %s2602_s5 = inlined_call_operand.vmem [shape: bf16[128,16], index: 5, kind: input, shape index: {}]   ;;  %s2603_s6 = inlined_call_operand.vmem [shape: bf16[128,16], index: 6, kind: input, shape index: {}]   ;;  %s2604_s7 = inlined_call_operand.vmem [shape: bf16[2,64,16], index: 7, kind: output, shape index: {}]  }
   0x1   :  { %s2398_s26 = smov 0  }
   0x2 LB: > { %s29_s27 = sadd.s32 1, %s2345_s25  ;;  %p1890_p0 = scmp.ge.s32.totalorder %s2349_s26, 1  ;;  %s2349_s26 = sphi %s2398_s26, %s17_s26   ;;  %s2345_s25 = sphi %s2396_s25, %s2606_s25   ;;  %s2341_s24 = sphi %s2394_s24, %s2605_s24  }
   0x3   : > { %p31_p1 = scmp.ge.s32.totalorder %s29_s27, 2  ;;  %p277_p2 = scmp.lt.s32.totalorder %s2349_s26, 3 }
   0x5   : > { %s2608_s27 = smov (%p31_p1, %s29_s27), 0  ;;  %p278_p3 = pnand %p1890_p0, %p277_p2 }
   0x6   : > { %p329_p4 = scmp.lt.s32.totalorder (!%p278_p3), %s2341_s24, 1  ;;  %v2351_v0 = vmov (!%p278_p3), 0.0|0.0   ;;  %vm2352_vm0 = vmmov (!%p278_p3), 0   ;;  %v2353_v1 = vmov (!%p278_p3), 0.0   ;;  %v2299_v2 = vld [vmem:[%s2599_s2] sm:$0xff] (!%p278_p3)   ;;  %vm376_vm1 = vcmask (!%p278_p3), 130048  }
   0x7   : > { %281 = sbr.rel (%p278_p3) target bundleno = 498 (0x1f2), region = 48  ;;  %2228 = vmatprep.subr.bf16.mxu0 (!%p278_p3), %v2351_v0  ;;  %2231 = vmatprep.subr.bf16.mxu1 (!%p278_p3), %v2351_v0  ;;  %v2300_v9 = vld [vmem:[%s2600_s3] sm:$0xff] (!%p278_p3)   ;;  %v2312_v52 = vld [vmem:[%s2602_s5 + $0x8] sm:$0xff] (!%p278_p3)   ;;  %v2313_v54 = vld [vmem:[%s2602_s5 + $0x10] sm:$0xff] (!%p278_p3)   ;;  %vm1766_vm2 = vcmask (!%p278_p3), 125952  }
   0x8   : > { %2080 = vmatprep.mubr.msk.bf16.mxu0 (!%p278_p3), %vm2352_vm0, %v2353_v1  ;;  %2088 = vmatprep.mubr.msk.bf16.mxu1 (!%p278_p3), %vm2352_vm0, %v2353_v1  ;;  %v2301_v21 = vld [vmem:[%s2601_s4] sm:$0xff] (!%p278_p3)   ;;  %v2316_v53 = vld [vmem:[%s2603_s6 + $0x8] sm:$0xff] (!%p278_p3)   ;;  %v2318_v55 = vld [vmem:[%s2603_s6 + $0x10] sm:$0xff] (!%p278_p3)  }
   0x9   : > { %v2302_v22 = vld [vmem:[%s2599_s2] sm:$0xff] (!%p278_p3)   ;;  %v2315_v56 = vld [vmem:[%s2602_s5 + $0x18] sm:$0xff] (!%p278_p3)   ;;  %v2319_v60 = vld [vmem:[%s2602_s5 + $0x28] sm:$0xff] (!%p278_p3)  }
   0xa   : > { %v2303_v24 = vld [vmem:[%s2600_s3] sm:$0xff] (!%p278_p3)   ;;  %v2320_v57 = vld [vmem:[%s2603_s6 + $0x18] sm:$0xff] (!%p278_p3)   ;;  %v2321_v61 = vld [vmem:[%s2602_s5 + $0x30] sm:$0xff] (!%p278_p3)  }
   0xb   : > { %v2304_v27 = vld [vmem:[%s2601_s4] sm:$0xff] (!%p278_p3)   ;;  %v2323_v62 = vld [vmem:[%s2602_s5 + $0x38] sm:$0xff] (!%p278_p3)   ;;  %v2324_v63 = vld [vmem:[%s2603_s6 + $0x28] sm:$0xff] (!%p278_p3)  }
   0xc   : > { %v2305_v35 = vld [vmem:[%s2599_s2] sm:$0xff] (!%p278_p3)  }
   0xd   : > { %v2306_v36 = vld [vmem:[%s2600_s3] sm:$0xff] (!%p278_p3)  }
   0xe   : > { %s2610_s24 = smov (!%p329_p4, %s2341_s24), 1  ;;  %v2307_v45 = vld [vmem:[%s2601_s4] sm:$0xff]  }
   0xf   : > { %s2418_s28 = sshll.u32 %s2610_s24, 5  ;;  %v2308_v46 = vld [vmem:[%s2599_s2] sm:$0xff]  }
  0x10   : > { %s2424_s8 = scalar_lea.vmem %s2597_s0, %s2418_s28  ;;  %s2434_s13 = scalar_lea.vmem %s2598_s1, %s2418_s28  ;;  %v2311_v48 = vld [vmem:[%s2602_s5] sm:$0xff]  }
  0x11   : > { %v1971_v3 = vld [vmem:[%s2424_s8] sm:$0xff]   ;;  %v2002_v4 = vld [vmem:[%s2424_s8 + $0x8] sm:$0xff]   ;;  %v2005_v25 = vld [vmem:[%s2434_s13 + $0x10] sm:$0xff]  }
  0x12   : > { %v1972_v5 = vunpack.c.l.bf16 %v1971_v3  ;;  %v1973_v6 = vunpack.c.h.bf16 %v1971_v3  ;;  %2230 = vmatpush3.bf16.msra.mxu0 %v1971_v3  ;;  %v1975_v7 = vld [vmem:[%s2434_s13] sm:$0xff]   ;;  %v2003_v8 = vld [vmem:[%s2434_s13 + $0x8] sm:$0xff]   ;;  %v1980_v10 = vunpack.c.l.bf16 %v2002_v4  ;;  %v1981_v11 = vunpack.c.h.bf16 %v2002_v4  ;;  %v2004_v26 = vld [vmem:[%s2424_s8 + $0x10] sm:$0xff]  }
  0x13   : > { %v1976_v12 = vunpack.c.l.bf16 %v1975_v7  ;;  %v1977_v13 = vunpack.c.h.bf16 %v1975_v7  ;;  %2233 = vmatpush3.bf16.msra.mxu1 %v1975_v7  ;;  %v1984_v14 = vunpack.c.l.bf16 %v2003_v8  ;;  %v1985_v15 = vunpack.c.h.bf16 %v2003_v8  ;;  %2234 = vmatprep.subr.bf16.mxu0 %v2351_v0  ;;  %v2007_v32 = vld [vmem:[%s2434_s13 + $0x18] sm:$0xff]   ;;  %v2314_v49 = vld [vmem:[%s2603_s6] sm:$0xff]   ;;  %s2570_s13 = scalar_lea.vmem %s2604_s7, %s2418_s28 }
  0x14   : > { %2237 = vmatprep.subr.bf16.mxu1 %v2351_v0  ;;  %v1992_v28 = vunpack.c.l.bf16 %v2005_v25  ;;  %v1993_v29 = vunpack.c.h.bf16 %v2005_v25  ;;  %v1988_v30 = vunpack.c.l.bf16 %v2004_v26  ;;  %v1989_v31 = vunpack.c.h.bf16 %v2004_v26  ;;  %v2006_v37 = vld [vmem:[%s2424_s8 + $0x18] sm:$0xff]   ;;  %v2309_v50 = vld [vmem:[%s2600_s3] sm:$0xff]  }
  0x15   : > { %v538_v16 = vadd.f32 %v1976_v12, %v1972_v5  ;;  %v539_v17 = vadd.f32 %v1977_v13, %v1973_v6  ;;  %2081 = vmatmul.mubr.msk.bf16.vlgmr.msra.gmra.mrb[0].mxu0 %vm376_vm1, %v2299_v2  ;;  %v809_v18 = vadd.f32 %v1984_v14, %v1980_v10  ;;  %v810_v19 = vadd.f32 %v1985_v15, %v1981_v11  ;;  %v2310_v51 = vld [vmem:[%s2601_s4] sm:$0xff]  }
  0x16   : > { %2089 = vmatmul.mubr.msk.bf16.vlgmr.msra.gmra.mrb[0].mxu1 %vm376_vm1, %v2300_v9  ;;  %2096 = vmatprep.mubr.msk.bf16.mxu0 %vm2352_vm0, %v2353_v1  ;;  %v1080_v33 = vadd.f32 %v1992_v28, %v1988_v30  ;;  %v1081_v34 = vadd.f32 %v1993_v29, %v1989_v31  ;;  %v1996_v39 = vunpack.c.l.bf16 %v2006_v37  ;;  %v1997_v40 = vunpack.c.h.bf16 %v2006_v37  ;;  %v2317_v58 = vld [vmem:[%s2602_s5 + $0x20] sm:$0xff]  }
  0x17   : > { %2239 = vmatpush3.bf16.msra.mxu1 %v2002_v4  ;;  %v2235_v20 = vpack.c.bf16 %v539_v17, %v538_v16  ;;  %2104 = vmatprep.mubr.msk.bf16.mxu1 %vm2352_vm0, %v2353_v1  ;;  %v2244_v23 = vpack.c.bf16 %v810_v19, %v809_v18  ;;  %v2000_v41 = vunpack.c.l.bf16 %v2007_v32  ;;  %v2001_v42 = vunpack.c.h.bf16 %v2007_v32  ;;  %v2322_v59 = vld [vmem:[%s2603_s6 + $0x20] sm:$0xff]  }
  0x18   : > { %2243 = vmatprep.subr.bf16.mxu1 %v2351_v0  ;;  %v2253_v38 = vpack.c.bf16 %v1081_v34, %v1080_v33 }
  0x19   : > { %2236 = vmatpush3.bf16.msra.mxu0 %v2235_v20  ;;  %v1351_v43 = vadd.f32 %v2000_v41, %v1996_v39  ;;  %v1352_v44 = vadd.f32 %v2001_v42, %v1997_v40 }
  0x1a   : > { %2240 = vmatprep.subr.bf16.mxu0 %v2351_v0 }
  0x1b   : > { %v2262_v47 = vpack.c.bf16 %v1352_v44, %v1351_v43 }
  0x1d   : > { %2097 = vmatmul.mubr.msk.bf16.vlgmr.msra.gmra.mrb[4].mxu0 %vm376_vm1, %v2301_v21 }
  0x1e   : > { %2105 = vmatmul.mubr.msk.bf16.vlgmr.msra.gmra.mrb[4].mxu1 %vm376_vm1, %v2302_v22  ;;  %2242 = vmatpush3.bf16.msra.mxu0 %v2003_v8 }
  0x1f   : > { %2245 = vmatpush3.bf16.msra.mxu1 %v2244_v23  ;;  %2112 = vmatprep.mubr.msk.bf16.mxu0 %vm2352_vm0, %v2353_v1 }
  0x20   : > { %2120 = vmatprep.mubr.msk.bf16.mxu1 %vm2352_vm0, %v2353_v1  ;;  %2249 = vmatprep.subr.bf16.mxu1 %v2351_v0 }
  0x21   : > { %2246 = vmatprep.subr.bf16.mxu0 %v2351_v0 }
  0x25   : > { %2113 = vmatmul.mubr.msk.bf16.vlgmr.msra.gmra.mrb[8].mxu0 %vm376_vm1, %v2303_v24 }
  0x26   : > { %2121 = vmatmul.mubr.msk.bf16.vlgmr.msra.gmra.mrb[8].mxu1 %vm376_vm1, %v2304_v27  ;;  %2248 = vmatpush3.bf16.msra.mxu0 %v2004_v26 }
  0x27   : > { %2251 = vmatpush3.bf16.msra.mxu1 %v2005_v25  ;;  %2128 = vmatprep.mubr.msk.bf16.mxu0 %vm2352_vm0, %v2353_v1 }
  0x28   : > { %2136 = vmatprep.mubr.msk.bf16.mxu1 %vm2352_vm0, %v2353_v1  ;;  %2255 = vmatprep.subr.bf16.mxu1 %v2351_v0 }
  0x29   : > { %2252 = vmatprep.subr.bf16.mxu0 %v2351_v0 }
  0x2d   : > { %2129 = vmatmul.mubr.msk.bf16.vlgmr.msra.gmra.mrb[12].mxu0 %vm376_vm1, %v2305_v35 }
  0x2e   : > { %2137 = vmatmul.mubr.msk.bf16.vlgmr.msra.gmra.mrb[12].mxu1 %vm376_vm1, %v2306_v36  ;;  %2254 = vmatpush3.bf16.msra.mxu0 %v2253_v38 }
  0x2f   : > { %2257 = vmatpush3.bf16.msra.mxu1 %v2006_v37  ;;  %2144 = vmatprep.mubr.msk.bf16.mxu0 %vm2352_vm0, %v2353_v1 }
  0x30   : > { %2152 = vmatprep.mubr.msk.bf16.mxu1 %vm2352_vm0, %v2353_v1  ;;  %2261 = vmatprep.subr.bf16.mxu1 %v2351_v0 }
  0x31   : > { %2258 = vmatprep.subr.bf16.mxu0 %v2351_v0  ;;  %v2325_v0 = vld [vmem:[%s2603_s6 + $0x30] sm:$0xff]  }
  0x35   : > { %2145 = vmatmul.mubr.msk.bf16.vlgmr.msra.gmra.mrb[16].mxu0 %vm376_vm1, %v2307_v45 }
  0x36   : > { %2153 = vmatmul.mubr.msk.bf16.vlgmr.msra.gmra.mrb[16].mxu1 %vm376_vm1, %v2308_v46  ;;  %2260 = vmatpush3.bf16.msra.mxu0 %v2007_v32 }
  0x37   : > { %2263 = vmatpush3.bf16.msra.mxu1 %v2262_v47  ;;  %2160 = vmatprep.mubr.msk.bf16.mxu0 %vm2352_vm0, %v2353_v1 }
  0x38   : > { %2168 = vmatprep.mubr.msk.bf16.mxu1 %vm2352_vm0, %v2353_v1  ;;  %2200 = vmatprep.subr.bf16.mxu0 %v2311_v48  ;;  %v2326_v1 = vld [vmem:[%s2603_s6 + $0x38] sm:$0xff]  }
  0x39   : > { %2172 = vmatprep.subr.bf16.mxu1 %v2314_v49 }
  0x3d   : > { %2161 = vmatmul.mubr.msk.bf16.vlgmr.msra.gmra.mrb[20].mxu0 %vm376_vm1, %v2309_v50 }
  0x3e   : > { %2169 = vmatmul.mubr.msk.bf16.vlgmr.msra.gmra.mrb[20].mxu1 %vm376_vm1, %v2310_v51  ;;  %2201 = vmatpush3.bf16.msra.mxu0 %v2311_v48 }
  0x3f   : > { %2202 = vmatprep.subr.bf16.mxu0 %v2312_v52  ;;  %2173 = vmatpush3.bf16.msra.mxu1 %v2314_v49 }
  0x40   : > { %2174 = vmatprep.subr.bf16.mxu1 %v2316_v53 }
  0x42   : > { %2203 = vmatpush3.bf16.msra.mxu0 %v2312_v52 }
  0x43   : > { %2204 = vmatprep.subr.bf16.mxu0 %v2313_v54  ;;  %2175 = vmatpush3.bf16.msra.mxu1 %v2316_v53 }
  0x44   : > { %2176 = vmatprep.subr.bf16.mxu1 %v2318_v55 }
  0x46   : > { %2205 = vmatpush3.bf16.msra.mxu0 %v2313_v54 }
  0x47   : > { %2206 = vmatprep.subr.bf16.mxu0 %v2315_v56  ;;  %2177 = vmatpush3.bf16.msra.mxu1 %v2318_v55 }
  0x48   : > { %2178 = vmatprep.subr.bf16.mxu1 %v2320_v57 }
  0x4a   : > { %2207 = vmatpush3.bf16.msra.mxu0 %v2315_v56 }
  0x4b   : > { %2208 = vmatprep.subr.bf16.mxu0 %v2317_v58  ;;  %2179 = vmatpush3.bf16.msra.mxu1 %v2320_v57 }
  0x4c   : > { %2180 = vmatprep.subr.bf16.mxu1 %v2322_v59 }
  0x4e   : > { %2209 = vmatpush3.bf16.msra.mxu0 %v2317_v58 }
  0x4f   : > { %2210 = vmatprep.subr.bf16.mxu0 %v2319_v60  ;;  %2181 = vmatpush3.bf16.msra.mxu1 %v2322_v59 }
  0x50   : > { %2182 = vmatprep.subr.bf16.mxu1 %v2324_v63 }
  0x52   : > { %2211 = vmatpush3.bf16.msra.mxu0 %v2319_v60 }
  0x53   : > { %2212 = vmatprep.subr.bf16.mxu0 %v2321_v61  ;;  %2183 = vmatpush3.bf16.msra.mxu1 %v2324_v63 }
  0x54   : > { %2184 = vmatprep.subr.bf16.mxu1 %v2325_v0 }
  0x56   : > { %2213 = vmatpush3.bf16.msra.mxu0 %v2321_v61 }
  0x57   : > { %2214 = vmatprep.subr.bf16.mxu0 %v2323_v62  ;;  %2185 = vmatpush3.bf16.msra.mxu1 %v2325_v0 }
  0x58   : > { %2186 = vmatprep.subr.bf16.mxu1 %v2326_v1 }
  0x5a   : > { %2215 = vmatpush3.bf16.msra.mxu0 %v2323_v62 }
  0x5b   : > { %2187 = vmatpush3.bf16.msra.mxu1 %v2326_v1 }
  0xe8   : > { %v446_v2 = vpop.f32.mrb[0].mxu0 }
  0xe9   : > { %v529_v3 = vpop.f32.mrb[0].mxu1  ;;  %v2082_v4 = vpop.f32.mrb[1].mxu0 }
  0xea   : > { %v621_v5 = vsub.f32 %v446_v2, %v529_v3  ;;  %v2090_v6 = vpop.f32.mrb[1].mxu1  ;;  %v449_v7 = vpop.f32.mrb[2].mxu0 }
  0xeb   : > { %v532_v8 = vpop.f32.mrb[2].mxu1  ;;  %v2083_v9 = vpop.f32.mrb[3].mxu0 }
  0xec   : > { %v622_v10 = vsub.f32 %v449_v7, %v532_v8  ;;  %v2091_v11 = vpop.f32.mrb[3].mxu1  ;;  %2216 = vmatprep.mubr.f32.mxu0 %v621_v5 }
  0xee   : > { %2217 = vmatmul.mubr.f32.vlgmr.msra.gmra.mrb[24].mxu0 %v622_v10 }
  0xf0   : > { %v614_v12 = vpop.f32.mrb[4].mxu0 }
  0xf1   : > { %v625_v13 = vsub.f32 %v614_v12, %v446_v2  ;;  %v717_v14 = vpop.f32.mrb[4].mxu1  ;;  %v2098_v15 = vpop.f32.mrb[5].mxu0 }
  0xf2   : > { %v2106_v16 = vpop.f32.mrb[5].mxu1  ;;  %v617_v17 = vpop.f32.mrb[6].mxu0 }
  0xf3   : > { %v627_v18 = vsub.f32 %v625_v13, %v529_v3  ;;  %v626_v19 = vsub.f32 %v617_v17, %v449_v7  ;;  %v720_v20 = vpop.f32.mrb[6].mxu1  ;;  %v2099_v21 = vpop.f32.mrb[7].mxu0 }
  0xf4   : > { %v2107_v22 = vpop.f32.mrb[7].mxu1 }
  0xf5   : > { %v628_v23 = vsub.f32 %v626_v19, %v532_v8  ;;  %2188 = vmatprep.mubr.f32.mxu1 %v627_v18 }
  0xf7   : > { %2189 = vmatmul.mubr.f32.vlgmr.msra.gmra.mrb[24].mxu1 %v628_v23 }
  0xf8   : > { %v800_v24 = vpop.f32.mrb[8].mxu0 }
  0xf9   : > { %v892_v25 = vsub.f32 %v717_v14, %v800_v24  ;;  %v885_v26 = vpop.f32.mrb[8].mxu1  ;;  %v2114_v27 = vpop.f32.mrb[9].mxu0 }
  0xfa   : > { %v896_v28 = vsub.f32 %v885_v26, %v717_v14  ;;  %v2122_v29 = vpop.f32.mrb[9].mxu1  ;;  %v803_v30 = vpop.f32.mrb[10].mxu0 }
  0xfb   : > { %v893_v31 = vsub.f32 %v720_v20, %v803_v30  ;;  %v888_v32 = vpop.f32.mrb[10].mxu1  ;;  %v2115_v33 = vpop.f32.mrb[11].mxu0  ;;  %2219 = vmatprep.mubr.f32.mxu0 %v892_v25 }
  0xfc   : > { %v898_v34 = vsub.f32 %v896_v28, %v800_v24  ;;  %v897_v35 = vsub.f32 %v888_v32, %v720_v20  ;;  %v2123_v36 = vpop.f32.mrb[11].mxu1 }
  0xfd   : > { %2220 = vmatmul.mubr.f32.gmra.mrb[26].mxu0 %v893_v31 }
  0xfe   : > { %v899_v37 = vsub.f32 %v897_v35, %v803_v30  ;;  %2191 = vmatprep.mubr.f32.mxu1 %v898_v34 }
 0x100   : > { %2192 = vmatmul.mubr.f32.gmra.mrb[26].mxu1 %v899_v37  ;;  %v988_v38 = vpop.f32.mrb[12].mxu0 }
 0x101   : > { %v1071_v39 = vpop.f32.mrb[12].mxu1  ;;  %v2130_v40 = vpop.f32.mrb[13].mxu0 }
 0x102   : > { %v1163_v41 = vsub.f32 %v988_v38, %v1071_v39  ;;  %v2138_v42 = vpop.f32.mrb[13].mxu1  ;;  %v991_v43 = vpop.f32.mrb[14].mxu0 }
 0x103   : > { %v1074_v44 = vpop.f32.mrb[14].mxu1  ;;  %v2131_v45 = vpop.f32.mrb[15].mxu0 }
 0x104   : > { %v1164_v46 = vsub.f32 %v991_v43, %v1074_v44  ;;  %v2139_v47 = vpop.f32.mrb[15].mxu1  ;;  %2222 = vmatprep.mubr.f32.mxu0 %v1163_v41 }
 0x106   : > { %2223 = vmatmul.mubr.f32.gmra.mrb[28].mxu0 %v1164_v46 }
 0x108   : > { %v1156_v48 = vpop.f32.mrb[16].mxu0 }
 0x109   : > { %v1167_v49 = vsub.f32 %v1156_v48, %v988_v38  ;;  %v1259_v50 = vpop.f32.mrb[16].mxu1  ;;  %v2146_v51 = vpop.f32.mrb[17].mxu0 }
 0x10a   : > { %v2154_v52 = vpop.f32.mrb[17].mxu1  ;;  %v1159_v53 = vpop.f32.mrb[18].mxu0 }
 0x10b   : > { %v1169_v54 = vsub.f32 %v1167_v49, %v1071_v39  ;;  %v1168_v55 = vsub.f32 %v1159_v53, %v991_v43  ;;  %v1262_v56 = vpop.f32.mrb[18].mxu1  ;;  %v2147_v57 = vpop.f32.mrb[19].mxu0 }
 0x10c   : > { %v2155_v58 = vpop.f32.mrb[19].mxu1 }
 0x10d   : > { %v1170_v59 = vsub.f32 %v1168_v55, %v1074_v44  ;;  %2194 = vmatprep.mubr.f32.mxu1 %v1169_v54 }
 0x10f   : > { %2195 = vmatmul.mubr.f32.gmra.mrb[28].mxu1 %v1170_v59 }
 0x110   : > { %v1342_v60 = vpop.f32.mrb[20].mxu0 }
 0x111   : > { %v1434_v61 = vsub.f32 %v1259_v50, %v1342_v60  ;;  %v1427_v62 = vpop.f32.mrb[20].mxu1  ;;  %v2162_v63 = vpop.f32.mrb[21].mxu0 }
 0x112   : > { %v1438_v0 = vsub.f32 %v1427_v62, %v1259_v50  ;;  %v2170_v1 = vpop.f32.mrb[21].mxu1  ;;  %v1345_v2 = vpop.f32.mrb[22].mxu0 }
 0x113   : > { %v1435_v3 = vsub.f32 %v1262_v56, %v1345_v2  ;;  %v1430_v4 = vpop.f32.mrb[22].mxu1  ;;  %v2163_v5 = vpop.f32.mrb[23].mxu0  ;;  %2225 = vmatprep.mubr.f32.mxu0 %v1434_v61 }
 0x114   : > { %v1440_v6 = vsub.f32 %v1438_v0, %v1342_v60  ;;  %v1439_v7 = vsub.f32 %v1430_v4, %v1262_v56  ;;  %v2171_v8 = vpop.f32.mrb[23].mxu1 }
 0x115   : > { %2226 = vmatmul.mubr.f32.gmra.mrb[30].mxu0 %v1435_v3 }
 0x116   : > { %v1441_v9 = vsub.f32 %v1439_v7, %v1345_v2  ;;  %2197 = vmatprep.mubr.f32.mxu1 %v1440_v6 }
 0x118   : > { %2198 = vmatmul.mubr.f32.gmra.mrb[30].mxu1 %v1441_v9 }
 0x1c1   : > { %v2218_v10 = vpop.f32.mrb[24].mxu0 }
 0x1c2   : > { %v1695_v11 = vpop.f32.mrb[25].mxu0 }
 0x1ca   : > { %v2190_v12 = vpop.f32.mrb[24].mxu1 }
 0x1cb   : > { %v1701_v13 = vadd.f32 %v2218_v10, %v2190_v12  ;;  %v1574_v14 = vpop.f32.mrb[25].mxu1 }
 0x1cc   : > { %v1696_v15 = vadd.f32 %v1695_v11, %v1574_v14 }
 0x1cd   : > { %v1963_v16 = vpack.c.bf16 %v1701_v13, %v1701_v13 }
 0x1ce   : > { %v1962_v17 = vpack.c.bf16 %v1696_v15, %v1696_v15 }
 0x1cf   : > { %1768 = vst.msk [vmem:[%s2570_s13 + $0x4] sm:$0xf] %vm1766_vm2, %v1963_v16 }
 0x1d0   : > { %1767 = vst.msk [vmem:[%s2570_s13] sm:$0xf] %vm1766_vm2, %v1962_v17  ;;  %v2221_v18 = vpop.f32.mrb[26].mxu0 }
 0x1d1   : > { %v1705_v19 = vpop.f32.mrb[27].mxu0 }
 0x1d3   : > { %v2193_v20 = vpop.f32.mrb[26].mxu1 }
 0x1d4   : > { %v1711_v21 = vadd.f32 %v2221_v18, %v2193_v20  ;;  %v1584_v22 = vpop.f32.mrb[27].mxu1 }
 0x1d5   : > { %v1706_v23 = vadd.f32 %v1705_v19, %v1584_v22 }
 0x1d6   : > { %v1965_v24 = vpack.c.bf16 %v1711_v21, %v1711_v21 }
 0x1d7   : > { %v1964_v25 = vpack.c.bf16 %v1706_v23, %v1706_v23 }
 0x1d8   : > { %1770 = vst.msk [vmem:[%s2570_s13 + $0xc] sm:$0xf] %vm1766_vm2, %v1965_v24 }
 0x1d9   : > { %1769 = vst.msk [vmem:[%s2570_s13 + $0x8] sm:$0xf] %vm1766_vm2, %v1964_v25  ;;  %v2224_v26 = vpop.f32.mrb[28].mxu0 }
 0x1da   : > { %v1715_v27 = vpop.f32.mrb[29].mxu0 }
 0x1e2   : > { %v2196_v28 = vpop.f32.mrb[28].mxu1 }
 0x1e3   : > { %v1721_v29 = vadd.f32 %v2224_v26, %v2196_v28  ;;  %v1594_v30 = vpop.f32.mrb[29].mxu1 }
 0x1e4   : > { %v1716_v31 = vadd.f32 %v1715_v27, %v1594_v30 }
 0x1e5   : > { %v1967_v32 = vpack.c.bf16 %v1721_v29, %v1721_v29 }
 0x1e6   : > { %v1966_v33 = vpack.c.bf16 %v1716_v31, %v1716_v31 }
 0x1e7   : > { %1772 = vst.msk [vmem:[%s2570_s13 + $0x14] sm:$0xf] %vm1766_vm2, %v1967_v32 }
 0x1e8   : > { %1771 = vst.msk [vmem:[%s2570_s13 + $0x10] sm:$0xf] %vm1766_vm2, %v1966_v33  ;;  %v2227_v34 = vpop.f32.mrb[30].mxu0 }
 0x1e9   : > { %v1725_v35 = vpop.f32.mrb[31].mxu0 }
 0x1eb   : > { %v2199_v36 = vpop.f32.mrb[30].mxu1 }
 0x1ec   : > { %v1731_v37 = vadd.f32 %v2227_v34, %v2199_v36  ;;  %v1604_v38 = vpop.f32.mrb[31].mxu1 }
 0x1ed   : > { %v1726_v39 = vadd.f32 %v1725_v35, %v1604_v38 }
 0x1ee   : > { %v1969_v40 = vpack.c.bf16 %v1731_v37, %v1731_v37 }
 0x1ef   : > { %v1968_v41 = vpack.c.bf16 %v1726_v39, %v1726_v39 }
 0x1f0   : > { %1774 = vst.msk [vmem:[%s2570_s13 + $0x1c] sm:$0xf] %vm1766_vm2, %v1969_v40 }
 0x1f1   : > { %1773 = vst.msk [vmem:[%s2570_s13 + $0x18] sm:$0xf] %vm1766_vm2, %v1968_v41 }
 0x1f2 PF: > { %s17_s26 = sadd.s32 1, %s2349_s26   ;;  %s2605_s24 = smov %s2345_s25 }
 0x1f3   : > { %p14_p5 = scmp.ge.s32.totalorder %s17_s26, 4   ;;  %s2606_s25 = smov %s2608_s27 }
 0x1f5   :  { %16 = sbr.rel (!%p14_p5) target bundleno = 2 (0x2), region = 87 }

</bundles_post_ra>
